<compile_context>
chip_gen: v7x
topology: tpu7x:2x2x1
jax: 0.10.0
libtpu: 0.0.40
codegen_flags: <defaults>
</compile_context>

<pallas_src>
import jax
import jax.numpy as jnp
from jax.experimental import pallas as pl
from jax.experimental.pallas import tpu as pltpu


_VMEM_LIMIT = 32 * 1024 * 1024      # explicit scoped-VMEM cap; safe on v5e/v6e/v7x


# --------------------------------------------------------------------------- #
# helpers
# --------------------------------------------------------------------------- #
def _round_up(x, m):
    return ((x + m - 1) // m) * m


def _pick_tile(n, candidates):
    for c in candidates:
        if n >= c and n % c == 0:
            return c
    return None


# --------------------------------------------------------------------------- #
# Pallas kernels
# --------------------------------------------------------------------------- #
def _matmul_kernel(a_ref, w_ref, o_ref, acc_ref):
    """bf16 MXU matmul with f32 accumulation over the K grid axis."""
    k = pl.program_id(2)

    @pl.when(k == 0)
    def _():
        acc_ref[...] = jnp.zeros_like(acc_ref)

    acc_ref[...] += jnp.dot(a_ref[...], w_ref[...],
                            preferred_element_type=jnp.float32)

    @pl.when(k == pl.num_programs(2) - 1)
    def _():
        o_ref[...] = acc_ref[...].astype(o_ref.dtype)


def _scale_shift_relu_kernel(y_ref, scale_ref, shift_ref, o_ref):
    y = y_ref[...].astype(jnp.float32)
    o_ref[...] = jnp.maximum(y * scale_ref[...] + shift_ref[...],
                             0.0).astype(o_ref.dtype)


# --------------------------------------------------------------------------- #
# Pallas wrappers
# --------------------------------------------------------------------------- #
def matmul_bf16(a, w, out_dtype=jnp.bfloat16):
    """(M, K) @ (K, Np) -> (M, Np).  Np must be a multiple of 128 (lane-dense)."""
    M0, K = a.shape
    Kw, Np = w.shape
    assert Kw == K and Np % 128 == 0
    a = a.astype(jnp.bfloat16)
    w = w.astype(jnp.bfloat16)

    M = M0
    if M % 16:                                    # only the tiny-M layer-1 path
        M = _round_up(M0, 16)
        a = jnp.pad(a, ((0, M - M0), (0, 0)))

    # VMEM budget: acc(tm*tn*4) + 2x A/W/out blocks stays well under 8 MiB even
    # at tm=512 / tn=1024 / tk=512, which fits v7x's 64 MiB physical VMEM.
    tm = _pick_tile(M, (512, 256, 128, 64, 32, 16)) or M
    tn = _pick_tile(Np, (1024, 896, 768, 640, 512, 384, 256, 128))
    tk = _pick_tile(K, (512, 256, 128)) or K      # small / odd K: single K block

    out = pl.pallas_call(
        _matmul_kernel,
        out_shape=jax.ShapeDtypeStruct((M, Np), out_dtype),
        grid_spec=pltpu.PrefetchScalarGridSpec(
            num_scalar_prefetch=0,
            grid=(M // tm, Np // tn, K // tk),
            in_specs=[pl.BlockSpec((tm, tk), lambda i, j, k: (i, k)),
                      pl.BlockSpec((tk, tn), lambda i, j, k: (k, j))],
            out_specs=pl.BlockSpec((tm, tn), lambda i, j, k: (i, j)),
            scratch_shapes=[pltpu.VMEM((tm, tn), jnp.float32)]),
        compiler_params=pltpu.CompilerParams(
            dimension_semantics=("parallel", "parallel", "arbitrary"),
            vmem_limit_bytes=_VMEM_LIMIT),
    )(a, w)
    return out[:M0] if M != M0 else out


def scale_shift_relu(y, scale, shift, out_dtype=jnp.bfloat16):
    """Per-channel y*scale + shift then ReLU on an (M, C) slab (HBM-bound)."""
    M0, C = y.shape
    scale = scale.reshape(1, C).astype(jnp.float32)
    shift = shift.reshape(1, C).astype(jnp.float32)

    tm = _pick_tile(M0, (512, 256, 128, 64, 32, 16, 8))
    pad = 0
    if tm is None:
        tm = _round_up(max(M0, 8), 8)
        pad = tm - M0
        if pad:
            y = jnp.pad(y, ((0, pad), (0, 0)))
    Mp = M0 + pad

    out = pl.pallas_call(
        _scale_shift_relu_kernel,
        out_shape=jax.ShapeDtypeStruct((Mp, C), out_dtype),
        grid_spec=pltpu.PrefetchScalarGridSpec(
            num_scalar_prefetch=0,
            grid=(Mp // tm,),
            in_specs=[pl.BlockSpec((tm, C), lambda i: (i, 0)),
                      pl.BlockSpec((1, C), lambda i: (0, 0)),
                      pl.BlockSpec((1, C), lambda i: (0, 0))],
            out_specs=pl.BlockSpec((tm, C), lambda i: (i, 0))),
        compiler_params=pltpu.CompilerParams(
            dimension_semantics=("parallel",),
            vmem_limit_bytes=_VMEM_LIMIT),
    )(y, scale, shift)
    return out[:M0] if pad else out


# --------------------------------------------------------------------------- #
# BatchNorm scalar math (per-channel, tiny, plain JAX)
# --------------------------------------------------------------------------- #
def bn_scale_shift(s, ss, count, gamma, beta, eps=1e-5):
    # Training-mode BN (biased variance).  f32 tree-reduced sums; the clamp
    # guards the E[x^2]-E[x]^2 cancellation (review correctness note).
    s = s.astype(jnp.float32)
    ss = ss.astype(jnp.float32)
    mean = s / count
    var = jnp.maximum(ss / count - mean * mean, 0.0)
    scale = gamma.astype(jnp.float32) * jax.lax.rsqrt(var + eps)
    shift = beta.astype(jnp.float32) - mean * scale
    return scale, shift


# --------------------------------------------------------------------------- #
# stride-2 ConvTranspose2d tap bookkeeping (k=4, s=2, p=1):  oy = 2*iy - 1 + ky
#   even oy = 2h   <- (iy = h,   ky = 1) and (iy = h-1, ky = 3)
#   odd  oy = 2h+1 <- (iy = h,   ky = 2) and (iy = h+1, ky = 0)
# _PAR_OFF holds 1-padded source offsets (1 == no shift), _PAR_KY the kernel taps.
# --------------------------------------------------------------------------- #
_PAR_OFF = {0: (1, 0), 1: (1, 2)}
_PAR_KY = {0: (1, 3), 1: (2, 0)}


def _shift_tap(p, ro, co, H, W):
    """Read plane p at (h + ro - 1, w + co - 1), zeros outside [0,H)x[0,W)."""
    pp = jnp.pad(p, ((0, 0), (1, 1), (1, 1), (0, 0)))
    return pp[:, ro:ro + H, co:co + W, :]


def _interleave(planes, N, H, W, C):
    """planes[py*2+px]: (N,H,W,C) -> (N,2H,2W,C) with out[2h+py, 2w+px] = plane."""
    row0 = jnp.stack([planes[0], planes[1]], axis=3)     # (N,H,W,2,C)
    row1 = jnp.stack([planes[2], planes[3]], axis=3)
    full = jnp.stack([row0, row1], axis=2)               # (N,H,2,W,2,C)
    return full.reshape(N, 2 * H, 2 * W, C)


# --------------------------------------------------------------------------- #
# parameter init + one-time GEMM-layout precompute
# --------------------------------------------------------------------------- #
def init_params(key, z_dim, d_dim):
    chans = [z_dim, d_dim * 32, d_dim * 16, d_dim * 8, d_dim * 4, d_dim * 2, 3]
    params = []
    for i in range(6):
        key, k1, k2, k3, k4 = jax.random.split(key, 5)
        cin, cout = chans[i], chans[i + 1]
        W = 0.05 * jax.random.normal(k1, (cin, cout, 4, 4), jnp.float32)
        b = 0.05 * jax.random.normal(k2, (cout,), jnp.float32)
        gamma = 1.0 + 0.1 * jax.random.normal(k3, (cout,), jnp.float32)
        beta = 0.1 * jax.random.normal(k4, (cout,), jnp.float32)
        params.append((W, b, gamma, beta))
    return params


def prepare_params(params):
    """GEMM-layout weights: (cin, cout, 4, 4) -> (cin, 16*cpad) bf16 with column
    index (ky*4 + kx)*cpad + co.  cout is padded to a multiple of 8 so the GEMM
    output width 16*cpad is a lane-dense multiple of 128 (zeros in the pad)."""
    prepared = []
    for (W, b, g, bt) in params:
        cin, cout = W.shape[0], W.shape[1]
        cpad = _round_up(cout, 8)
        wt = jnp.transpose(W, (0, 2, 3, 1))               # (cin, 4, 4, cout)
        if cpad != cout:
            wt = jnp.pad(wt, ((0, 0), (0, 0), (0, 0), (0, cpad - cout)))
        wg = wt.reshape(cin, 16 * cpad).astype(jnp.bfloat16)
        prepared.append((wg, b.astype(jnp.float32), g.astype(jnp.float32),
                         bt.astype(jnp.float32)))
    return prepared


# --------------------------------------------------------------------------- #
# generator forward (Pallas GEMMs + XLA shift-add glue)
# --------------------------------------------------------------------------- #
def _up_block(x, layer_params, *, final):
    """One ConvTranspose2d(k=4, s=2, p=1) [+ BN + ReLU | + Tanh] block."""
    wg, b, g, bt = layer_params
    N, H, W, cin = x.shape
    cout = b.shape[0]
    cpad = wg.shape[1] // 16

    # 1) Pallas GEMM, no im2col: one column group of width cpad per (ky,kx) tap.
    z = matmul_bf16(x.reshape(N * H * W, cin), wg)        # (N*H*W, 16*cpad) bf16

    # 2) XLA shift-add: scatter the 16 tap planes onto the 4 output parities.
    #    Each Z element is consumed exactly once; bias added per output pixel.
    planes = []
    for py in range(2):
        for px in range(2):
            acc = None
            for dy in range(2):
                for dx in range(2):
                    tap = _PAR_KY[py][dy] * 4 + _PAR_KY[px][dx]
                    p = z[:, tap * cpad:tap * cpad + cout]
                    p = p.reshape(N, H, W, cout).astype(jnp.float32)
                    p = _shift_tap(p, _PAR_OFF[py][dy], _PAR_OFF[px][dx], H, W)
                    acc = p if acc is None else acc + p
            planes.append(acc + b)

    if final:
        planes = [jnp.tanh(p) for p in planes]            # valid channels only
        return _interleave(planes, N, H, W, cout)         # (N, 2H, 2W, 3) f32

    # 3) BN batch statistics + fused normalize/ReLU Pallas pass.
    s = sum(p.sum(axis=(0, 1, 2)) for p in planes)
    ss = sum((p * p).sum(axis=(0, 1, 2)) for p in planes)
    scale, shift = bn_scale_shift(s, ss, 4 * N * H * W, g, bt)
    y = _interleave([p.astype(jnp.bfloat16) for p in planes], N, H, W, cout)
    y = scale_shift_relu(y.reshape(N * 4 * H * W, cout), scale, shift)
    return y.reshape(N, 2 * H, 2 * W, cout)


def generator_forward_pallas(noise, prepared):
    """noise (N, z_dim) -> image (N, 3, 128, 128), training-mode BatchNorm."""
    N = noise.shape[0]

    # layer 1: ConvTranspose2d(z, C1, k=4, s=1, p=0) on a 1x1 input == GEMM;
    # output pixel (h, w) is exactly kernel tap (ky, kx).
    wg, b, g, bt = prepared[0]
    c1 = b.shape[0]
    cpad = wg.shape[1] // 16
    z = matmul_bf16(noise, wg)                            # (N, 16*cpad) bf16
    y1 = z.reshape(N, 16, cpad)[:, :, :c1].astype(jnp.float32) + b
    s = y1.sum(axis=(0, 1))
    ss = (y1 * y1).sum(axis=(0, 1))
    scale, shift = bn_scale_shift(s, ss, N * 16, g, bt)
    x = scale_shift_relu(y1.reshape(N * 16, c1), scale, shift)
    x = x.reshape(N, 4, 4, c1)                            # NHWC, bf16

    # layers 2-5: GEMM + shift-add + BN + ReLU, each doubling the resolution.
    for li in range(1, 5):
        x = _up_block(x, prepared[li], final=False)

    # layer 6: GEMM + shift-add + Tanh -> (N, 128, 128, 3)
    img = _up_block(x, prepared[5], final=True)
    return img.transpose(0, 3, 1, 2).astype(jnp.float32)  # NCHW


# --------------------------------------------------------------------------- #
# pure-JAX reference (for correctness check)
# --------------------------------------------------------------------------- #
def _ref_convT(x_nchw, W_pt, b, s, p):
    k = W_pt.shape[2]
    Wconv = jnp.flip(W_pt, axis=(2, 3)).transpose(1, 0, 2, 3)   # (C_out, C_in, k, k)
    pad = k - 1 - p
    y = jax.lax.conv_general_dilated(
        x_nchw, Wconv, window_strides=(1, 1),
        padding=[(pad, pad), (pad, pad)], lhs_dilation=(s, s),
        dimension_numbers=("NCHW", "OIHW", "NCHW"))
    return y + b.reshape(1, -1, 1, 1)


def _ref_bn_relu(y, gamma, beta, eps=1e-5):
    mean = y.mean(axis=(0, 2, 3), keepdims=True)
    var = y.var(axis=(0, 2, 3), keepdims=True)   # biased, like torch training BN
    yn = (y - mean) / jnp.sqrt(var + eps)
    yn = yn * gamma.reshape(1, -1, 1, 1) + beta.reshape(1, -1, 1, 1)
    return jnp.maximum(yn, 0.0)


def generator_forward_ref(noise, params, z_dim):
    x = noise.reshape(-1, z_dim, 1, 1)
    strides = [(1, 0)] + [(2, 1)] * 5
    for li in range(5):
        W, b, g, bt = params[li]
        s, p = strides[li]
        x = _ref_bn_relu(_ref_convT(x, W, b, s, p), g, bt)
    W, b, _, _ = params[5]
    return jnp.tanh(_ref_convT(x, W, b, 2, 1))


# --------------------------------------------------------------------------- #
if __name__ == "__main__":
    z_dim, d_dim, batch = 64, 4, 2     # small d_dim keeps the demo fast; shapes scale
    key = jax.random.PRNGKey(0)
    kp, kn = jax.random.split(key)
    params = init_params(kp, z_dim, d_dim)
    noise = jax.random.normal(kn, (batch, z_dim), jnp.float32)

    prepared = prepare_params(params)              # one-time weight layout

    fwd = jax.jit(generator_forward_pallas)
    out = jax.block_until_ready(fwd(noise, prepared))

    assert out.shape == (batch, 3, 128, 128), out.shape
    assert bool(jnp.all(jnp.isfinite(out)))

    # bf16 weights/activations through 6 layers -> tolerance covers rounding;
    # tap/parity indexing bugs would produce O(1) errors and be caught here.
    ref = generator_forward_ref(noise, params, z_dim)
    max_err = float(jnp.max(jnp.abs(out - ref)))
    assert max_err < 1e-1, f"mismatch vs reference: {max_err}"

    print("KERNEL_OK")
</pallas_src>

<mosaic_0001>
module attributes {stable_mosaic.version = 11 : i64} {
  func.func @_matmul_kernel(%arg0: i32, %arg1: i32, %arg2: i32, %arg3: memref<16x64xbf16, #tpu.memory_space<vmem>>, %arg4: memref<64x1024xbf16, #tpu.memory_space<vmem>>, %arg5: memref<16x1024xbf16, #tpu.memory_space<vmem>>, %arg6: memref<16x1024xf32, #tpu.memory_space<vmem>>) attributes {dimension_semantics = [#tpu.dimension_semantics<parallel>, #tpu.dimension_semantics<parallel>, #tpu.dimension_semantics<arbitrary>], iteration_bounds = array<i64: 1, 2, 1>, scalar_prefetch = 0 : i64, scratch_operands = 1 : i64, tpu.core_type = #tpu.core_type<tc>, window_params = [{transform_indices = @transform_0, window_bounds = array<i64: 16, 64>}, {transform_indices = @transform_1, window_bounds = array<i64: 64, 1024>}, {transform_indices = @transform_2, window_bounds = array<i64: 16, 1024>}]} {
    %c0_i32 = arith.constant 0 : i32
    %0 = arith.cmpi eq, %arg2, %c0_i32 : i32
    %1 = arith.extui %0 : i1 to i32
    %c0_i32_0 = arith.constant 0 : i32
    %2 = arith.cmpi ne, %1, %c0_i32_0 : i32
    scf.if %2 {
      %cst_10 = arith.constant 0.000000e+00 : f32
      %12 = vector.broadcast %cst_10 : f32 to vector<16x1024xf32>
      %c0_11 = arith.constant 0 : index
      %c0_12 = arith.constant 0 : index
      %13 = vector.load %arg6[%c0_11, %c0_12] : memref<16x1024xf32, #tpu.memory_space<vmem>>, vector<16x1024xf32>
      tpu.vector_store %arg6[%c0_11, %c0_12], %12 {strides = array<i32>} : memref<16x1024xf32, #tpu.memory_space<vmem>>, vector<16x1024xf32>,
    } else {
    }
    %c0 = arith.constant 0 : index
    %c0_1 = arith.constant 0 : index
    %3 = vector.load %arg6[%c0, %c0_1] : memref<16x1024xf32, #tpu.memory_space<vmem>>, vector<16x1024xf32>
    %c0_2 = arith.constant 0 : index
    %c0_3 = arith.constant 0 : index
    %4 = vector.load %arg3[%c0_2, %c0_3] : memref<16x64xbf16, #tpu.memory_space<vmem>>, vector<16x64xbf16>
    %c0_4 = arith.constant 0 : index
    %c0_5 = arith.constant 0 : index
    %5 = vector.load %arg4[%c0_4, %c0_5] : memref<64x1024xbf16, #tpu.memory_space<vmem>>, vector<64x1024xbf16>
    %cst = arith.constant dense<0.000000e+00> : vector<16x1024xf32>
    %6 = tpu.matmul %4, %5, %cst {dimension_numbers = #tpu.dot_dimension_numbers<[1], [0], [0], [1], [0, 0, 1, 1], [], []>} : vector<16x64xbf16>, vector<64x1024xbf16>, vector<16x1024xf32> -> vector<16x1024xf32>
    %7 = arith.addf %3, %6 : vector<16x1024xf32>
    %c0_6 = arith.constant 0 : index
    %c0_7 = arith.constant 0 : index
    %8 = vector.load %arg6[%c0_6, %c0_7] : memref<16x1024xf32, #tpu.memory_space<vmem>>, vector<16x1024xf32>
    tpu.vector_store %arg6[%c0_6, %c0_7], %7 {strides = array<i32>} : memref<16x1024xf32, #tpu.memory_space<vmem>>, vector<16x1024xf32>,
    %c0_i32_8 = arith.constant 0 : i32
    %9 = arith.cmpi eq, %arg2, %c0_i32_8 : i32
    %10 = arith.extui %9 : i1 to i32
    %c0_i32_9 = arith.constant 0 : i32
    %11 = arith.cmpi ne, %10, %c0_i32_9 : i32
    scf.if %11 {
      %c0_10 = arith.constant 0 : index
      %c0_11 = arith.constant 0 : index
      %12 = vector.load %arg6[%c0_10, %c0_11] : memref<16x1024xf32, #tpu.memory_space<vmem>>, vector<16x1024xf32>
      %13 = arith.truncf %12 : vector<16x1024xf32> to vector<16x1024xbf16>
      %c0_12 = arith.constant 0 : index
      %c0_13 = arith.constant 0 : index
      %14 = vector.load %arg5[%c0_12, %c0_13] : memref<16x1024xbf16, #tpu.memory_space<vmem>>, vector<16x1024xbf16>
      tpu.vector_store %arg5[%c0_12, %c0_13], %13 {strides = array<i32>} : memref<16x1024xbf16, #tpu.memory_space<vmem>>, vector<16x1024xbf16>,
    } else {
    }
    return
  }
  func.func @transform_0(%arg0: i32, %arg1: i32, %arg2: i32) -> (i32, i32) {
    %c0_i32 = arith.constant 0 : i32
    return %arg0, %arg2 : i32, i32
  }
  func.func @transform_1(%arg0: i32, %arg1: i32, %arg2: i32) -> (i32, i32) {
    %c0_i32 = arith.constant 0 : i32
    return %arg2, %arg1 : i32, i32
  }
  func.func @transform_2(%arg0: i32, %arg1: i32, %arg2: i32) -> (i32, i32) {
    %c0_i32 = arith.constant 0 : i32
    return %arg0, %arg1 : i32, i32
  }
}

module attributes {stable_mosaic.version = 11 : i64} {
  func.func @_matmul_kernel(%arg0: i32, %arg1: i32, %arg2: i32, %arg3: memref<32x128xbf16, #tpu.memory_space<vmem>>, %arg4: memref<128x1024xbf16, #tpu.memory_space<vmem>>, %arg5: memref<32x1024xbf16, #tpu.memory_space<vmem>>, %arg6: memref<32x1024xf32, #tpu.memory_space<vmem>>) attributes {dimension_semantics = [#tpu.dimension_semantics<parallel>, #tpu.dimension_semantics<parallel>, #tpu.dimension_semantics<arbitrary>], iteration_bounds = array<i64: 1, 1, 1>, scalar_prefetch = 0 : i64, scratch_operands = 1 : i64, tpu.core_type = #tpu.core_type<tc>, window_params = [{transform_indices = @transform_0, window_bounds = array<i64: 32, 128>}, {transform_indices = @transform_1, window_bounds = array<i64: 128, 1024>}, {transform_indices = @transform_2, window_bounds = array<i64: 32, 1024>}]} {
    %c0_i32 = arith.constant 0 : i32
    %0 = arith.cmpi eq, %arg2, %c0_i32 : i32
    %1 = arith.extui %0 : i1 to i32
    %c0_i32_0 = arith.constant 0 : i32
    %2 = arith.cmpi ne, %1, %c0_i32_0 : i32
    scf.if %2 {
      %cst_10 = arith.constant 0.000000e+00 : f32
      %12 = vector.broadcast %cst_10 : f32 to vector<32x1024xf32>
      %c0_11 = arith.constant 0 : index
      %c0_12 = arith.constant 0 : index
      %13 = vector.load %arg6[%c0_11, %c0_12] : memref<32x1024xf32, #tpu.memory_space<vmem>>, vector<32x1024xf32>
      tpu.vector_store %arg6[%c0_11, %c0_12], %12 {strides = array<i32>} : memref<32x1024xf32, #tpu.memory_space<vmem>>, vector<32x1024xf32>,
    } else {
    }
    %c0 = arith.constant 0 : index
    %c0_1 = arith.constant 0 : index
    %3 = vector.load %arg6[%c0, %c0_1] : memref<32x1024xf32, #tpu.memory_space<vmem>>, vector<32x1024xf32>
    %c0_2 = arith.constant 0 : index
    %c0_3 = arith.constant 0 : index
    %4 = vector.load %arg3[%c0_2, %c0_3] : memref<32x128xbf16, #tpu.memory_space<vmem>>, vector<32x128xbf16>
    %c0_4 = arith.constant 0 : index
    %c0_5 = arith.constant 0 : index
    %5 = vector.load %arg4[%c0_4, %c0_5] : memref<128x1024xbf16, #tpu.memory_space<vmem>>, vector<128x1024xbf16>
    %cst = arith.constant dense<0.000000e+00> : vector<32x1024xf32>
    %6 = tpu.matmul %4, %5, %cst {dimension_numbers = #tpu.dot_dimension_numbers<[1], [0], [0], [1], [0, 0, 1, 1], [], []>} : vector<32x128xbf16>, vector<128x1024xbf16>, vector<32x1024xf32> -> vector<32x1024xf32>
    %7 = arith.addf %3, %6 : vector<32x1024xf32>
    %c0_6 = arith.constant 0 : index
    %c0_7 = arith.constant 0 : index
    %8 = vector.load %arg6[%c0_6, %c0_7] : memref<32x1024xf32, #tpu.memory_space<vmem>>, vector<32x1024xf32>
    tpu.vector_store %arg6[%c0_6, %c0_7], %7 {strides = array<i32>} : memref<32x1024xf32, #tpu.memory_space<vmem>>, vector<32x1024xf32>,
    %c0_i32_8 = arith.constant 0 : i32
    %9 = arith.cmpi eq, %arg2, %c0_i32_8 : i32
    %10 = arith.extui %9 : i1 to i32
    %c0_i32_9 = arith.constant 0 : i32
    %11 = arith.cmpi ne, %10, %c0_i32_9 : i32
    scf.if %11 {
      %c0_10 = arith.constant 0 : index
      %c0_11 = arith.constant 0 : index
      %12 = vector.load %arg6[%c0_10, %c0_11] : memref<32x1024xf32, #tpu.memory_space<vmem>>, vector<32x1024xf32>
      %13 = arith.truncf %12 : vector<32x1024xf32> to vector<32x1024xbf16>
      %c0_12 = arith.constant 0 : index
      %c0_13 = arith.constant 0 : index
      %14 = vector.load %arg5[%c0_12, %c0_13] : memref<32x1024xbf16, #tpu.memory_space<vmem>>, vector<32x1024xbf16>
      tpu.vector_store %arg5[%c0_12, %c0_13], %13 {strides = array<i32>} : memref<32x1024xbf16, #tpu.memory_space<vmem>>, vector<32x1024xbf16>,
    } else {
    }
    return
  }
  func.func @transform_0(%arg0: i32, %arg1: i32, %arg2: i32) -> (i32, i32) {
    %c0_i32 = arith.constant 0 : i32
    return %arg0, %arg2 : i32, i32
  }
  func.func @transform_1(%arg0: i32, %arg1: i32, %arg2: i32) -> (i32, i32) {
    %c0_i32 = arith.constant 0 : i32
    return %arg2, %arg1 : i32, i32
  }
  func.func @transform_2(%arg0: i32, %arg1: i32, %arg2: i32) -> (i32, i32) {
    %c0_i32 = arith.constant 0 : i32
    return %arg0, %arg1 : i32, i32
  }
}

module attributes {stable_mosaic.version = 11 : i64} {
  func.func @_scale_shift_relu_kernel(%arg0: i32, %arg1: memref<32x128xf32, #tpu.memory_space<vmem>>, %arg2: memref<1x128xf32, #tpu.memory_space<vmem>>, %arg3: memref<1x128xf32, #tpu.memory_space<vmem>>, %arg4: memref<32x128xbf16, #tpu.memory_space<vmem>>) attributes {dimension_semantics = [#tpu.dimension_semantics<parallel>], iteration_bounds = array<i64: 1>, scalar_prefetch = 0 : i64, scratch_operands = 0 : i64, tpu.core_type = #tpu.core_type<tc>, window_params = [{transform_indices = @transform_0, window_bounds = array<i64: 32, 128>}, {pipeline_mode = #tpu.pipeline_mode<synchronous>, transform_indices = @transform_1, window_bounds = array<i64: 1, 128>}, {pipeline_mode = #tpu.pipeline_mode<synchronous>, transform_indices = @transform_2, window_bounds = array<i64: 1, 128>}, {transform_indices = @transform_3, window_bounds = array<i64: 32, 128>}]} {
    %c0 = arith.constant 0 : index
    %c0_0 = arith.constant 0 : index
    %0 = vector.load %arg1[%c0, %c0_0] : memref<32x128xf32, #tpu.memory_space<vmem>>, vector<32x128xf32>
    %c0_1 = arith.constant 0 : index
    %c0_2 = arith.constant 0 : index
    %1 = vector.load %arg2[%c0_1, %c0_2] : memref<1x128xf32, #tpu.memory_space<vmem>>, vector<1x128xf32>
    %2 = vector.broadcast %1 : vector<1x128xf32> to vector<32x128xf32>
    %3 = arith.mulf %0, %2 : vector<32x128xf32>
    %c0_3 = arith.constant 0 : index
    %c0_4 = arith.constant 0 : index
    %4 = vector.load %arg3[%c0_3, %c0_4] : memref<1x128xf32, #tpu.memory_space<vmem>>, vector<1x128xf32>
    %5 = vector.broadcast %4 : vector<1x128xf32> to vector<32x128xf32>
    %6 = arith.addf %3, %5 : vector<32x128xf32>
    %cst = arith.constant 0.000000e+00 : f32
    %7 = vector.broadcast %cst : f32 to vector<32x128xf32>
    %8 = arith.maximumf %6, %7 : vector<32x128xf32>
    %9 = arith.truncf %8 : vector<32x128xf32> to vector<32x128xbf16>
    %c0_5 = arith.constant 0 : index
    %c0_6 = arith.constant 0 : index
    %10 = vector.load %arg4[%c0_5, %c0_6] : memref<32x128xbf16, #tpu.memory_space<vmem>>, vector<32x128xbf16>
    tpu.vector_store %arg4[%c0_5, %c0_6], %9 {strides = array<i32>} : memref<32x128xbf16, #tpu.memory_space<vmem>>, vector<32x128xbf16>,
    return
  }
  func.func @transform_0(%arg0: i32) -> (i32, i32) {
    %c0_i32 = arith.constant 0 : i32
    %c0_i32_0 = arith.constant 0 : i32
    return %arg0, %c0_i32 : i32, i32
  }
  func.func @transform_1(%arg0: i32) -> (i32, i32) {
    %c0_i32 = arith.constant 0 : i32
    %c0_i32_0 = arith.constant 0 : i32
    %c0_i32_1 = arith.constant 0 : i32
    return %c0_i32, %c0_i32_0 : i32, i32
  }
  func.func @transform_2(%arg0: i32) -> (i32, i32) {
    %c0_i32 = arith.constant 0 : i32
    %c0_i32_0 = arith.constant 0 : i32
    %c0_i32_1 = arith.constant 0 : i32
    return %c0_i32, %c0_i32_0 : i32, i32
  }
  func.func @transform_3(%arg0: i32) -> (i32, i32) {
    %c0_i32 = arith.constant 0 : i32
    %c0_i32_0 = arith.constant 0 : i32
    return %arg0, %c0_i32 : i32, i32
  }
}

module attributes {stable_mosaic.version = 11 : i64} {
  func.func @_matmul_kernel(%arg0: i32, %arg1: i32, %arg2: i32, %arg3: memref<128x64xbf16, #tpu.memory_space<vmem>>, %arg4: memref<64x512xbf16, #tpu.memory_space<vmem>>, %arg5: memref<128x512xbf16, #tpu.memory_space<vmem>>, %arg6: memref<128x512xf32, #tpu.memory_space<vmem>>) attributes {dimension_semantics = [#tpu.dimension_semantics<parallel>, #tpu.dimension_semantics<parallel>, #tpu.dimension_semantics<arbitrary>], iteration_bounds = array<i64: 1, 1, 1>, scalar_prefetch = 0 : i64, scratch_operands = 1 : i64, tpu.core_type = #tpu.core_type<tc>, window_params = [{transform_indices = @transform_0, window_bounds = array<i64: 128, 64>}, {transform_indices = @transform_1, window_bounds = array<i64: 64, 512>}, {transform_indices = @transform_2, window_bounds = array<i64: 128, 512>}]} {
    %c0_i32 = arith.constant 0 : i32
    %0 = arith.cmpi eq, %arg2, %c0_i32 : i32
    %1 = arith.extui %0 : i1 to i32
    %c0_i32_0 = arith.constant 0 : i32
    %2 = arith.cmpi ne, %1, %c0_i32_0 : i32
    scf.if %2 {
      %cst_10 = arith.constant 0.000000e+00 : f32
      %12 = vector.broadcast %cst_10 : f32 to vector<128x512xf32>
      %c0_11 = arith.constant 0 : index
      %c0_12 = arith.constant 0 : index
      %13 = vector.load %arg6[%c0_11, %c0_12] : memref<128x512xf32, #tpu.memory_space<vmem>>, vector<128x512xf32>
      tpu.vector_store %arg6[%c0_11, %c0_12], %12 {strides = array<i32>} : memref<128x512xf32, #tpu.memory_space<vmem>>, vector<128x512xf32>,
    } else {
    }
    %c0 = arith.constant 0 : index
    %c0_1 = arith.constant 0 : index
    %3 = vector.load %arg6[%c0, %c0_1] : memref<128x512xf32, #tpu.memory_space<vmem>>, vector<128x512xf32>
    %c0_2 = arith.constant 0 : index
    %c0_3 = arith.constant 0 : index
    %4 = vector.load %arg3[%c0_2, %c0_3] : memref<128x64xbf16, #tpu.memory_space<vmem>>, vector<128x64xbf16>
    %c0_4 = arith.constant 0 : index
    %c0_5 = arith.constant 0 : index
    %5 = vector.load %arg4[%c0_4, %c0_5] : memref<64x512xbf16, #tpu.memory_space<vmem>>, vector<64x512xbf16>
    %cst = arith.constant dense<0.000000e+00> : vector<128x512xf32>
    %6 = tpu.matmul %4, %5, %cst {dimension_numbers = #tpu.dot_dimension_numbers<[1], [0], [0], [1], [0, 0, 1, 1], [], []>} : vector<128x64xbf16>, vector<64x512xbf16>, vector<128x512xf32> -> vector<128x512xf32>
    %7 = arith.addf %3, %6 : vector<128x512xf32>
    %c0_6 = arith.constant 0 : index
    %c0_7 = arith.constant 0 : index
    %8 = vector.load %arg6[%c0_6, %c0_7] : memref<128x512xf32, #tpu.memory_space<vmem>>, vector<128x512xf32>
    tpu.vector_store %arg6[%c0_6, %c0_7], %7 {strides = array<i32>} : memref<128x512xf32, #tpu.memory_space<vmem>>, vector<128x512xf32>,
    %c0_i32_8 = arith.constant 0 : i32
    %9 = arith.cmpi eq, %arg2, %c0_i32_8 : i32
    %10 = arith.extui %9 : i1 to i32
    %c0_i32_9 = arith.constant 0 : i32
    %11 = arith.cmpi ne, %10, %c0_i32_9 : i32
    scf.if %11 {
      %c0_10 = arith.constant 0 : index
      %c0_11 = arith.constant 0 : index
      %12 = vector.load %arg6[%c0_10, %c0_11] : memref<128x512xf32, #tpu.memory_space<vmem>>, vector<128x512xf32>
      %13 = arith.truncf %12 : vector<128x512xf32> to vector<128x512xbf16>
      %c0_12 = arith.constant 0 : index
      %c0_13 = arith.constant 0 : index
      %14 = vector.load %arg5[%c0_12, %c0_13] : memref<128x512xbf16, #tpu.memory_space<vmem>>, vector<128x512xbf16>
      tpu.vector_store %arg5[%c0_12, %c0_13], %13 {strides = array<i32>} : memref<128x512xbf16, #tpu.memory_space<vmem>>, vector<128x512xbf16>,
    } else {
    }
    return
  }
  func.func @transform_0(%arg0: i32, %arg1: i32, %arg2: i32) -> (i32, i32) {
    %c0_i32 = arith.constant 0 : i32
    return %arg0, %arg2 : i32, i32
  }
  func.func @transform_1(%arg0: i32, %arg1: i32, %arg2: i32) -> (i32, i32) {
    %c0_i32 = arith.constant 0 : i32
    return %arg2, %arg1 : i32, i32
  }
  func.func @transform_2(%arg0: i32, %arg1: i32, %arg2: i32) -> (i32, i32) {
    %c0_i32 = arith.constant 0 : i32
    return %arg0, %arg1 : i32, i32
  }
}

module attributes {stable_mosaic.version = 11 : i64} {
  func.func @_scale_shift_relu_kernel(%arg0: i32, %arg1: memref<128x64xbf16, #tpu.memory_space<vmem>>, %arg2: memref<1x64xf32, #tpu.memory_space<vmem>>, %arg3: memref<1x64xf32, #tpu.memory_space<vmem>>, %arg4: memref<128x64xbf16, #tpu.memory_space<vmem>>) attributes {dimension_semantics = [#tpu.dimension_semantics<parallel>], iteration_bounds = array<i64: 1>, scalar_prefetch = 0 : i64, scratch_operands = 0 : i64, tpu.core_type = #tpu.core_type<tc>, window_params = [{transform_indices = @transform_0, window_bounds = array<i64: 128, 64>}, {pipeline_mode = #tpu.pipeline_mode<synchronous>, transform_indices = @transform_1, window_bounds = array<i64: 1, 64>}, {pipeline_mode = #tpu.pipeline_mode<synchronous>, transform_indices = @transform_2, window_bounds = array<i64: 1, 64>}, {transform_indices = @transform_3, window_bounds = array<i64: 128, 64>}]} {
    %c0 = arith.constant 0 : index
    %c0_0 = arith.constant 0 : index
    %0 = vector.load %arg1[%c0, %c0_0] : memref<128x64xbf16, #tpu.memory_space<vmem>>, vector<128x64xbf16>
    %1 = arith.extf %0 : vector<128x64xbf16> to vector<128x64xf32>
    %c0_1 = arith.constant 0 : index
    %c0_2 = arith.constant 0 : index
    %2 = vector.load %arg2[%c0_1, %c0_2] : memref<1x64xf32, #tpu.memory_space<vmem>>, vector<1x64xf32>
    %3 = vector.broadcast %2 : vector<1x64xf32> to vector<128x64xf32>
    %4 = arith.mulf %1, %3 : vector<128x64xf32>
    %c0_3 = arith.constant 0 : index
    %c0_4 = arith.constant 0 : index
    %5 = vector.load %arg3[%c0_3, %c0_4] : memref<1x64xf32, #tpu.memory_space<vmem>>, vector<1x64xf32>
    %6 = vector.broadcast %5 : vector<1x64xf32> to vector<128x64xf32>
    %7 = arith.addf %4, %6 : vector<128x64xf32>
    %cst = arith.constant 0.000000e+00 : f32
    %8 = vector.broadcast %cst : f32 to vector<128x64xf32>
    %9 = arith.maximumf %7, %8 : vector<128x64xf32>
    %10 = arith.truncf %9 : vector<128x64xf32> to vector<128x64xbf16>
    %c0_5 = arith.constant 0 : index
    %c0_6 = arith.constant 0 : index
    %11 = vector.load %arg4[%c0_5, %c0_6] : memref<128x64xbf16, #tpu.memory_space<vmem>>, vector<128x64xbf16>
    tpu.vector_store %arg4[%c0_5, %c0_6], %10 {strides = array<i32>} : memref<128x64xbf16, #tpu.memory_space<vmem>>, vector<128x64xbf16>,
    return
  }
  func.func @transform_0(%arg0: i32) -> (i32, i32) {
    %c0_i32 = arith.constant 0 : i32
    %c0_i32_0 = arith.constant 0 : i32
    return %arg0, %c0_i32 : i32, i32
  }
  func.func @transform_1(%arg0: i32) -> (i32, i32) {
    %c0_i32 = arith.constant 0 : i32
    %c0_i32_0 = arith.constant 0 : i32
    %c0_i32_1 = arith.constant 0 : i32
    return %c0_i32, %c0_i32_0 : i32, i32
  }
  func.func @transform_2(%arg0: i32) -> (i32, i32) {
    %c0_i32 = arith.constant 0 : i32
    %c0_i32_0 = arith.constant 0 : i32
    %c0_i32_1 = arith.constant 0 : i32
    return %c0_i32, %c0_i32_0 : i32, i32
  }
  func.func @transform_3(%arg0: i32) -> (i32, i32) {
    %c0_i32 = arith.constant 0 : i32
    %c0_i32_0 = arith.constant 0 : i32
    return %arg0, %c0_i32 : i32, i32
  }
}

module attributes {stable_mosaic.version = 11 : i64} {
  func.func @_matmul_kernel(%arg0: i32, %arg1: i32, %arg2: i32, %arg3: memref<512x32xbf16, #tpu.memory_space<vmem>>, %arg4: memref<32x256xbf16, #tpu.memory_space<vmem>>, %arg5: memref<512x256xbf16, #tpu.memory_space<vmem>>, %arg6: memref<512x256xf32, #tpu.memory_space<vmem>>) attributes {dimension_semantics = [#tpu.dimension_semantics<parallel>, #tpu.dimension_semantics<parallel>, #tpu.dimension_semantics<arbitrary>], iteration_bounds = array<i64: 1, 1, 1>, scalar_prefetch = 0 : i64, scratch_operands = 1 : i64, tpu.core_type = #tpu.core_type<tc>, window_params = [{transform_indices = @transform_0, window_bounds = array<i64: 512, 32>}, {transform_indices = @transform_1, window_bounds = array<i64: 32, 256>}, {transform_indices = @transform_2, window_bounds = array<i64: 512, 256>}]} {
    %c0_i32 = arith.constant 0 : i32
    %0 = arith.cmpi eq, %arg2, %c0_i32 : i32
    %1 = arith.extui %0 : i1 to i32
    %c0_i32_0 = arith.constant 0 : i32
    %2 = arith.cmpi ne, %1, %c0_i32_0 : i32
    scf.if %2 {
      %cst_10 = arith.constant 0.000000e+00 : f32
      %12 = vector.broadcast %cst_10 : f32 to vector<512x256xf32>
      %c0_11 = arith.constant 0 : index
      %c0_12 = arith.constant 0 : index
      %13 = vector.load %arg6[%c0_11, %c0_12] : memref<512x256xf32, #tpu.memory_space<vmem>>, vector<512x256xf32>
      tpu.vector_store %arg6[%c0_11, %c0_12], %12 {strides = array<i32>} : memref<512x256xf32, #tpu.memory_space<vmem>>, vector<512x256xf32>,
    } else {
    }
    %c0 = arith.constant 0 : index
    %c0_1 = arith.constant 0 : index
    %3 = vector.load %arg6[%c0, %c0_1] : memref<512x256xf32, #tpu.memory_space<vmem>>, vector<512x256xf32>
    %c0_2 = arith.constant 0 : index
    %c0_3 = arith.constant 0 : index
    %4 = vector.load %arg3[%c0_2, %c0_3] : memref<512x32xbf16, #tpu.memory_space<vmem>>, vector<512x32xbf16>
    %c0_4 = arith.constant 0 : index
    %c0_5 = arith.constant 0 : index
    %5 = vector.load %arg4[%c0_4, %c0_5] : memref<32x256xbf16, #tpu.memory_space<vmem>>, vector<32x256xbf16>
    %cst = arith.constant dense<0.000000e+00> : vector<512x256xf32>
    %6 = tpu.matmul %4, %5, %cst {dimension_numbers = #tpu.dot_dimension_numbers<[1], [0], [0], [1], [0, 0, 1, 1], [], []>} : vector<512x32xbf16>, vector<32x256xbf16>, vector<512x256xf32> -> vector<512x256xf32>
    %7 = arith.addf %3, %6 : vector<512x256xf32>
    %c0_6 = arith.constant 0 : index
    %c0_7 = arith.constant 0 : index
    %8 = vector.load %arg6[%c0_6, %c0_7] : memref<512x256xf32, #tpu.memory_space<vmem>>, vector<512x256xf32>
    tpu.vector_store %arg6[%c0_6, %c0_7], %7 {strides = array<i32>} : memref<512x256xf32, #tpu.memory_space<vmem>>, vector<512x256xf32>,
    %c0_i32_8 = arith.constant 0 : i32
    %9 = arith.cmpi eq, %arg2, %c0_i32_8 : i32
    %10 = arith.extui %9 : i1 to i32
    %c0_i32_9 = arith.constant 0 : i32
    %11 = arith.cmpi ne, %10, %c0_i32_9 : i32
    scf.if %11 {
      %c0_10 = arith.constant 0 : index
      %c0_11 = arith.constant 0 : index
      %12 = vector.load %arg6[%c0_10, %c0_11] : memref<512x256xf32, #tpu.memory_space<vmem>>, vector<512x256xf32>
      %13 = arith.truncf %12 : vector<512x256xf32> to vector<512x256xbf16>
      %c0_12 = arith.constant 0 : index
      %c0_13 = arith.constant 0 : index
      %14 = vector.load %arg5[%c0_12, %c0_13] : memref<512x256xbf16, #tpu.memory_space<vmem>>, vector<512x256xbf16>
      tpu.vector_store %arg5[%c0_12, %c0_13], %13 {strides = array<i32>} : memref<512x256xbf16, #tpu.memory_space<vmem>>, vector<512x256xbf16>,
    } else {
    }
    return
  }
  func.func @transform_0(%arg0: i32, %arg1: i32, %arg2: i32) -> (i32, i32) {
    %c0_i32 = arith.constant 0 : i32
    return %arg0, %arg2 : i32, i32
  }
  func.func @transform_1(%arg0: i32, %arg1: i32, %arg2: i32) -> (i32, i32) {
    %c0_i32 = arith.constant 0 : i32
    return %arg2, %arg1 : i32, i32
  }
  func.func @transform_2(%arg0: i32, %arg1: i32, %arg2: i32) -> (i32, i32) {
    %c0_i32 = arith.constant 0 : i32
    return %arg0, %arg1 : i32, i32
  }
}

module attributes {stable_mosaic.version = 11 : i64} {
  func.func @_scale_shift_relu_kernel(%arg0: i32, %arg1: memref<512x32xbf16, #tpu.memory_space<vmem>>, %arg2: memref<1x32xf32, #tpu.memory_space<vmem>>, %arg3: memref<1x32xf32, #tpu.memory_space<vmem>>, %arg4: memref<512x32xbf16, #tpu.memory_space<vmem>>) attributes {dimension_semantics = [#tpu.dimension_semantics<parallel>], iteration_bounds = array<i64: 1>, scalar_prefetch = 0 : i64, scratch_operands = 0 : i64, tpu.core_type = #tpu.core_type<tc>, window_params = [{transform_indices = @transform_0, window_bounds = array<i64: 512, 32>}, {pipeline_mode = #tpu.pipeline_mode<synchronous>, transform_indices = @transform_1, window_bounds = array<i64: 1, 32>}, {pipeline_mode = #tpu.pipeline_mode<synchronous>, transform_indices = @transform_2, window_bounds = array<i64: 1, 32>}, {transform_indices = @transform_3, window_bounds = array<i64: 512, 32>}]} {
    %c0 = arith.constant 0 : index
    %c0_0 = arith.constant 0 : index
    %0 = vector.load %arg1[%c0, %c0_0] : memref<512x32xbf16, #tpu.memory_space<vmem>>, vector<512x32xbf16>
    %1 = arith.extf %0 : vector<512x32xbf16> to vector<512x32xf32>
    %c0_1 = arith.constant 0 : index
    %c0_2 = arith.constant 0 : index
    %2 = vector.load %arg2[%c0_1, %c0_2] : memref<1x32xf32, #tpu.memory_space<vmem>>, vector<1x32xf32>
    %3 = vector.broadcast %2 : vector<1x32xf32> to vector<512x32xf32>
    %4 = arith.mulf %1, %3 : vector<512x32xf32>
    %c0_3 = arith.constant 0 : index
    %c0_4 = arith.constant 0 : index
    %5 = vector.load %arg3[%c0_3, %c0_4] : memref<1x32xf32, #tpu.memory_space<vmem>>, vector<1x32xf32>
    %6 = vector.broadcast %5 : vector<1x32xf32> to vector<512x32xf32>
    %7 = arith.addf %4, %6 : vector<512x32xf32>
    %cst = arith.constant 0.000000e+00 : f32
    %8 = vector.broadcast %cst : f32 to vector<512x32xf32>
    %9 = arith.maximumf %7, %8 : vector<512x32xf32>
    %10 = arith.truncf %9 : vector<512x32xf32> to vector<512x32xbf16>
    %c0_5 = arith.constant 0 : index
    %c0_6 = arith.constant 0 : index
    %11 = vector.load %arg4[%c0_5, %c0_6] : memref<512x32xbf16, #tpu.memory_space<vmem>>, vector<512x32xbf16>
    tpu.vector_store %arg4[%c0_5, %c0_6], %10 {strides = array<i32>} : memref<512x32xbf16, #tpu.memory_space<vmem>>, vector<512x32xbf16>,
    return
  }
  func.func @transform_0(%arg0: i32) -> (i32, i32) {
    %c0_i32 = arith.constant 0 : i32
    %c0_i32_0 = arith.constant 0 : i32
    return %arg0, %c0_i32 : i32, i32
  }
  func.func @transform_1(%arg0: i32) -> (i32, i32) {
    %c0_i32 = arith.constant 0 : i32
    %c0_i32_0 = arith.constant 0 : i32
    %c0_i32_1 = arith.constant 0 : i32
    return %c0_i32, %c0_i32_0 : i32, i32
  }
  func.func @transform_2(%arg0: i32) -> (i32, i32) {
    %c0_i32 = arith.constant 0 : i32
    %c0_i32_0 = arith.constant 0 : i32
    %c0_i32_1 = arith.constant 0 : i32
    return %c0_i32, %c0_i32_0 : i32, i32
  }
  func.func @transform_3(%arg0: i32) -> (i32, i32) {
    %c0_i32 = arith.constant 0 : i32
    %c0_i32_0 = arith.constant 0 : i32
    return %arg0, %c0_i32 : i32, i32
  }
}

module attributes {stable_mosaic.version = 11 : i64} {
  func.func @_scale_shift_relu_kernel(%arg0: i32, %arg1: memref<512x16xbf16, #tpu.memory_space<vmem>>, %arg2: memref<1x16xf32, #tpu.memory_space<vmem>>, %arg3: memref<1x16xf32, #tpu.memory_space<vmem>>, %arg4: memref<512x16xbf16, #tpu.memory_space<vmem>>) attributes {dimension_semantics = [#tpu.dimension_semantics<parallel>], iteration_bounds = array<i64: 4>, scalar_prefetch = 0 : i64, scratch_operands = 0 : i64, tpu.core_type = #tpu.core_type<tc>, window_params = [{transform_indices = @transform_0, window_bounds = array<i64: 512, 16>}, {pipeline_mode = #tpu.pipeline_mode<synchronous>, transform_indices = @transform_1, window_bounds = array<i64: 1, 16>}, {pipeline_mode = #tpu.pipeline_mode<synchronous>, transform_indices = @transform_2, window_bounds = array<i64: 1, 16>}, {transform_indices = @transform_3, window_bounds = array<i64: 512, 16>}]} {
    %c0 = arith.constant 0 : index
    %c0_0 = arith.constant 0 : index
    %0 = vector.load %arg1[%c0, %c0_0] : memref<512x16xbf16, #tpu.memory_space<vmem>>, vector<512x16xbf16>
    %1 = arith.extf %0 : vector<512x16xbf16> to vector<512x16xf32>
    %c0_1 = arith.constant 0 : index
    %c0_2 = arith.constant 0 : index
    %2 = vector.load %arg2[%c0_1, %c0_2] : memref<1x16xf32, #tpu.memory_space<vmem>>, vector<1x16xf32>
    %3 = vector.broadcast %2 : vector<1x16xf32> to vector<512x16xf32>
    %4 = arith.mulf %1, %3 : vector<512x16xf32>
    %c0_3 = arith.constant 0 : index
    %c0_4 = arith.constant 0 : index
    %5 = vector.load %arg3[%c0_3, %c0_4] : memref<1x16xf32, #tpu.memory_space<vmem>>, vector<1x16xf32>
    %6 = vector.broadcast %5 : vector<1x16xf32> to vector<512x16xf32>
    %7 = arith.addf %4, %6 : vector<512x16xf32>
    %cst = arith.constant 0.000000e+00 : f32
    %8 = vector.broadcast %cst : f32 to vector<512x16xf32>
    %9 = arith.maximumf %7, %8 : vector<512x16xf32>
    %10 = arith.truncf %9 : vector<512x16xf32> to vector<512x16xbf16>
    %c0_5 = arith.constant 0 : index
    %c0_6 = arith.constant 0 : index
    %11 = vector.load %arg4[%c0_5, %c0_6] : memref<512x16xbf16, #tpu.memory_space<vmem>>, vector<512x16xbf16>
    tpu.vector_store %arg4[%c0_5, %c0_6], %10 {strides = array<i32>} : memref<512x16xbf16, #tpu.memory_space<vmem>>, vector<512x16xbf16>,
    return
  }
  func.func @transform_0(%arg0: i32) -> (i32, i32) {
    %c0_i32 = arith.constant 0 : i32
    %c0_i32_0 = arith.constant 0 : i32
    return %arg0, %c0_i32 : i32, i32
  }
  func.func @transform_1(%arg0: i32) -> (i32, i32) {
    %c0_i32 = arith.constant 0 : i32
    %c0_i32_0 = arith.constant 0 : i32
    %c0_i32_1 = arith.constant 0 : i32
    return %c0_i32, %c0_i32_0 : i32, i32
  }
  func.func @transform_2(%arg0: i32) -> (i32, i32) {
    %c0_i32 = arith.constant 0 : i32
    %c0_i32_0 = arith.constant 0 : i32
    %c0_i32_1 = arith.constant 0 : i32
    return %c0_i32, %c0_i32_0 : i32, i32
  }
  func.func @transform_3(%arg0: i32) -> (i32, i32) {
    %c0_i32 = arith.constant 0 : i32
    %c0_i32_0 = arith.constant 0 : i32
    return %arg0, %c0_i32 : i32, i32
  }
}

module attributes {stable_mosaic.version = 11 : i64} {
  func.func @_matmul_kernel(%arg0: i32, %arg1: i32, %arg2: i32, %arg3: memref<512x16xbf16, #tpu.memory_space<vmem>>, %arg4: memref<16x128xbf16, #tpu.memory_space<vmem>>, %arg5: memref<512x128xbf16, #tpu.memory_space<vmem>>, %arg6: memref<512x128xf32, #tpu.memory_space<vmem>>) attributes {dimension_semantics = [#tpu.dimension_semantics<parallel>, #tpu.dimension_semantics<parallel>, #tpu.dimension_semantics<arbitrary>], iteration_bounds = array<i64: 4, 1, 1>, scalar_prefetch = 0 : i64, scratch_operands = 1 : i64, tpu.core_type = #tpu.core_type<tc>, window_params = [{transform_indices = @transform_0, window_bounds = array<i64: 512, 16>}, {transform_indices = @transform_1, window_bounds = array<i64: 16, 128>}, {transform_indices = @transform_2, window_bounds = array<i64: 512, 128>}]} {
    %c0_i32 = arith.constant 0 : i32
    %0 = arith.cmpi eq, %arg2, %c0_i32 : i32
    %1 = arith.extui %0 : i1 to i32
    %c0_i32_0 = arith.constant 0 : i32
    %2 = arith.cmpi ne, %1, %c0_i32_0 : i32
    scf.if %2 {
      %cst_10 = arith.constant 0.000000e+00 : f32
      %12 = vector.broadcast %cst_10 : f32 to vector<512x128xf32>
      %c0_11 = arith.constant 0 : index
      %c0_12 = arith.constant 0 : index
      %13 = vector.load %arg6[%c0_11, %c0_12] : memref<512x128xf32, #tpu.memory_space<vmem>>, vector<512x128xf32>
      tpu.vector_store %arg6[%c0_11, %c0_12], %12 {strides = array<i32>} : memref<512x128xf32, #tpu.memory_space<vmem>>, vector<512x128xf32>,
    } else {
    }
    %c0 = arith.constant 0 : index
    %c0_1 = arith.constant 0 : index
    %3 = vector.load %arg6[%c0, %c0_1] : memref<512x128xf32, #tpu.memory_space<vmem>>, vector<512x128xf32>
    %c0_2 = arith.constant 0 : index
    %c0_3 = arith.constant 0 : index
    %4 = vector.load %arg3[%c0_2, %c0_3] : memref<512x16xbf16, #tpu.memory_space<vmem>>, vector<512x16xbf16>
    %c0_4 = arith.constant 0 : index
    %c0_5 = arith.constant 0 : index
    %5 = vector.load %arg4[%c0_4, %c0_5] : memref<16x128xbf16, #tpu.memory_space<vmem>>, vector<16x128xbf16>
    %cst = arith.constant dense<0.000000e+00> : vector<512x128xf32>
    %6 = tpu.matmul %4, %5, %cst {dimension_numbers = #tpu.dot_dimension_numbers<[1], [0], [0], [1], [0, 0, 1, 1], [], []>} : vector<512x16xbf16>, vector<16x128xbf16>, vector<512x128xf32> -> vector<512x128xf32>
    %7 = arith.addf %3, %6 : vector<512x128xf32>
    %c0_6 = arith.constant 0 : index
    %c0_7 = arith.constant 0 : index
    %8 = vector.load %arg6[%c0_6, %c0_7] : memref<512x128xf32, #tpu.memory_space<vmem>>, vector<512x128xf32>
    tpu.vector_store %arg6[%c0_6, %c0_7], %7 {strides = array<i32>} : memref<512x128xf32, #tpu.memory_space<vmem>>, vector<512x128xf32>,
    %c0_i32_8 = arith.constant 0 : i32
    %9 = arith.cmpi eq, %arg2, %c0_i32_8 : i32
    %10 = arith.extui %9 : i1 to i32
    %c0_i32_9 = arith.constant 0 : i32
    %11 = arith.cmpi ne, %10, %c0_i32_9 : i32
    scf.if %11 {
      %c0_10 = arith.constant 0 : index
      %c0_11 = arith.constant 0 : index
      %12 = vector.load %arg6[%c0_10, %c0_11] : memref<512x128xf32, #tpu.memory_space<vmem>>, vector<512x128xf32>
      %13 = arith.truncf %12 : vector<512x128xf32> to vector<512x128xbf16>
      %c0_12 = arith.constant 0 : index
      %c0_13 = arith.constant 0 : index
      %14 = vector.load %arg5[%c0_12, %c0_13] : memref<512x128xbf16, #tpu.memory_space<vmem>>, vector<512x128xbf16>
      tpu.vector_store %arg5[%c0_12, %c0_13], %13 {strides = array<i32>} : memref<512x128xbf16, #tpu.memory_space<vmem>>, vector<512x128xbf16>,
    } else {
    }
    return
  }
  func.func @transform_0(%arg0: i32, %arg1: i32, %arg2: i32) -> (i32, i32) {
    %c0_i32 = arith.constant 0 : i32
    return %arg0, %arg2 : i32, i32
  }
  func.func @transform_1(%arg0: i32, %arg1: i32, %arg2: i32) -> (i32, i32) {
    %c0_i32 = arith.constant 0 : i32
    return %arg2, %arg1 : i32, i32
  }
  func.func @transform_2(%arg0: i32, %arg1: i32, %arg2: i32) -> (i32, i32) {
    %c0_i32 = arith.constant 0 : i32
    return %arg0, %arg1 : i32, i32
  }
}

module attributes {stable_mosaic.version = 11 : i64} {
  func.func @_scale_shift_relu_kernel(%arg0: i32, %arg1: memref<512x8xbf16, #tpu.memory_space<vmem>>, %arg2: memref<1x8xf32, #tpu.memory_space<vmem>>, %arg3: memref<1x8xf32, #tpu.memory_space<vmem>>, %arg4: memref<512x8xbf16, #tpu.memory_space<vmem>>) attributes {dimension_semantics = [#tpu.dimension_semantics<parallel>], iteration_bounds = array<i64: 16>, scalar_prefetch = 0 : i64, scratch_operands = 0 : i64, tpu.core_type = #tpu.core_type<tc>, window_params = [{transform_indices = @transform_0, window_bounds = array<i64: 512, 8>}, {pipeline_mode = #tpu.pipeline_mode<synchronous>, transform_indices = @transform_1, window_bounds = array<i64: 1, 8>}, {pipeline_mode = #tpu.pipeline_mode<synchronous>, transform_indices = @transform_2, window_bounds = array<i64: 1, 8>}, {transform_indices = @transform_3, window_bounds = array<i64: 512, 8>}]} {
    %c0 = arith.constant 0 : index
    %c0_0 = arith.constant 0 : index
    %0 = vector.load %arg1[%c0, %c0_0] : memref<512x8xbf16, #tpu.memory_space<vmem>>, vector<512x8xbf16>
    %1 = arith.extf %0 : vector<512x8xbf16> to vector<512x8xf32>
    %c0_1 = arith.constant 0 : index
    %c0_2 = arith.constant 0 : index
    %2 = vector.load %arg2[%c0_1, %c0_2] : memref<1x8xf32, #tpu.memory_space<vmem>>, vector<1x8xf32>
    %3 = vector.broadcast %2 : vector<1x8xf32> to vector<512x8xf32>
    %4 = arith.mulf %1, %3 : vector<512x8xf32>
    %c0_3 = arith.constant 0 : index
    %c0_4 = arith.constant 0 : index
    %5 = vector.load %arg3[%c0_3, %c0_4] : memref<1x8xf32, #tpu.memory_space<vmem>>, vector<1x8xf32>
    %6 = vector.broadcast %5 : vector<1x8xf32> to vector<512x8xf32>
    %7 = arith.addf %4, %6 : vector<512x8xf32>
    %cst = arith.constant 0.000000e+00 : f32
    %8 = vector.broadcast %cst : f32 to vector<512x8xf32>
    %9 = arith.maximumf %7, %8 : vector<512x8xf32>
    %10 = arith.truncf %9 : vector<512x8xf32> to vector<512x8xbf16>
    %c0_5 = arith.constant 0 : index
    %c0_6 = arith.constant 0 : index
    %11 = vector.load %arg4[%c0_5, %c0_6] : memref<512x8xbf16, #tpu.memory_space<vmem>>, vector<512x8xbf16>
    tpu.vector_store %arg4[%c0_5, %c0_6], %10 {strides = array<i32>} : memref<512x8xbf16, #tpu.memory_space<vmem>>, vector<512x8xbf16>,
    return
  }
  func.func @transform_0(%arg0: i32) -> (i32, i32) {
    %c0_i32 = arith.constant 0 : i32
    %c0_i32_0 = arith.constant 0 : i32
    return %arg0, %c0_i32 : i32, i32
  }
  func.func @transform_1(%arg0: i32) -> (i32, i32) {
    %c0_i32 = arith.constant 0 : i32
    %c0_i32_0 = arith.constant 0 : i32
    %c0_i32_1 = arith.constant 0 : i32
    return %c0_i32, %c0_i32_0 : i32, i32
  }
  func.func @transform_2(%arg0: i32) -> (i32, i32) {
    %c0_i32 = arith.constant 0 : i32
    %c0_i32_0 = arith.constant 0 : i32
    %c0_i32_1 = arith.constant 0 : i32
    return %c0_i32, %c0_i32_0 : i32, i32
  }
  func.func @transform_3(%arg0: i32) -> (i32, i32) {
    %c0_i32 = arith.constant 0 : i32
    %c0_i32_0 = arith.constant 0 : i32
    return %arg0, %c0_i32 : i32, i32
  }
}

module attributes {stable_mosaic.version = 11 : i64} {
  func.func @_matmul_kernel(%arg0: i32, %arg1: i32, %arg2: i32, %arg3: memref<512x8xbf16, #tpu.memory_space<vmem>>, %arg4: memref<8x128xbf16, #tpu.memory_space<vmem>>, %arg5: memref<512x128xbf16, #tpu.memory_space<vmem>>, %arg6: memref<512x128xf32, #tpu.memory_space<vmem>>) attributes {dimension_semantics = [#tpu.dimension_semantics<parallel>, #tpu.dimension_semantics<parallel>, #tpu.dimension_semantics<arbitrary>], iteration_bounds = array<i64: 16, 1, 1>, scalar_prefetch = 0 : i64, scratch_operands = 1 : i64, tpu.core_type = #tpu.core_type<tc>, window_params = [{transform_indices = @transform_0, window_bounds = array<i64: 512, 8>}, {transform_indices = @transform_1, window_bounds = array<i64: 8, 128>}, {transform_indices = @transform_2, window_bounds = array<i64: 512, 128>}]} {
    %c0_i32 = arith.constant 0 : i32
    %0 = arith.cmpi eq, %arg2, %c0_i32 : i32
    %1 = arith.extui %0 : i1 to i32
    %c0_i32_0 = arith.constant 0 : i32
    %2 = arith.cmpi ne, %1, %c0_i32_0 : i32
    scf.if %2 {
      %cst_10 = arith.constant 0.000000e+00 : f32
      %12 = vector.broadcast %cst_10 : f32 to vector<512x128xf32>
      %c0_11 = arith.constant 0 : index
      %c0_12 = arith.constant 0 : index
      %13 = vector.load %arg6[%c0_11, %c0_12] : memref<512x128xf32, #tpu.memory_space<vmem>>, vector<512x128xf32>
      tpu.vector_store %arg6[%c0_11, %c0_12], %12 {strides = array<i32>} : memref<512x128xf32, #tpu.memory_space<vmem>>, vector<512x128xf32>,
    } else {
    }
    %c0 = arith.constant 0 : index
    %c0_1 = arith.constant 0 : index
    %3 = vector.load %arg6[%c0, %c0_1] : memref<512x128xf32, #tpu.memory_space<vmem>>, vector<512x128xf32>
    %c0_2 = arith.constant 0 : index
    %c0_3 = arith.constant 0 : index
    %4 = vector.load %arg3[%c0_2, %c0_3] : memref<512x8xbf16, #tpu.memory_space<vmem>>, vector<512x8xbf16>
    %c0_4 = arith.constant 0 : index
    %c0_5 = arith.constant 0 : index
    %5 = vector.load %arg4[%c0_4, %c0_5] : memref<8x128xbf16, #tpu.memory_space<vmem>>, vector<8x128xbf16>
    %cst = arith.constant dense<0.000000e+00> : vector<512x128xf32>
    %6 = tpu.matmul %4, %5, %cst {dimension_numbers = #tpu.dot_dimension_numbers<[1], [0], [0], [1], [0, 0, 1, 1], [], []>} : vector<512x8xbf16>, vector<8x128xbf16>, vector<512x128xf32> -> vector<512x128xf32>
    %7 = arith.addf %3, %6 : vector<512x128xf32>
    %c0_6 = arith.constant 0 : index
    %c0_7 = arith.constant 0 : index
    %8 = vector.load %arg6[%c0_6, %c0_7] : memref<512x128xf32, #tpu.memory_space<vmem>>, vector<512x128xf32>
    tpu.vector_store %arg6[%c0_6, %c0_7], %7 {strides = array<i32>} : memref<512x128xf32, #tpu.memory_space<vmem>>, vector<512x128xf32>,
    %c0_i32_8 = arith.constant 0 : i32
    %9 = arith.cmpi eq, %arg2, %c0_i32_8 : i32
    %10 = arith.extui %9 : i1 to i32
    %c0_i32_9 = arith.constant 0 : i32
    %11 = arith.cmpi ne, %10, %c0_i32_9 : i32
    scf.if %11 {
      %c0_10 = arith.constant 0 : index
      %c0_11 = arith.constant 0 : index
      %12 = vector.load %arg6[%c0_10, %c0_11] : memref<512x128xf32, #tpu.memory_space<vmem>>, vector<512x128xf32>
      %13 = arith.truncf %12 : vector<512x128xf32> to vector<512x128xbf16>
      %c0_12 = arith.constant 0 : index
      %c0_13 = arith.constant 0 : index
      %14 = vector.load %arg5[%c0_12, %c0_13] : memref<512x128xbf16, #tpu.memory_space<vmem>>, vector<512x128xbf16>
      tpu.vector_store %arg5[%c0_12, %c0_13], %13 {strides = array<i32>} : memref<512x128xbf16, #tpu.memory_space<vmem>>, vector<512x128xbf16>,
    } else {
    }
    return
  }
  func.func @transform_0(%arg0: i32, %arg1: i32, %arg2: i32) -> (i32, i32) {
    %c0_i32 = arith.constant 0 : i32
    return %arg0, %arg2 : i32, i32
  }
  func.func @transform_1(%arg0: i32, %arg1: i32, %arg2: i32) -> (i32, i32) {
    %c0_i32 = arith.constant 0 : i32
    return %arg2, %arg1 : i32, i32
  }
  func.func @transform_2(%arg0: i32, %arg1: i32, %arg2: i32) -> (i32, i32) {
    %c0_i32 = arith.constant 0 : i32
    return %arg0, %arg1 : i32, i32
  }
}

</mosaic_0001>

<bundles_post_ra>
// kernel: generator_forward_pallas.12
= control target key start
LH: loop header
LB: loop body
LE: loop exit
PB: predicated region body
PF: predicated region fallthrough
CT: control target
= control target key end

     0   :  { %s133_s0 = inlined_call_operand.vmem [shape: f32[32,128], index: 0, kind: input, shape index: {}]   ;;  %s134_s1 = inlined_call_operand.vmem [shape: f32[1,128], index: 1, kind: input, shape index: {}]   ;;  %s135_s2 = inlined_call_operand.vmem [shape: f32[1,128], index: 2, kind: input, shape index: {}]   ;;  %s136_s3 = inlined_call_operand.vmem [shape: bf16[32,128], index: 3, kind: output, shape index: {}]  }
   0x1   :  { %v14_v0 = vld [vmem:[%s133_s0] sm:$0xff]  ;;  %v15_v1 = vld [vmem:[%s133_s0 + $0x8] sm:$0xff]  ;;  %v16_v6 = vld [vmem:[%s133_s0 + $0x10] sm:$0xff] }
   0x2   :  { %v68_v2 = vld [vmem:[%s134_s1] ss:$0 sm:$0xff]  ;;  %v17_v7 = vld [vmem:[%s133_s0 + $0x18] sm:$0xff] }
   0x3   :  { %v25_v3 = vmul.f32 %v68_v2, %v14_v0  ;;  %v26_v4 = vmul.f32 %v68_v2, %v15_v1  ;;  %v69_v5 = vld [vmem:[%s135_s2] ss:$0 sm:$0xff]  ;;  %v27_v8 = vmul.f32 %v68_v2, %v16_v6  ;;  %v28_v9 = vmul.f32 %v68_v2, %v17_v7 }
   0x5   :  { %v36_v10 = vadd.f32 %v69_v5, %v25_v3  ;;  %v37_v11 = vadd.f32 %v69_v5, %v26_v4  ;;  %v38_v12 = vadd.f32 %v69_v5, %v27_v8  ;;  %v39_v13 = vadd.f32 %v69_v5, %v28_v9 }
   0x7   :  { %v40_v14 = vmax.f32 %v36_v10, 0.0  ;;  %v41_v15 = vmax.f32 %v37_v11, 0.0  ;;  %v42_v16 = vmax.f32 %v38_v12, 0.0  ;;  %v43_v17 = vmax.f32 %v39_v13, 0.0 }
   0x9   :  { %v81_v18 = vpack.c.bf16 %v41_v15, %v40_v14  ;;  %v86_v19 = vpack.c.bf16 %v43_v17, %v42_v16 }
   0xb   :  { %82 = vst [vmem:[%s136_s3] sm:$0xff] %v81_v18   ;;  %88 = vst [vmem:[%s136_s3 + $0x8] sm:$0xff] %v86_v19  }

// kernel: generator_forward_pallas.11
= control target key start
LH: loop header
LB: loop body
LE: loop exit
PB: predicated region body
PF: predicated region fallthrough
CT: control target
= control target key end

     0   :  { %7 = vsyncpa [#allocation4], 0  ;;  %s1313_s0 = inlined_call_operand.vmem [shape: bf16[16,64], index: 0, kind: input, shape index: {}]   ;;  %s1314_s1 = inlined_call_operand.hbm [shape: bf16[64,2048], index: 1, kind: input, shape index: {}]   ;;  %s1315_s2 = inlined_call_operand.vmem [shape: bf16[16,2048], index: 2, kind: output, shape index: {}]  }
   0x1   :  { %9 = vsyncpa [#allocation4 + $0x1], 0  ;;  %s1114_s9 = smov 0   ;;  %s1116_s10 = smov 0  }
   0x2   :  { %s1118_s11 = smov 0   ;;  %s1120_s12 = smov 0  }
   0x3   :  { %s1122_s13 = smov 0   ;;  %s1124_s14 = smov 0  }
   0x4 LB: > { %s881_s15 = sadd.s32 4294967295, %s1092_s14   ;;  %s30_s16 = sadd.s32 1, %s1088_s13  ;;  %s1092_s14 = sphi %s1124_s14, %s15_s14   ;;  %s1088_s13 = sphi %s1122_s13, %s1326_s13   ;;  %s1084_s12 = sphi %s1120_s12, %s1325_s12   ;;  %s1080_s11 = sphi %s1118_s11, %s1324_s11   ;;  %s1076_s10 = sphi %s1116_s10, %s1323_s10   ;;  %s1072_s9 = sphi %s1114_s9, %s1322_s9  }
   0x5   : > { %p32_p0 = scmp.ge.s32.totalorder %s30_s16, 2  ;;  %s71_s17 = sadd.s32 1, %s1080_s11 }
   0x6   : > { %p78_p1 = scmp.ne.s32.totalorder %s1080_s11, %s1076_s10  ;;  %p79_p2 = scmp.eq.s32.totalorder %s1092_s14, 0 }
   0x7   : > { %s1328_s16 = smov (%p32_p0, %s30_s16), 0  ;;  %p84_p4 = scmp.ne.s32.totalorder %s1076_s10, %s1072_s9 }
   0x8   : > { %p1150_p3 = por %p79_p2, %p78_p1  ;;  %s67_s19 = ssub.s32 %s1088_s13, %s1328_s16 }
   0x9   : > { %p85_p5 = scmp.eq.s32.totalorder %s881_s15, 0  ;;  %p69_p6 = scmp.eq.s32.totalorder %s67_s19, 0 }
   0xa   : > { %p110_p7 = scmp.eq.s32.totalorder %s881_s15, 1  ;;  %p958_p10 = scmp.lt.s32.totalorder %s1092_s14, 2 }
   0xb   : > { %p1157_p8 = por %p85_p5, %p84_p4  ;;  %s148_s23 = sand.u32 1, %s1080_s11  }
   0xc   : > { %s1162_s21 = scalar_select %p69_p6, %s1080_s11, %s71_s17  }
   0xd   : > { %p1164_p9 = por %p110_p7, %p78_p1  ;;  %s942_s24 = sshll.u32 %s1088_s13, 9 }
   0xe   : > { %s886_s25 = sshll.u32 %s148_s23, 8  ;;  %s1174_s28 = scalar_lea.hbm %s1314_s1, %s942_s24 }
   0xf   : > { %s1318_s22 = scalar_select %p1164_p9, 1, 0 }
  0x10   : > { %s152_s29 = scalar_lea.vmem [#allocation3], %s886_s25  ;;  %p1178_p11 = pnand %p958_p10, %p1150_p3 }
  0x11   : > { %s162_s30 = sshll.u32 %s152_s29, 4  ;;  %s1185_s4 = scalar_lea.sflag [#allocation4], %s148_s23  ;;  %s1182_s30 = int_to_ptr.vmem [resolvable:$true] %s162_s30 }
  0x12   : > { %s1012_s5 = scalar_lea.hbm %s1174_s28, 4096  ;;  %p1014_p0 = pneg %p1178_p11 }
  0x13   : > { %p1013_p13 = scmp.ne.s32.totalorder %s1174_s28, %s1012_s5  ;;  %s1017_s8 = scalar_lea.hbm %s1314_s1, 8192 }
  0x14   : > { %p1018_p3 = scmp.lt.u32.totalorder %s1174_s28, %s1314_s1  ;;  %p1019_p4 = scmp.lt.u32.totalorder %s1017_s8, %s1012_s5 }
  0x15   : > { %p1015_p1 = pnand %p1014_p0, %p1013_p13  ;;  %p1021_p6 = scmp.lt.u32.totalorder %s1012_s5, %s1174_s28 }
  0x16   : > { %p1020_p5 = por %p1019_p4, %p1018_p3 }
  0x17   : > { %p1016_p2 = pneg %p1015_p1 }
  0x18   : > { %p1022_p7 = por %p1021_p6, %p1020_p5 }
  0x1a   : > { %p1023_p10 = pnand %p1022_p7, %p1016_p2 }
  0x1c   : > { %1026 = shalt.err (!%p1023_p10)
}
  0x1d   : > { %s1027_s17 = scalar_lea.vmem %s1182_s30, 4096  ;;  %s1094_s18 = smov [#allocation3]  }
  0x1e   : > { %p1028_p13 = scmp.ne.s32.totalorder %s1182_s30, %s1027_s17  ;;  %s1032_s19 = sshll.u32 %s1094_s18, 4  ;;  %s1033_s19 = int_to_ptr.vmem [resolvable:$false] %s1032_s19 }
  0x1f   : > { %s1034_s23 = scalar_lea.vmem %s1033_s19, 8192  ;;  %p1035_p9 = scmp.lt.s32.totalorder %s1182_s30, %s1033_s19 }
  0x20   : > { %p1030_p1 = pnand %p1028_p13, %p1014_p0  ;;  %p1036_p3 = scmp.lt.s32.totalorder %s1034_s23, %s1027_s17 }
  0x22   : > { %p1031_p12 = pneg %p1030_p1  ;;  %p1037_p4 = por %p1036_p3, %p1035_p9 }
  0x24   : > { %p1038_p5 = pnand %p1037_p4, %p1031_p12 }
  0x26   : > { %1041 = shalt.err (!%p1038_p5)
}
  0x27   : > { %s1095_s24 = smov 1024   ;;  %s1096_s25 = smov 512  }
  0x28   : > { %s1097_s26 = smov 32   ;;  %p170_p0 = scmp.lt.s32.totalorder %s1092_s14, 3 }
  0x29   : > { %957 = dma.hbm_to_vmem [thread:$0]  (!%p1178_p11), %s1174_s28, 4096, %s1182_s30, %s1185_s4, %s1095_s24, %s1096_s25, %s1097_s26  }
  0x2a   : > { %p1320_p2 = scmp.ge.s32.totalorder %s1092_s14, 1 }
  0x2c   : > { %p171_p6 = pnand %p1320_p2, %p170_p0 }
  0x2d   : > { %s1217_s27 = sand.u32 (!%p171_p6), 1, %s1076_s10  }
  0x2e   : > { %174 = sbr.rel (%p171_p6) target bundleno = 316 (0x13c), region = 28  ;;  %s890_s29 = sshll.u32 (!%p171_p6), %s1217_s27, 8 }
  0x2f   : > { %s177_s5 = scalar_lea.sflag (!%p171_p6), [#allocation4], %s1217_s27  ;;  %s1221_s6 = scalar_lea.vmem (!%p171_p6), [#allocation3], %s890_s29 }
  0x35   : > { %1067 = dma.done.wait (%p1157_p8), %s177_s5, 4096  }
  0x36   : > { %1069 = vsyncadd (%p1157_p8), %s177_s5, 4294963200  ;;  %v1098_v0 = vmov 0   ;;  %v260_v1 = vld [vmem:[%s1221_s6] sm:$0xff]  ;;  %v261_v3 = vld [vmem:[%s1221_s6 + $0x8] sm:$0xff]  ;;  %vm457_vm0 = vcmask 523264   ;;  %s891_s30 = sshll.u32 %s1217_s27, 6 }
  0x37   : > { %493 = vmatprep.mubr.bf16.mxu0 %v1098_v0  ;;  %536 = vmatprep.mubr.bf16.mxu1 %v1098_v0  ;;  %v264_v2 = vld [vmem:[%s1221_s6 + $0x20] sm:$0xff]  ;;  %v265_v5 = vld [vmem:[%s1221_s6 + $0x28] sm:$0xff]  ;;  %v262_v31 = vld [vmem:[%s1221_s6 + $0x10] sm:$0xff]  ;;  %s1271_s3 = scalar_lea.vmem [#allocation5], %s891_s30  ;;  %p1321_p8 = scmp.ne.s32.totalorder %s1318_s22, 0 }
  0x38   : > { %v894_v4 = vcombine.high %v260_v1, %v264_v2  ;;  %v893_v6 = vcombine.low %v260_v1, %v264_v2  ;;  %v268_v7 = vld [vmem:[%s1221_s6 + $0x40] sm:$0xff]  ;;  %v896_v9 = vcombine.high %v261_v3, %v265_v5  ;;  %v895_v10 = vcombine.low %v261_v3, %v265_v5  ;;  %v269_v12 = vld [vmem:[%s1221_s6 + $0x48] sm:$0xff]  ;;  %v266_v32 = vld [vmem:[%s1221_s6 + $0x30] sm:$0xff]  ;;  %s951_s4 = sshll.u32 (%p1321_p8), %s1084_s12, 5 }
  0x39   : > { %v272_v8 = vld [vmem:[%s1221_s6 + $0x60] sm:$0xff]  ;;  %v273_v13 = vld [vmem:[%s1221_s6 + $0x68] sm:$0xff]  ;;  %v263_v33 = vld [vmem:[%s1221_s6 + $0x18] sm:$0xff]  ;;  %v898_v37 = vcombine.high %v262_v31, %v266_v32  ;;  %v897_v44 = vcombine.low %v262_v31, %v266_v32  ;;  %s752_s9 = scalar_lea.vmem (%p1321_p8), %s1315_s2, %s951_s4 }
  0x3a   : > { %v902_v11 = vcombine.high %v268_v7, %v272_v8  ;;  %v276_v14 = vld [vmem:[%s1221_s6 + $0x80] sm:$0xff]  ;;  %461 = vmatprep.subr.bf16.mxu0 %v894_v4  ;;  %v904_v15 = vcombine.high %v269_v12, %v273_v13  ;;  %v277_v17 = vld [vmem:[%s1221_s6 + $0x88] sm:$0xff]  ;;  %504 = vmatprep.subr.bf16.mxu1 %v896_v9  ;;  %v901_v19 = vcombine.low %v268_v7, %v272_v8  ;;  %v267_v34 = vld [vmem:[%s1221_s6 + $0x38] sm:$0xff] }
  0x3b   : > { %v280_v16 = vld [vmem:[%s1221_s6 + $0xa0] sm:$0xff]  ;;  %v281_v18 = vld [vmem:[%s1221_s6 + $0xa8] sm:$0xff]  ;;  %462 = vmatpush1.bf16.msra.mxu0 %v893_v6  ;;  %505 = vmatpush1.bf16.msra.mxu1 %v895_v10  ;;  %v903_v20 = vcombine.low %v269_v12, %v273_v13  ;;  %v900_v38 = vcombine.high %v263_v33, %v267_v34  ;;  %v270_v39 = vld [vmem:[%s1221_s6 + $0x50] sm:$0xff]  ;;  %v899_v45 = vcombine.low %v263_v33, %v267_v34 }
  0x3c   : > { %463 = vmatprep.subr.bf16.mxu0 %v902_v11  ;;  %v910_v21 = vcombine.high %v276_v14, %v280_v16  ;;  %506 = vmatprep.subr.bf16.mxu1 %v904_v15  ;;  %v912_v22 = vcombine.high %v277_v17, %v281_v18  ;;  %v284_v23 = vld [vmem:[%s1221_s6 + $0xc0] sm:$0xff]  ;;  %v285_v25 = vld [vmem:[%s1221_s6 + $0xc8] sm:$0xff]  ;;  %v909_v27 = vcombine.low %v276_v14, %v280_v16  ;;  %v274_v40 = vld [vmem:[%s1221_s6 + $0x70] sm:$0xff] }
  0x3d   : > { %v288_v24 = vld [vmem:[%s1221_s6 + $0xe0] sm:$0xff]  ;;  %v289_v26 = vld [vmem:[%s1221_s6 + $0xe8] sm:$0xff]  ;;  %v911_v28 = vcombine.low %v277_v17, %v281_v18  ;;  %v271_v42 = vld [vmem:[%s1221_s6 + $0x58] sm:$0xff]  ;;  %v906_v46 = vcombine.high %v270_v39, %v274_v40  ;;  %v905_v52 = vcombine.low %v270_v39, %v274_v40 }
  0x3e   : > { %v918_v29 = vcombine.high %v284_v23, %v288_v24  ;;  %v920_v30 = vcombine.high %v285_v25, %v289_v26  ;;  %v917_v35 = vcombine.low %v284_v23, %v288_v24  ;;  %v919_v36 = vcombine.low %v285_v25, %v289_v26  ;;  %v1011_v41 = vld [vmem:[%s1313_s0] sm:$0xff]   ;;  %v275_v43 = vld [vmem:[%s1221_s6 + $0x78] sm:$0xff]  ;;  %v278_v48 = vld [vmem:[%s1221_s6 + $0x90] sm:$0xff] }
  0x3f   : > { %464 = vmatpush1.bf16.msra.mxu0 %v901_v19  ;;  %507 = vmatpush1.bf16.msra.mxu1 %v903_v20  ;;  %v908_v47 = vcombine.high %v271_v42, %v275_v43  ;;  %v282_v49 = vld [vmem:[%s1221_s6 + $0xb0] sm:$0xff]  ;;  %v279_v50 = vld [vmem:[%s1221_s6 + $0x98] sm:$0xff]  ;;  %v907_v53 = vcombine.low %v271_v42, %v275_v43 }
  0x40   : > { %465 = vmatprep.subr.bf16.mxu0 %v910_v21  ;;  %508 = vmatprep.subr.bf16.mxu1 %v912_v22  ;;  %v283_v51 = vld [vmem:[%s1221_s6 + $0xb8] sm:$0xff]  ;;  %v914_v54 = vcombine.high %v278_v48, %v282_v49  ;;  %v286_v56 = vld [vmem:[%s1221_s6 + $0xd0] sm:$0xff]  ;;  %v913_v60 = vcombine.low %v278_v48, %v282_v49 }
  0x41   : > { %v916_v55 = vcombine.high %v279_v50, %v283_v51  ;;  %v290_v57 = vld [vmem:[%s1221_s6 + $0xf0] sm:$0xff]  ;;  %v287_v58 = vld [vmem:[%s1221_s6 + $0xd8] sm:$0xff]  ;;  %v915_v61 = vcombine.low %v279_v50, %v283_v51 }
  0x42   : > { %v291_v59 = vld [vmem:[%s1221_s6 + $0xf8] sm:$0xff]  ;;  %v922_v62 = vcombine.high %v286_v56, %v290_v57  ;;  %v921_v1 = vcombine.low %v286_v56, %v290_v57 }
  0x43   : > { %466 = vmatpush1.bf16.msra.mxu0 %v909_v27  ;;  %509 = vmatpush1.bf16.msra.mxu1 %v911_v28  ;;  %v924_v63 = vcombine.high %v287_v58, %v291_v59  ;;  %v923_v2 = vcombine.low %v287_v58, %v291_v59 }
  0x44   : > { %467 = vmatprep.subr.bf16.mxu0 %v918_v29  ;;  %510 = vmatprep.subr.bf16.mxu1 %v920_v30 }
  0x47   : > { %468 = vmatpush1.bf16.msra.mxu0 %v917_v35  ;;  %511 = vmatpush1.bf16.msra.mxu1 %v919_v36 }
  0x48   : > { %547 = vmatprep.subr.bf16.mxu0 %v898_v37  ;;  %590 = vmatprep.subr.bf16.mxu1 %v900_v38 }
  0x4a   : > { %925 = vmatmul.mubr.msk.bf16.vlgmr.msra.gmra.mrb[0].mxu0 %vm457_vm0, %v1011_v41  ;;  %926 = vmatmul.mubr.msk.bf16.vlgmr.msra.gmra.mrb[0].mxu1 %vm457_vm0, %v1011_v41 }
  0x4b   : > { %548 = vmatpush1.bf16.msra.mxu0 %v897_v44  ;;  %591 = vmatpush1.bf16.msra.mxu1 %v899_v45 }
  0x4c   : > { %549 = vmatprep.subr.bf16.mxu0 %v906_v46  ;;  %592 = vmatprep.subr.bf16.mxu1 %v908_v47 }
  0x4d   : > { %579 = vmatprep.mubr.bf16.mxu0 %v1098_v0  ;;  %622 = vmatprep.mubr.bf16.mxu1 %v1098_v0 }
  0x4f   : > { %550 = vmatpush1.bf16.msra.mxu0 %v905_v52  ;;  %593 = vmatpush1.bf16.msra.mxu1 %v907_v53 }
  0x50   : > { %551 = vmatprep.subr.bf16.mxu0 %v914_v54  ;;  %594 = vmatprep.subr.bf16.mxu1 %v916_v55 }
  0x53   : > { %552 = vmatpush1.bf16.msra.mxu0 %v913_v60  ;;  %595 = vmatpush1.bf16.msra.mxu1 %v915_v61 }
  0x54   : > { %553 = vmatprep.subr.bf16.mxu0 %v922_v62  ;;  %596 = vmatprep.subr.bf16.mxu1 %v924_v63 }
  0x57   : > { %554 = vmatpush1.bf16.msra.mxu0 %v921_v1  ;;  %597 = vmatpush1.bf16.msra.mxu1 %v923_v2 }
  0x5a   : > { %927 = vmatmul.mubr.msk.bf16.vlgmr.msra.gmra.mrb[4].mxu0 %vm457_vm0, %v1011_v41  ;;  %928 = vmatmul.mubr.msk.bf16.vlgmr.msra.gmra.mrb[4].mxu1 %vm457_vm0, %v1011_v41 }
 0x11d   : > { %v495_v0 = vpop.f32.mrb[0].mxu0  ;;  %v538_v3 = vpop.f32.mrb[0].mxu1 }
 0x11e   : > { %v497_v4 = vpop.f32.mrb[1].mxu0  ;;  %v540_v6 = vpop.f32.mrb[1].mxu1 }
 0x11f   : > { %v943_v5 = vpack.c.bf16 %v497_v4, %v495_v0  ;;  %v499_v7 = vpop.f32.mrb[2].mxu0  ;;  %v944_v8 = vpack.c.bf16 %v540_v6, %v538_v3  ;;  %v542_v9 = vpop.f32.mrb[2].mxu1 }
 0x120   : > { %v501_v10 = vpop.f32.mrb[3].mxu0  ;;  %v544_v12 = vpop.f32.mrb[3].mxu1 }
 0x121   : > { %732 = vst [vmem:[%s1271_s3] sm:$0xff] %v943_v5  ;;  %v947_v11 = vpack.c.bf16 %v501_v10, %v499_v7  ;;  %733 = vst [vmem:[%s1271_s3 + $0x8] sm:$0xff] %v944_v8  ;;  %v948_v13 = vpack.c.bf16 %v544_v12, %v542_v9 }
 0x123   : > { %736 = vst [vmem:[%s1271_s3 + $0x20] sm:$0xff] %v947_v11  ;;  %737 = vst [vmem:[%s1271_s3 + $0x28] sm:$0xff] %v948_v13 }
 0x128   : > { %v765_v26 = vld [vmem:[%s1271_s3] sm:$0xff] (%p1321_p8)  ;;  %v767_v27 = vld [vmem:[%s1271_s3 + $0x8] sm:$0xff] (%p1321_p8) }
 0x129   : > { %766 = vst [vmem:[%s752_s9] sm:$0xff] (%p1321_p8), %v765_v26  ;;  %768 = vst [vmem:[%s752_s9 + $0x8] sm:$0xff] (%p1321_p8), %v767_v27 }
 0x12a   : > { %v773_v30 = vld [vmem:[%s1271_s3 + $0x20] sm:$0xff] (%p1321_p8)  ;;  %v775_v31 = vld [vmem:[%s1271_s3 + $0x28] sm:$0xff] (%p1321_p8) }
 0x12b   : > { %774 = vst [vmem:[%s752_s9 + $0x40] sm:$0xff] (%p1321_p8), %v773_v30  ;;  %776 = vst [vmem:[%s752_s9 + $0x48] sm:$0xff] (%p1321_p8), %v775_v31 }
 0x12d   : > { %v581_v14 = vpop.f32.mrb[4].mxu0  ;;  %v624_v15 = vpop.f32.mrb[4].mxu1  ;;  %746 = sbr.rel (!%p1321_p8) target bundleno = 316 (0x13c), region = 44 }
 0x12e   : > { %v583_v16 = vpop.f32.mrb[5].mxu0  ;;  %v626_v18 = vpop.f32.mrb[5].mxu1 }
 0x12f   : > { %v945_v17 = vpack.c.bf16 %v583_v16, %v581_v14  ;;  %v585_v19 = vpop.f32.mrb[6].mxu0  ;;  %v946_v20 = vpack.c.bf16 %v626_v18, %v624_v15  ;;  %v628_v21 = vpop.f32.mrb[6].mxu1 }
 0x130   : > { %v587_v22 = vpop.f32.mrb[7].mxu0  ;;  %v630_v24 = vpop.f32.mrb[7].mxu1 }
 0x131   : > { %734 = vst [vmem:[%s1271_s3 + $0x10] sm:$0xff] %v945_v17  ;;  %v949_v23 = vpack.c.bf16 %v587_v22, %v585_v19  ;;  %735 = vst [vmem:[%s1271_s3 + $0x18] sm:$0xff] %v946_v20  ;;  %v950_v25 = vpack.c.bf16 %v630_v24, %v628_v21 }
 0x133   : > { %738 = vst [vmem:[%s1271_s3 + $0x30] sm:$0xff] %v949_v23  ;;  %739 = vst [vmem:[%s1271_s3 + $0x38] sm:$0xff] %v950_v25 }
 0x138   : > { %v769_v28 = vld [vmem:[%s1271_s3 + $0x10] sm:$0xff]  ;;  %v771_v29 = vld [vmem:[%s1271_s3 + $0x18] sm:$0xff] }
 0x139   : > { %770 = vst [vmem:[%s752_s9 + $0x10] sm:$0xff] %v769_v28  ;;  %772 = vst [vmem:[%s752_s9 + $0x18] sm:$0xff] %v771_v29 }
 0x13a   : > { %v777_v32 = vld [vmem:[%s1271_s3 + $0x30] sm:$0xff]  ;;  %v779_v33 = vld [vmem:[%s1271_s3 + $0x38] sm:$0xff] }
 0x13b   : > { %778 = vst [vmem:[%s752_s9 + $0x50] sm:$0xff] %v777_v32  ;;  %780 = vst [vmem:[%s752_s9 + $0x58] sm:$0xff] %v779_v33 }
 0x13c PF: > { %s15_s14 = sadd.s32 1, %s1092_s14   ;;  %s1322_s9 = smov %s1076_s10 }
 0x13d   : > { %p12_p9 = scmp.ge.s32.totalorder %s15_s14, 4   ;;  %s1323_s10 = smov %s1080_s11 }
 0x13e   : > { %s1324_s11 = smov %s1162_s21  ;;  %s1325_s12 = smov %s1088_s13 }
 0x13f   : > { %s1326_s13 = smov %s1328_s16  ;;  %14 = sbr.rel (!%p12_p9) target bundleno = 4 (0x4), region = 102 }
 0x146   :  { %796 = vsyncpa [#allocation4], 1 }
 0x147   :  { %798 = vsyncpa [#allocation4 + $0x1], 1 }

// kernel: generator_forward_pallas.13
= control target key start
LH: loop header
LB: loop body
LE: loop exit
PB: predicated region body
PF: predicated region fallthrough
CT: control target
= control target key end

     0   :  { %7 = vsyncpa [#allocation4], 0  ;;  %s1050_s9 = smov [#allocation3]   ;;  %s1155_s0 = inlined_call_operand.vmem [shape: bf16[32,128], index: 0, kind: input, shape index: {}]   ;;  %s1156_s1 = inlined_call_operand.hbm [shape: bf16[128,1024], index: 1, kind: input, shape index: {}]   ;;  %s1157_s2 = inlined_call_operand.vmem [shape: bf16[32,1024], index: 2, kind: output, shape index: {}]  }
   0x1   :  { %s15_s10 = sshll.u32 %s1050_s9, 4  ;;  %s1026_s13 = scalar_lea.hbm %s1156_s1, 8192  ;;  %s16_s10 = int_to_ptr.vmem [resolvable:$true] %s15_s10 }
   0x2   :  { %p1027_p0 = scmp.ne.s32.totalorder %s1156_s1, %s1026_s13  ;;  %p1030_p1 = scmp.lt.u32.totalorder %s1026_s13, %s1156_s1 }
   0x4   :  { %p1032_p2 = pnand %p1030_p1, %p1027_p0 }
   0x6   :  { %1035 = shalt.err (!%p1032_p2)
}
   0x7   :  { %s1036_s18 = scalar_lea.vmem %s16_s10, 8192  ;;  %p1041_p4 = scmp.lt.s32.totalorder %s16_s10, %s16_s10 }
   0x8   :  { %p1037_p3 = scmp.ne.s32.totalorder %s16_s10, %s1036_s18  ;;  %p1042_p5 = scmp.lt.s32.totalorder %s1036_s18, %s1036_s18 }
   0xa   :  { %p1043_p6 = por %p1042_p5, %p1041_p4 }
   0xc   :  { %p1044_p7 = pnand %p1043_p6, %p1037_p3 }
   0xe   :  { %1047 = shalt.err (!%p1044_p7)
}
   0xf   :  { %s1051_s19 = smov 512   ;;  %s1052_s20 = smov 32  }
  0x10   :  { %21 = dma.hbm_to_vmem [thread:$0]  %s1156_s1, 8192, %s16_s10, [#allocation4], %s1051_s19, %s1051_s19, %s1052_s20  }
  0x11   :  { %1048 = dma.done.wait [#allocation4], 8192  }
  0x12   :  { %1049 = vsyncadd [#allocation4], 4294959104  ;;  %v1053_v0 = vmov 0   ;;  %v98_v1 = vld [vmem:[#allocation3] sm:$0xff]  ;;  %v99_v3 = vld [vmem:[#allocation3 + $0x8] sm:$0xff] }
  0x13   :  { %526 = vmatprep.mubr.bf16.mxu0 %v1053_v0  ;;  %579 = vmatprep.mubr.bf16.mxu1 %v1053_v0  ;;  %v102_v2 = vld [vmem:[#allocation3 + $0x20] sm:$0xff]  ;;  %v103_v5 = vld [vmem:[#allocation3 + $0x28] sm:$0xff]  ;;  %v100_v63 = vld [vmem:[#allocation3 + $0x10] sm:$0xff] }
  0x14   :  { %v925_v4 = vcombine.high %v98_v1, %v102_v2  ;;  %v924_v6 = vcombine.low %v98_v1, %v102_v2  ;;  %v106_v7 = vld [vmem:[#allocation3 + $0x40] sm:$0xff]  ;;  %v927_v9 = vcombine.high %v99_v3, %v103_v5  ;;  %v926_v10 = vcombine.low %v99_v3, %v103_v5  ;;  %v107_v12 = vld [vmem:[#allocation3 + $0x48] sm:$0xff]  ;;  %v104_v1 = vld [vmem:[#allocation3 + $0x30] sm:$0xff] }
  0x15   :  { %v110_v8 = vld [vmem:[#allocation3 + $0x60] sm:$0xff]  ;;  %v111_v13 = vld [vmem:[#allocation3 + $0x68] sm:$0xff]  ;;  %v101_v2 = vld [vmem:[#allocation3 + $0x18] sm:$0xff] }
  0x16   :  { %v933_v11 = vcombine.high %v106_v7, %v110_v8  ;;  %v114_v14 = vld [vmem:[#allocation3 + $0x80] sm:$0xff]  ;;  %494 = vmatprep.subr.bf16.mxu0 %v925_v4  ;;  %v935_v15 = vcombine.high %v107_v12, %v111_v13  ;;  %v115_v17 = vld [vmem:[#allocation3 + $0x88] sm:$0xff]  ;;  %547 = vmatprep.subr.bf16.mxu1 %v927_v9  ;;  %v932_v19 = vcombine.low %v106_v7, %v110_v8  ;;  %v105_v3 = vld [vmem:[#allocation3 + $0x38] sm:$0xff] }
  0x17   :  { %v118_v16 = vld [vmem:[#allocation3 + $0xa0] sm:$0xff]  ;;  %v119_v18 = vld [vmem:[#allocation3 + $0xa8] sm:$0xff]  ;;  %495 = vmatpush1.bf16.msra.mxu0 %v924_v6  ;;  %548 = vmatpush1.bf16.msra.mxu1 %v926_v10  ;;  %v934_v20 = vcombine.low %v107_v12, %v111_v13  ;;  %v929_v6 = vcombine.high %v100_v63, %v104_v1  ;;  %v931_v7 = vcombine.high %v101_v2, %v105_v3  ;;  %v108_v8 = vld [vmem:[#allocation3 + $0x50] sm:$0xff] }
  0x18   :  { %496 = vmatprep.subr.bf16.mxu0 %v933_v11  ;;  %v941_v21 = vcombine.high %v114_v14, %v118_v16  ;;  %549 = vmatprep.subr.bf16.mxu1 %v935_v15  ;;  %v943_v22 = vcombine.high %v115_v17, %v119_v18  ;;  %v122_v23 = vld [vmem:[#allocation3 + $0xc0] sm:$0xff]  ;;  %v123_v25 = vld [vmem:[#allocation3 + $0xc8] sm:$0xff]  ;;  %v940_v27 = vcombine.low %v114_v14, %v118_v16  ;;  %v112_v9 = vld [vmem:[#allocation3 + $0x70] sm:$0xff] }
  0x19   :  { %v126_v24 = vld [vmem:[#allocation3 + $0xe0] sm:$0xff]  ;;  %v127_v26 = vld [vmem:[#allocation3 + $0xe8] sm:$0xff]  ;;  %v942_v28 = vcombine.low %v115_v17, %v119_v18  ;;  %v109_v11 = vld [vmem:[#allocation3 + $0x58] sm:$0xff]  ;;  %v928_v13 = vcombine.low %v100_v63, %v104_v1  ;;  %v930_v14 = vcombine.low %v101_v2, %v105_v3  ;;  %v937_v15 = vcombine.high %v108_v8, %v112_v9 }
  0x1a   :  { %v949_v29 = vcombine.high %v122_v23, %v126_v24  ;;  %v951_v30 = vcombine.high %v123_v25, %v127_v26  ;;  %v130_v31 = vld [vmem:[#allocation3 + $0x100] sm:$0xff]  ;;  %v131_v33 = vld [vmem:[#allocation3 + $0x108] sm:$0xff]  ;;  %v948_v35 = vcombine.low %v122_v23, %v126_v24  ;;  %v950_v36 = vcombine.low %v123_v25, %v127_v26  ;;  %v113_v12 = vld [vmem:[#allocation3 + $0x78] sm:$0xff] }
  0x1b   :  { %497 = vmatpush1.bf16.msra.mxu0 %v932_v19  ;;  %550 = vmatpush1.bf16.msra.mxu1 %v934_v20  ;;  %v134_v32 = vld [vmem:[#allocation3 + $0x120] sm:$0xff]  ;;  %v135_v34 = vld [vmem:[#allocation3 + $0x128] sm:$0xff]  ;;  %v939_v16 = vcombine.high %v109_v11, %v113_v12  ;;  %v116_v17 = vld [vmem:[#allocation3 + $0x90] sm:$0xff] }
  0x1c   :  { %498 = vmatprep.subr.bf16.mxu0 %v941_v21  ;;  %551 = vmatprep.subr.bf16.mxu1 %v943_v22  ;;  %v957_v37 = vcombine.high %v130_v31, %v134_v32  ;;  %v959_v38 = vcombine.high %v131_v33, %v135_v34  ;;  %v138_v39 = vld [vmem:[#allocation3 + $0x140] sm:$0xff]  ;;  %v139_v41 = vld [vmem:[#allocation3 + $0x148] sm:$0xff]  ;;  %v956_v43 = vcombine.low %v130_v31, %v134_v32  ;;  %v120_v18 = vld [vmem:[#allocation3 + $0xb0] sm:$0xff] }
  0x1d   :  { %v142_v40 = vld [vmem:[#allocation3 + $0x160] sm:$0xff]  ;;  %v143_v42 = vld [vmem:[#allocation3 + $0x168] sm:$0xff]  ;;  %v958_v44 = vcombine.low %v131_v33, %v135_v34  ;;  %v117_v19 = vld [vmem:[#allocation3 + $0x98] sm:$0xff]  ;;  %v936_v21 = vcombine.low %v108_v8, %v112_v9  ;;  %v938_v22 = vcombine.low %v109_v11, %v113_v12  ;;  %v945_v23 = vcombine.high %v116_v17, %v120_v18 }
  0x1e   :  { %v965_v45 = vcombine.high %v138_v39, %v142_v40  ;;  %v967_v46 = vcombine.high %v139_v41, %v143_v42  ;;  %v146_v47 = vld [vmem:[#allocation3 + $0x180] sm:$0xff]  ;;  %v147_v49 = vld [vmem:[#allocation3 + $0x188] sm:$0xff]  ;;  %v964_v51 = vcombine.low %v138_v39, %v142_v40  ;;  %v966_v52 = vcombine.low %v139_v41, %v143_v42  ;;  %v121_v20 = vld [vmem:[#allocation3 + $0xb8] sm:$0xff] }
  0x1f   :  { %499 = vmatpush1.bf16.msra.mxu0 %v940_v27  ;;  %552 = vmatpush1.bf16.msra.mxu1 %v942_v28  ;;  %v150_v48 = vld [vmem:[#allocation3 + $0x1a0] sm:$0xff]  ;;  %v151_v50 = vld [vmem:[#allocation3 + $0x1a8] sm:$0xff]  ;;  %v947_v24 = vcombine.high %v117_v19, %v121_v20  ;;  %v124_v25 = vld [vmem:[#allocation3 + $0xd0] sm:$0xff]  ;;  %v946_v31 = vcombine.low %v117_v19, %v121_v20 }
  0x20   :  { %500 = vmatprep.subr.bf16.mxu0 %v949_v29  ;;  %553 = vmatprep.subr.bf16.mxu1 %v951_v30  ;;  %v973_v53 = vcombine.high %v146_v47, %v150_v48  ;;  %v975_v54 = vcombine.high %v147_v49, %v151_v50  ;;  %v154_v55 = vld [vmem:[#allocation3 + $0x1c0] sm:$0xff]  ;;  %v155_v57 = vld [vmem:[#allocation3 + $0x1c8] sm:$0xff]  ;;  %v972_v59 = vcombine.low %v146_v47, %v150_v48  ;;  %v128_v26 = vld [vmem:[#allocation3 + $0xf0] sm:$0xff] }
  0x21   :  { %v158_v56 = vld [vmem:[#allocation3 + $0x1e0] sm:$0xff]  ;;  %v159_v58 = vld [vmem:[#allocation3 + $0x1e8] sm:$0xff]  ;;  %v974_v60 = vcombine.low %v147_v49, %v151_v50  ;;  %v125_v27 = vld [vmem:[#allocation3 + $0xd8] sm:$0xff]  ;;  %v944_v30 = vcombine.low %v116_v17, %v120_v18  ;;  %v953_v32 = vcombine.high %v124_v25, %v128_v26 }
  0x22   :  { %v981_v61 = vcombine.high %v154_v55, %v158_v56  ;;  %v983_v62 = vcombine.high %v155_v57, %v159_v58  ;;  %v980_v4 = vcombine.low %v154_v55, %v158_v56  ;;  %v982_v5 = vcombine.low %v155_v57, %v159_v58  ;;  %v1086_v10 = vld [vmem:[%s1155_s0] sm:$0xff]   ;;  %v129_v28 = vld [vmem:[#allocation3 + $0xf8] sm:$0xff]  ;;  %v1095_v29 = vld [vmem:[%s1155_s0 + $0x8] sm:$0xff]  }
  0x23   :  { %501 = vmatpush1.bf16.msra.mxu0 %v948_v35  ;;  %554 = vmatpush1.bf16.msra.mxu1 %v950_v36  ;;  %v955_v33 = vcombine.high %v125_v27, %v129_v28  ;;  %v132_v34 = vld [vmem:[#allocation3 + $0x110] sm:$0xff]  ;;  %v133_v36 = vld [vmem:[#allocation3 + $0x118] sm:$0xff]  ;;  %v954_v39 = vcombine.low %v125_v27, %v129_v28 }
  0x24   :  { %502 = vmatprep.subr.bf16.mxu0 %v957_v37  ;;  %555 = vmatprep.subr.bf16.mxu1 %v959_v38  ;;  %v136_v35 = vld [vmem:[#allocation3 + $0x130] sm:$0xff]  ;;  %v137_v37 = vld [vmem:[#allocation3 + $0x138] sm:$0xff]  ;;  %v952_v38 = vcombine.low %v124_v25, %v128_v26 }
  0x25   :  { %v961_v40 = vcombine.high %v132_v34, %v136_v35  ;;  %v963_v41 = vcombine.high %v133_v36, %v137_v37  ;;  %v140_v42 = vld [vmem:[#allocation3 + $0x150] sm:$0xff]  ;;  %v962_v47 = vcombine.low %v133_v36, %v137_v37 }
  0x26   :  { %v148_v50 = vld [vmem:[#allocation3 + $0x190] sm:$0xff] }
  0x27   :  { %503 = vmatpush1.bf16.msra.mxu0 %v956_v43  ;;  %556 = vmatpush1.bf16.msra.mxu1 %v958_v44  ;;  %v144_v43 = vld [vmem:[#allocation3 + $0x170] sm:$0xff]  ;;  %v141_v44 = vld [vmem:[#allocation3 + $0x158] sm:$0xff] }
  0x28   :  { %504 = vmatprep.subr.bf16.mxu0 %v965_v45  ;;  %557 = vmatprep.subr.bf16.mxu1 %v967_v46  ;;  %v145_v45 = vld [vmem:[#allocation3 + $0x178] sm:$0xff]  ;;  %v960_v46 = vcombine.low %v132_v34, %v136_v35  ;;  %v969_v48 = vcombine.high %v140_v42, %v144_v43  ;;  %v156_v58 = vld [vmem:[#allocation3 + $0x1d0] sm:$0xff] }
  0x29   :  { %v971_v49 = vcombine.high %v141_v44, %v145_v45  ;;  %v970_v55 = vcombine.low %v141_v44, %v145_v45 }
  0x2b   :  { %505 = vmatpush1.bf16.msra.mxu0 %v964_v51  ;;  %558 = vmatpush1.bf16.msra.mxu1 %v966_v52  ;;  %v152_v51 = vld [vmem:[#allocation3 + $0x1b0] sm:$0xff]  ;;  %v149_v52 = vld [vmem:[#allocation3 + $0x198] sm:$0xff] }
  0x2c   :  { %506 = vmatprep.subr.bf16.mxu0 %v973_v53  ;;  %559 = vmatprep.subr.bf16.mxu1 %v975_v54  ;;  %v153_v53 = vld [vmem:[#allocation3 + $0x1b8] sm:$0xff]  ;;  %v968_v54 = vcombine.low %v140_v42, %v144_v43  ;;  %v977_v56 = vcombine.high %v148_v50, %v152_v51 }
  0x2d   :  { %v979_v57 = vcombine.high %v149_v52, %v153_v53  ;;  %v978_v63 = vcombine.low %v149_v52, %v153_v53 }
  0x2f   :  { %507 = vmatpush1.bf16.msra.mxu0 %v972_v59  ;;  %560 = vmatpush1.bf16.msra.mxu1 %v974_v60  ;;  %v160_v59 = vld [vmem:[#allocation3 + $0x1f0] sm:$0xff]  ;;  %v157_v60 = vld [vmem:[#allocation3 + $0x1d8] sm:$0xff] }
  0x30   :  { %508 = vmatprep.subr.bf16.mxu0 %v981_v61  ;;  %561 = vmatprep.subr.bf16.mxu1 %v983_v62  ;;  %v161_v61 = vld [vmem:[#allocation3 + $0x1f8] sm:$0xff]  ;;  %v976_v62 = vcombine.low %v148_v50, %v152_v51  ;;  %v985_v1 = vcombine.high %v156_v58, %v160_v59  ;;  %v984_v3 = vcombine.low %v156_v58, %v160_v59 }
  0x31   :  { %v987_v2 = vcombine.high %v157_v60, %v161_v61 }
  0x33   :  { %509 = vmatpush1.bf16.msra.mxu0 %v980_v4  ;;  %562 = vmatpush1.bf16.msra.mxu1 %v982_v5  ;;  %v986_v4 = vcombine.low %v157_v60, %v161_v61 }
  0x34   :  { %600 = vmatprep.subr.bf16.mxu0 %v929_v6  ;;  %653 = vmatprep.subr.bf16.mxu1 %v931_v7 }
  0x36   :  { %527 = vmatmul.mubr.bf16.vlgmr.msra.gmra.mrb[0].mxu0 %v1086_v10  ;;  %580 = vmatmul.mubr.bf16.vlgmr.msra.gmra.mrb[0].mxu1 %v1086_v10 }
  0x37   :  { %601 = vmatpush1.bf16.msra.mxu0 %v928_v13  ;;  %654 = vmatpush1.bf16.msra.mxu1 %v930_v14 }
  0x38   :  { %602 = vmatprep.subr.bf16.mxu0 %v937_v15  ;;  %655 = vmatprep.subr.bf16.mxu1 %v939_v16 }
  0x39   :  { %536 = vmatprep.mubr.bf16.mxu0 %v1053_v0  ;;  %589 = vmatprep.mubr.bf16.mxu1 %v1053_v0 }
  0x3b   :  { %603 = vmatpush1.bf16.msra.mxu0 %v936_v21  ;;  %656 = vmatpush1.bf16.msra.mxu1 %v938_v22 }
  0x3c   :  { %604 = vmatprep.subr.bf16.mxu0 %v945_v23  ;;  %657 = vmatprep.subr.bf16.mxu1 %v947_v24 }
  0x3e   :  { %537 = vmatmul.mubr.bf16.gmra.mrb[4].mxu0 %v1095_v29  ;;  %590 = vmatmul.mubr.bf16.gmra.mrb[4].mxu1 %v1095_v29 }
  0x3f   :  { %605 = vmatpush1.bf16.msra.mxu0 %v944_v30  ;;  %658 = vmatpush1.bf16.msra.mxu1 %v946_v31 }
  0x40   :  { %606 = vmatprep.subr.bf16.mxu0 %v953_v32  ;;  %659 = vmatprep.subr.bf16.mxu1 %v955_v33 }
  0x41   :  { %632 = vmatprep.mubr.bf16.mxu0 %v1053_v0  ;;  %685 = vmatprep.mubr.bf16.mxu1 %v1053_v0 }
  0x43   :  { %607 = vmatpush1.bf16.msra.mxu0 %v952_v38  ;;  %660 = vmatpush1.bf16.msra.mxu1 %v954_v39 }
  0x44   :  { %608 = vmatprep.subr.bf16.mxu0 %v961_v40  ;;  %661 = vmatprep.subr.bf16.mxu1 %v963_v41 }
  0x47   :  { %609 = vmatpush1.bf16.msra.mxu0 %v960_v46  ;;  %662 = vmatpush1.bf16.msra.mxu1 %v962_v47 }
  0x48   :  { %610 = vmatprep.subr.bf16.mxu0 %v969_v48  ;;  %663 = vmatprep.subr.bf16.mxu1 %v971_v49 }
  0x4b   :  { %611 = vmatpush1.bf16.msra.mxu0 %v968_v54  ;;  %664 = vmatpush1.bf16.msra.mxu1 %v970_v55 }
  0x4c   :  { %612 = vmatprep.subr.bf16.mxu0 %v977_v56  ;;  %665 = vmatprep.subr.bf16.mxu1 %v979_v57 }
  0x4f   :  { %613 = vmatpush1.bf16.msra.mxu0 %v976_v62  ;;  %666 = vmatpush1.bf16.msra.mxu1 %v978_v63 }
  0x50   :  { %614 = vmatprep.subr.bf16.mxu0 %v985_v1  ;;  %667 = vmatprep.subr.bf16.mxu1 %v987_v2 }
  0x53   :  { %615 = vmatpush1.bf16.msra.mxu0 %v984_v3  ;;  %668 = vmatpush1.bf16.msra.mxu1 %v986_v4 }
  0x56   :  { %633 = vmatmul.mubr.bf16.vlgmr.msra.gmra.mrb[8].mxu0 %v1086_v10  ;;  %686 = vmatmul.mubr.bf16.vlgmr.msra.gmra.mrb[8].mxu1 %v1086_v10 }
  0x57   :  { %642 = vmatprep.mubr.bf16.mxu0 %v1053_v0  ;;  %695 = vmatprep.mubr.bf16.mxu1 %v1053_v0 }
  0x5e   :  { %643 = vmatmul.mubr.bf16.gmra.mrb[12].mxu0 %v1095_v29  ;;  %696 = vmatmul.mubr.bf16.gmra.mrb[12].mxu1 %v1095_v29 }
 0x109   :  { %v528_v5 = vpop.f32.mrb[0].mxu0  ;;  %v581_v6 = vpop.f32.mrb[0].mxu1 }
 0x10a   :  { %v530_v7 = vpop.f32.mrb[1].mxu0  ;;  %v583_v9 = vpop.f32.mrb[1].mxu1 }
 0x10b   :  { %v1004_v8 = vpack.c.bf16 %v530_v7, %v528_v5  ;;  %v532_v11 = vpop.f32.mrb[2].mxu0  ;;  %v1005_v12 = vpack.c.bf16 %v583_v9, %v581_v6  ;;  %v585_v13 = vpop.f32.mrb[2].mxu1 }
 0x10c   :  { %v534_v14 = vpop.f32.mrb[3].mxu0  ;;  %v587_v15 = vpop.f32.mrb[3].mxu1 }
 0x10d   :  { %901 = vst [vmem:[%s1157_s2] sm:$0xff] %v1004_v8  ;;  %v1008_v10 = vpack.c.bf16 %v534_v14, %v532_v11  ;;  %902 = vst [vmem:[%s1157_s2 + $0x8] sm:$0xff] %v1005_v12  ;;  %v1009_v0 = vpack.c.bf16 %v587_v15, %v585_v13 }
 0x10f   :  { %905 = vst [vmem:[%s1157_s2 + $0x20] sm:$0xff] %v1008_v10  ;;  %906 = vst [vmem:[%s1157_s2 + $0x28] sm:$0xff] %v1009_v0 }
 0x111   :  { %v538_v16 = vpop.f32.mrb[4].mxu0  ;;  %v591_v17 = vpop.f32.mrb[4].mxu1 }
 0x112   :  { %v540_v18 = vpop.f32.mrb[5].mxu0  ;;  %v593_v20 = vpop.f32.mrb[5].mxu1 }
 0x113   :  { %v1012_v19 = vpack.c.bf16 %v540_v18, %v538_v16  ;;  %v542_v21 = vpop.f32.mrb[6].mxu0  ;;  %v1013_v22 = vpack.c.bf16 %v593_v20, %v591_v17  ;;  %v595_v23 = vpop.f32.mrb[6].mxu1 }
 0x114   :  { %v544_v24 = vpop.f32.mrb[7].mxu0  ;;  %v597_v26 = vpop.f32.mrb[7].mxu1 }
 0x115   :  { %909 = vst [vmem:[%s1157_s2 + $0x40] sm:$0xff] %v1012_v19  ;;  %v1016_v25 = vpack.c.bf16 %v544_v24, %v542_v21  ;;  %910 = vst [vmem:[%s1157_s2 + $0x48] sm:$0xff] %v1013_v22  ;;  %v1017_v27 = vpack.c.bf16 %v597_v26, %v595_v23 }
 0x117   :  { %913 = vst [vmem:[%s1157_s2 + $0x60] sm:$0xff] %v1016_v25  ;;  %914 = vst [vmem:[%s1157_s2 + $0x68] sm:$0xff] %v1017_v27 }
 0x129   :  { %v634_v28 = vpop.f32.mrb[8].mxu0  ;;  %v687_v29 = vpop.f32.mrb[8].mxu1 }
 0x12a   :  { %v636_v30 = vpop.f32.mrb[9].mxu0  ;;  %v689_v32 = vpop.f32.mrb[9].mxu1 }
 0x12b   :  { %v1006_v31 = vpack.c.bf16 %v636_v30, %v634_v28  ;;  %v638_v33 = vpop.f32.mrb[10].mxu0  ;;  %v1007_v34 = vpack.c.bf16 %v689_v32, %v687_v29  ;;  %v691_v35 = vpop.f32.mrb[10].mxu1 }
 0x12c   :  { %v640_v36 = vpop.f32.mrb[11].mxu0  ;;  %v693_v38 = vpop.f32.mrb[11].mxu1 }
 0x12d   :  { %903 = vst [vmem:[%s1157_s2 + $0x10] sm:$0xff] %v1006_v31  ;;  %v1010_v37 = vpack.c.bf16 %v640_v36, %v638_v33  ;;  %904 = vst [vmem:[%s1157_s2 + $0x18] sm:$0xff] %v1007_v34  ;;  %v1011_v39 = vpack.c.bf16 %v693_v38, %v691_v35 }
 0x12f   :  { %907 = vst [vmem:[%s1157_s2 + $0x30] sm:$0xff] %v1010_v37  ;;  %908 = vst [vmem:[%s1157_s2 + $0x38] sm:$0xff] %v1011_v39 }
 0x131   :  { %v644_v40 = vpop.f32.mrb[12].mxu0  ;;  %v697_v41 = vpop.f32.mrb[12].mxu1 }
 0x132   :  { %v646_v42 = vpop.f32.mrb[13].mxu0  ;;  %v699_v44 = vpop.f32.mrb[13].mxu1 }
 0x133   :  { %v1014_v43 = vpack.c.bf16 %v646_v42, %v644_v40  ;;  %v648_v45 = vpop.f32.mrb[14].mxu0  ;;  %v1015_v46 = vpack.c.bf16 %v699_v44, %v697_v41  ;;  %v701_v47 = vpop.f32.mrb[14].mxu1 }
 0x134   :  { %v650_v48 = vpop.f32.mrb[15].mxu0  ;;  %v703_v50 = vpop.f32.mrb[15].mxu1 }
 0x135   :  { %911 = vst [vmem:[%s1157_s2 + $0x50] sm:$0xff] %v1014_v43  ;;  %v1018_v49 = vpack.c.bf16 %v650_v48, %v648_v45  ;;  %912 = vst [vmem:[%s1157_s2 + $0x58] sm:$0xff] %v1015_v46  ;;  %v1019_v51 = vpack.c.bf16 %v703_v50, %v701_v47 }
 0x137   :  { %915 = vst [vmem:[%s1157_s2 + $0x70] sm:$0xff] %v1018_v49  ;;  %916 = vst [vmem:[%s1157_s2 + $0x78] sm:$0xff] %v1019_v51 }
 0x138   :  { %921 = vsyncpa [#allocation4], 1 }

// kernel: generator_forward_pallas.14
= control target key start
LH: loop header
LB: loop body
LE: loop exit
PB: predicated region body
PF: predicated region fallthrough
CT: control target
= control target key end

     0   :  { %vm172_vm0 = vcmask 519168   ;;  %s416_s0 = inlined_call_operand.vmem [shape: bf16[128,64], index: 0, kind: input, shape index: {}]   ;;  %s417_s1 = inlined_call_operand.vmem [shape: f32[1,64], index: 1, kind: input, shape index: {}]   ;;  %s418_s2 = inlined_call_operand.vmem [shape: f32[1,64], index: 2, kind: input, shape index: {}]   ;;  %s419_s3 = inlined_call_operand.vmem [shape: bf16[128,64], index: 3, kind: output, shape index: {}]  }
   0x1   :  { %v228_v0 = vld [vmem:[%s416_s0] sm:$0xff]   ;;  %v259_v4 = vld [vmem:[%s416_s0 + $0x8] sm:$0xff]   ;;  %v260_v5 = vld [vmem:[%s416_s0 + $0x10] sm:$0xff]  }
   0x2   :  { %v292_v1 = vld [vmem:[%s417_s1] ss:$0 sm:$0xff]  ;;  %v229_v2 = vunpack.c.l.bf16 %v228_v0  ;;  %v230_v3 = vunpack.c.h.bf16 %v228_v0  ;;  %v261_v6 = vld [vmem:[%s416_s0 + $0x18] sm:$0xff]   ;;  %v233_v8 = vunpack.c.l.bf16 %v259_v4  ;;  %v234_v9 = vunpack.c.h.bf16 %v259_v4  ;;  %v263_v41 = vld [vmem:[%s416_s0 + $0x28] sm:$0xff]  }
   0x3   :  { %v306_v7 = vld [vmem:[%s418_s2] ss:$0 sm:$0xff]  ;;  %v237_v10 = vunpack.c.l.bf16 %v260_v5  ;;  %v238_v11 = vunpack.c.h.bf16 %v260_v5  ;;  %v241_v14 = vunpack.c.l.bf16 %v261_v6  ;;  %v242_v15 = vunpack.c.h.bf16 %v261_v6  ;;  %v264_v42 = vld [vmem:[%s416_s0 + $0x30] sm:$0xff]   ;;  %v265_v47 = vld [vmem:[%s416_s0 + $0x38] sm:$0xff]  }
   0x4   :  { %v53_v12 = vmul.f32 %v229_v2, %v292_v1  ;;  %v54_v13 = vmul.f32 %v230_v3, %v292_v1  ;;  %v55_v16 = vmul.f32 %v233_v8, %v292_v1  ;;  %v56_v17 = vmul.f32 %v234_v9, %v292_v1  ;;  %v262_v36 = vld [vmem:[%s416_s0 + $0x20] sm:$0xff]  }
   0x5   :  { %v57_v18 = vmul.f32 %v237_v10, %v292_v1  ;;  %v58_v19 = vmul.f32 %v238_v11, %v292_v1  ;;  %v59_v22 = vmul.f32 %v241_v14, %v292_v1  ;;  %v60_v23 = vmul.f32 %v242_v15, %v292_v1 }
   0x6   :  { %v76_v20 = vadd.f32 %v306_v7, %v53_v12  ;;  %v77_v21 = vadd.f32 %v306_v7, %v54_v13  ;;  %v78_v24 = vadd.f32 %v306_v7, %v55_v16  ;;  %v79_v25 = vadd.f32 %v306_v7, %v56_v17 }
   0x7   :  { %v80_v26 = vadd.f32 %v306_v7, %v57_v18  ;;  %v81_v27 = vadd.f32 %v306_v7, %v58_v19  ;;  %v82_v30 = vadd.f32 %v306_v7, %v59_v22  ;;  %v83_v31 = vadd.f32 %v306_v7, %v60_v23 }
   0x8   :  { %v92_v28 = vmax.f32 %v76_v20, 0.0  ;;  %v93_v29 = vmax.f32 %v77_v21, 0.0  ;;  %v94_v32 = vmax.f32 %v78_v24, 0.0  ;;  %v95_v33 = vmax.f32 %v79_v25, 0.0 }
   0x9   :  { %v96_v34 = vmax.f32 %v80_v26, 0.0  ;;  %v97_v35 = vmax.f32 %v81_v27, 0.0  ;;  %v98_v39 = vmax.f32 %v82_v30, 0.0  ;;  %v99_v40 = vmax.f32 %v83_v31, 0.0 }
   0xa   :  { %v211_v37 = vpack.c.bf16 %v92_v28, %v92_v28  ;;  %v212_v38 = vpack.c.bf16 %v93_v29, %v93_v29  ;;  %v213_v43 = vpack.c.bf16 %v94_v32, %v94_v32  ;;  %v214_v44 = vpack.c.bf16 %v95_v33, %v95_v33 }
   0xb   :  { %v215_v45 = vpack.c.bf16 %v96_v34, %v96_v34  ;;  %v216_v46 = vpack.c.bf16 %v97_v35, %v97_v35  ;;  %v217_v48 = vpack.c.bf16 %v98_v39, %v98_v39  ;;  %v218_v49 = vpack.c.bf16 %v99_v40, %v99_v40 }
   0xc   :  { %173 = vst.msk [vmem:[%s419_s3] sm:$0xf] %vm172_vm0, %v211_v37  ;;  %174 = vst.msk [vmem:[%s419_s3 + $0x4] sm:$0xf] %vm172_vm0, %v212_v38  ;;  %v245_v50 = vunpack.c.l.bf16 %v262_v36  ;;  %v246_v51 = vunpack.c.h.bf16 %v262_v36  ;;  %v249_v52 = vunpack.c.l.bf16 %v263_v41  ;;  %v250_v53 = vunpack.c.h.bf16 %v263_v41 }
   0xd   :  { %175 = vst.msk [vmem:[%s419_s3 + $0x8] sm:$0xf] %vm172_vm0, %v213_v43  ;;  %176 = vst.msk [vmem:[%s419_s3 + $0xc] sm:$0xf] %vm172_vm0, %v214_v44  ;;  %v253_v54 = vunpack.c.l.bf16 %v264_v42  ;;  %v254_v55 = vunpack.c.h.bf16 %v264_v42  ;;  %v257_v58 = vunpack.c.l.bf16 %v265_v47  ;;  %v258_v59 = vunpack.c.h.bf16 %v265_v47 }
   0xe   :  { %177 = vst.msk [vmem:[%s419_s3 + $0x10] sm:$0xf] %vm172_vm0, %v215_v45  ;;  %178 = vst.msk [vmem:[%s419_s3 + $0x14] sm:$0xf] %vm172_vm0, %v216_v46  ;;  %v61_v56 = vmul.f32 %v245_v50, %v292_v1  ;;  %v62_v57 = vmul.f32 %v246_v51, %v292_v1  ;;  %v63_v60 = vmul.f32 %v249_v52, %v292_v1 }
   0xf   :  { %179 = vst.msk [vmem:[%s419_s3 + $0x18] sm:$0xf] %vm172_vm0, %v217_v48  ;;  %180 = vst.msk [vmem:[%s419_s3 + $0x1c] sm:$0xf] %vm172_vm0, %v218_v49  ;;  %v64_v61 = vmul.f32 %v250_v53, %v292_v1  ;;  %v65_v62 = vmul.f32 %v253_v54, %v292_v1  ;;  %v66_v63 = vmul.f32 %v254_v55, %v292_v1 }
  0x10   :  { %v84_v0 = vadd.f32 %v306_v7, %v61_v56  ;;  %v85_v2 = vadd.f32 %v306_v7, %v62_v57  ;;  %v67_v3 = vmul.f32 %v257_v58, %v292_v1  ;;  %v68_v4 = vmul.f32 %v258_v59, %v292_v1 }
  0x11   :  { %v86_v5 = vadd.f32 %v306_v7, %v63_v60  ;;  %v87_v6 = vadd.f32 %v306_v7, %v64_v61  ;;  %v88_v8 = vadd.f32 %v306_v7, %v65_v62  ;;  %v89_v9 = vadd.f32 %v306_v7, %v66_v63 }
  0x12   :  { %v100_v10 = vmax.f32 %v84_v0, 0.0  ;;  %v101_v11 = vmax.f32 %v85_v2, 0.0  ;;  %v90_v12 = vadd.f32 %v306_v7, %v67_v3  ;;  %v91_v13 = vadd.f32 %v306_v7, %v68_v4 }
  0x13   :  { %v102_v14 = vmax.f32 %v86_v5, 0.0  ;;  %v103_v15 = vmax.f32 %v87_v6, 0.0  ;;  %v104_v16 = vmax.f32 %v88_v8, 0.0  ;;  %v105_v17 = vmax.f32 %v89_v9, 0.0 }
  0x14   :  { %v219_v18 = vpack.c.bf16 %v100_v10, %v100_v10  ;;  %v220_v1 = vpack.c.bf16 %v101_v11, %v101_v11  ;;  %v106_v19 = vmax.f32 %v90_v12, 0.0  ;;  %v107_v20 = vmax.f32 %v91_v13, 0.0 }
  0x15   :  { %v221_v21 = vpack.c.bf16 %v102_v14, %v102_v14  ;;  %v222_v22 = vpack.c.bf16 %v103_v15, %v103_v15  ;;  %v223_v23 = vpack.c.bf16 %v104_v16, %v104_v16  ;;  %v224_v24 = vpack.c.bf16 %v105_v17, %v105_v17 }
  0x16   :  { %181 = vst.msk [vmem:[%s419_s3 + $0x20] sm:$0xf] %vm172_vm0, %v219_v18  ;;  %182 = vst.msk [vmem:[%s419_s3 + $0x24] sm:$0xf] %vm172_vm0, %v220_v1  ;;  %v225_v7 = vpack.c.bf16 %v106_v19, %v106_v19  ;;  %v226_v25 = vpack.c.bf16 %v107_v20, %v107_v20 }
  0x17   :  { %183 = vst.msk [vmem:[%s419_s3 + $0x28] sm:$0xf] %vm172_vm0, %v221_v21  ;;  %184 = vst.msk [vmem:[%s419_s3 + $0x2c] sm:$0xf] %vm172_vm0, %v222_v22 }
  0x18   :  { %185 = vst.msk [vmem:[%s419_s3 + $0x30] sm:$0xf] %vm172_vm0, %v223_v23  ;;  %186 = vst.msk [vmem:[%s419_s3 + $0x34] sm:$0xf] %vm172_vm0, %v224_v24 }
  0x19   :  { %187 = vst.msk [vmem:[%s419_s3 + $0x38] sm:$0xf] %vm172_vm0, %v225_v7  ;;  %188 = vst.msk [vmem:[%s419_s3 + $0x3c] sm:$0xf] %vm172_vm0, %v226_v25 }

// kernel: generator_forward_pallas.15
= control target key start
LH: loop header
LB: loop body
LE: loop exit
PB: predicated region body
PF: predicated region fallthrough
CT: control target
= control target key end

     0   :  { %7 = vsyncpa [#allocation4], 0  ;;  %s1149_s9 = smov [#allocation3]   ;;  %s1332_s0 = inlined_call_operand.vmem [shape: bf16[128,64], index: 0, kind: input, shape index: {}]   ;;  %s1333_s1 = inlined_call_operand.hbm [shape: bf16[64,512], index: 1, kind: input, shape index: {}]   ;;  %s1334_s2 = inlined_call_operand.vmem [shape: bf16[128,512], index: 2, kind: output, shape index: {}]  }
   0x1   :  { %s15_s10 = sshll.u32 %s1149_s9, 4  ;;  %s1125_s13 = scalar_lea.hbm %s1333_s1, 2048  ;;  %s16_s10 = int_to_ptr.vmem [resolvable:$true] %s15_s10 }
   0x2   :  { %p1126_p0 = scmp.ne.s32.totalorder %s1333_s1, %s1125_s13  ;;  %p1129_p1 = scmp.lt.u32.totalorder %s1125_s13, %s1333_s1 }
   0x4   :  { %p1131_p2 = pnand %p1129_p1, %p1126_p0 }
   0x6   :  { %1134 = shalt.err (!%p1131_p2)
}
   0x7   :  { %s1135_s18 = scalar_lea.vmem %s16_s10, 2048  ;;  %p1140_p4 = scmp.lt.s32.totalorder %s16_s10, %s16_s10 }
   0x8   :  { %p1136_p3 = scmp.ne.s32.totalorder %s16_s10, %s1135_s18  ;;  %p1141_p5 = scmp.lt.s32.totalorder %s1135_s18, %s1135_s18 }
   0xa   :  { %p1142_p6 = por %p1141_p5, %p1140_p4 }
   0xc   :  { %p1143_p7 = pnand %p1142_p6, %p1136_p3 }
   0xe   :  { %1146 = shalt.err (!%p1143_p7)
}
   0xf   :  { %s1150_s19 = smov 256   ;;  %s1151_s20 = smov 16  }
  0x10   :  { %21 = dma.hbm_to_vmem [thread:$0]  %s1333_s1, 2048, %s16_s10, [#allocation4], %s1150_s19, %s1150_s19, %s1151_s20  }
  0x11   :  { %1147 = dma.done.wait [#allocation4], 2048  }
  0x12   :  { %1148 = vsyncadd [#allocation4], 4294965248  ;;  %v1152_v0 = vmov 0   ;;  %v1093_v1 = vld [vmem:[#allocation3 + $0x4] ss:$16 sps:$4 sm:$0xff]   ;;  %vm310_vm0 = vcmask 523264  }
  0x13   :  { %367 = vmatprep.mubr.bf16.mxu0 %v1152_v0  ;;  %480 = vmatprep.mubr.bf16.mxu1 %v1152_v0  ;;  %v1095_v2 = vld [vmem:[#allocation3 + $0xc] ss:$16 sps:$4 sm:$0xff]   ;;  %v1097_v3 = vld [vmem:[#allocation3] ss:$16 sps:$4 sm:$0xff]   ;;  %v1098_v4 = vld [vmem:[#allocation3 + $0x8] ss:$16 sps:$4 sm:$0xff]  }
  0x14   :  { %335 = vmatprep.subr.bf16.mxu0 %v1093_v1  ;;  %448 = vmatprep.subr.bf16.mxu1 %v1095_v2  ;;  %v1099_v5 = vld [vmem:[#allocation3 + $0x24] ss:$16 sps:$4 sm:$0xff]   ;;  %v1101_v6 = vld [vmem:[#allocation3 + $0x2c] ss:$16 sps:$4 sm:$0xff]   ;;  %v1103_v7 = vld [vmem:[#allocation3 + $0x20] ss:$16 sps:$4 sm:$0xff]  }
  0x15   :  { %336 = vmatpush1.bf16.msra.mxu0 %v1097_v3  ;;  %449 = vmatpush1.bf16.msra.mxu1 %v1098_v4  ;;  %v1104_v8 = vld [vmem:[#allocation3 + $0x28] ss:$16 sps:$4 sm:$0xff]   ;;  %v1105_v9 = vld [vmem:[#allocation3 + $0x44] ss:$16 sps:$4 sm:$0xff]   ;;  %v1107_v10 = vld [vmem:[#allocation3 + $0x4c] ss:$16 sps:$4 sm:$0xff]  }
  0x16   :  { %337 = vmatprep.subr.bf16.mxu0 %v1099_v5  ;;  %450 = vmatprep.subr.bf16.mxu1 %v1101_v6  ;;  %v1109_v11 = vld [vmem:[#allocation3 + $0x40] ss:$16 sps:$4 sm:$0xff]   ;;  %v1110_v12 = vld [vmem:[#allocation3 + $0x48] ss:$16 sps:$4 sm:$0xff]   ;;  %v1111_v13 = vld [vmem:[#allocation3 + $0x64] ss:$16 sps:$4 sm:$0xff]  }
  0x17   :  { %v1113_v14 = vld [vmem:[#allocation3 + $0x6c] ss:$16 sps:$4 sm:$0xff]   ;;  %v1115_v15 = vld [vmem:[#allocation3 + $0x60] ss:$16 sps:$4 sm:$0xff]   ;;  %v1116_v16 = vld [vmem:[#allocation3 + $0x68] ss:$16 sps:$4 sm:$0xff]  }
  0x18   :  { %v1117_v17 = vld [vmem:[%s1332_s0] sm:$0xff]   ;;  %v1118_v18 = vld [vmem:[%s1332_s0 + $0x8] sm:$0xff]   ;;  %v1119_v19 = vld [vmem:[%s1332_s0 + $0x10] sm:$0xff]  }
  0x19   :  { %338 = vmatpush1.bf16.msra.mxu0 %v1103_v7  ;;  %451 = vmatpush1.bf16.msra.mxu1 %v1104_v8  ;;  %v1120_v20 = vld [vmem:[%s1332_s0 + $0x18] sm:$0xff]   ;;  %v1121_v21 = vld [vmem:[%s1332_s0 + $0x20] sm:$0xff]   ;;  %v1122_v22 = vld [vmem:[%s1332_s0 + $0x28] sm:$0xff]  }
  0x1a   :  { %339 = vmatprep.subr.bf16.mxu0 %v1105_v9  ;;  %452 = vmatprep.subr.bf16.mxu1 %v1107_v10  ;;  %v1123_v23 = vld [vmem:[%s1332_s0 + $0x30] sm:$0xff]   ;;  %v1124_v24 = vld [vmem:[%s1332_s0 + $0x38] sm:$0xff]  }
  0x1d   :  { %340 = vmatpush1.bf16.msra.mxu0 %v1109_v11  ;;  %453 = vmatpush1.bf16.msra.mxu1 %v1110_v12 }
  0x1e   :  { %341 = vmatprep.subr.bf16.mxu0 %v1111_v13  ;;  %454 = vmatprep.subr.bf16.mxu1 %v1113_v14 }
  0x21   :  { %342 = vmatpush1.bf16.msra.mxu0 %v1115_v15  ;;  %455 = vmatpush1.bf16.msra.mxu1 %v1116_v16 }
  0x24   :  { %1009 = vmatmul.mubr.msk.bf16.vlgmr.msra.gmra.mrb[0].mxu0 %vm310_vm0, %v1117_v17  ;;  %1017 = vmatmul.mubr.msk.bf16.vlgmr.msra.gmra.mrb[0].mxu1 %vm310_vm0, %v1117_v17 }
  0x25   :  { %377 = vmatprep.mubr.bf16.mxu0 %v1152_v0  ;;  %490 = vmatprep.mubr.bf16.mxu1 %v1152_v0 }
  0x2c   :  { %1010 = vmatmul.mubr.msk.bf16.gmra.mrb[4].mxu0 %vm310_vm0, %v1118_v18  ;;  %1018 = vmatmul.mubr.msk.bf16.gmra.mrb[4].mxu1 %vm310_vm0, %v1118_v18 }
  0x2d   :  { %387 = vmatprep.mubr.bf16.mxu0 %v1152_v0  ;;  %500 = vmatprep.mubr.bf16.mxu1 %v1152_v0 }
  0x34   :  { %1011 = vmatmul.mubr.msk.bf16.gmra.mrb[8].mxu0 %vm310_vm0, %v1119_v19  ;;  %1019 = vmatmul.mubr.msk.bf16.gmra.mrb[8].mxu1 %vm310_vm0, %v1119_v19 }
  0x35   :  { %397 = vmatprep.mubr.bf16.mxu0 %v1152_v0  ;;  %510 = vmatprep.mubr.bf16.mxu1 %v1152_v0 }
  0x3c   :  { %1012 = vmatmul.mubr.msk.bf16.gmra.mrb[12].mxu0 %vm310_vm0, %v1120_v20  ;;  %1020 = vmatmul.mubr.msk.bf16.gmra.mrb[12].mxu1 %vm310_vm0, %v1120_v20 }
  0x3d   :  { %407 = vmatprep.mubr.bf16.mxu0 %v1152_v0  ;;  %520 = vmatprep.mubr.bf16.mxu1 %v1152_v0 }
  0x44   :  { %1013 = vmatmul.mubr.msk.bf16.gmra.mrb[16].mxu0 %vm310_vm0, %v1121_v21  ;;  %1021 = vmatmul.mubr.msk.bf16.gmra.mrb[16].mxu1 %vm310_vm0, %v1121_v21 }
  0x45   :  { %417 = vmatprep.mubr.bf16.mxu0 %v1152_v0  ;;  %530 = vmatprep.mubr.bf16.mxu1 %v1152_v0 }
  0x4c   :  { %1014 = vmatmul.mubr.msk.bf16.gmra.mrb[20].mxu0 %vm310_vm0, %v1122_v22  ;;  %1022 = vmatmul.mubr.msk.bf16.gmra.mrb[20].mxu1 %vm310_vm0, %v1122_v22 }
  0x4d   :  { %427 = vmatprep.mubr.bf16.mxu0 %v1152_v0  ;;  %540 = vmatprep.mubr.bf16.mxu1 %v1152_v0 }
  0x54   :  { %1015 = vmatmul.mubr.msk.bf16.gmra.mrb[24].mxu0 %vm310_vm0, %v1123_v23  ;;  %1023 = vmatmul.mubr.msk.bf16.gmra.mrb[24].mxu1 %vm310_vm0, %v1123_v23 }
  0x55   :  { %437 = vmatprep.mubr.bf16.mxu0 %v1152_v0  ;;  %550 = vmatprep.mubr.bf16.mxu1 %v1152_v0 }
  0x5c   :  { %1016 = vmatmul.mubr.msk.bf16.gmra.mrb[28].mxu0 %vm310_vm0, %v1124_v24  ;;  %1024 = vmatmul.mubr.msk.bf16.gmra.mrb[28].mxu1 %vm310_vm0, %v1124_v24 }
  0xf7   :  { %v369_v25 = vpop.f32.mrb[0].mxu0  ;;  %v482_v26 = vpop.f32.mrb[0].mxu1 }
  0xf8   :  { %v371_v27 = vpop.f32.mrb[1].mxu0  ;;  %v484_v28 = vpop.f32.mrb[1].mxu1 }
  0xf9   :  { %v1057_v29 = vpack.c.bf16 %v371_v27, %v369_v25  ;;  %v1058_v30 = vpack.c.bf16 %v484_v28, %v482_v26  ;;  %v373_v31 = vpop.f32.mrb[2].mxu0  ;;  %v486_v32 = vpop.f32.mrb[2].mxu1 }
  0xfa   :  { %v375_v33 = vpop.f32.mrb[3].mxu0  ;;  %v488_v34 = vpop.f32.mrb[3].mxu1 }
  0xfb   :  { %948 = vst [vmem:[%s1334_s2] sm:$0xff] %v1057_v29  ;;  %949 = vst [vmem:[%s1334_s2 + $0x8] sm:$0xff] %v1058_v30  ;;  %v1059_v35 = vpack.c.bf16 %v375_v33, %v373_v31  ;;  %v1060_v36 = vpack.c.bf16 %v488_v34, %v486_v32 }
  0xfd   :  { %950 = vst [vmem:[%s1334_s2 + $0x10] sm:$0xff] %v1059_v35  ;;  %951 = vst [vmem:[%s1334_s2 + $0x18] sm:$0xff] %v1060_v36 }
  0xff   :  { %v379_v37 = vpop.f32.mrb[4].mxu0  ;;  %v492_v38 = vpop.f32.mrb[4].mxu1 }
 0x100   :  { %v381_v39 = vpop.f32.mrb[5].mxu0  ;;  %v494_v40 = vpop.f32.mrb[5].mxu1 }
 0x101   :  { %v1061_v41 = vpack.c.bf16 %v381_v39, %v379_v37  ;;  %v1062_v42 = vpack.c.bf16 %v494_v40, %v492_v38  ;;  %v383_v43 = vpop.f32.mrb[6].mxu0  ;;  %v496_v44 = vpop.f32.mrb[6].mxu1 }
 0x102   :  { %v385_v45 = vpop.f32.mrb[7].mxu0  ;;  %v498_v46 = vpop.f32.mrb[7].mxu1 }
 0x103   :  { %952 = vst [vmem:[%s1334_s2 + $0x20] sm:$0xff] %v1061_v41  ;;  %953 = vst [vmem:[%s1334_s2 + $0x28] sm:$0xff] %v1062_v42  ;;  %v1063_v47 = vpack.c.bf16 %v385_v45, %v383_v43  ;;  %v1064_v48 = vpack.c.bf16 %v498_v46, %v496_v44 }
 0x105   :  { %954 = vst [vmem:[%s1334_s2 + $0x30] sm:$0xff] %v1063_v47  ;;  %955 = vst [vmem:[%s1334_s2 + $0x38] sm:$0xff] %v1064_v48 }
 0x107   :  { %v389_v49 = vpop.f32.mrb[8].mxu0  ;;  %v502_v50 = vpop.f32.mrb[8].mxu1 }
 0x108   :  { %v391_v51 = vpop.f32.mrb[9].mxu0  ;;  %v504_v52 = vpop.f32.mrb[9].mxu1 }
 0x109   :  { %v1065_v53 = vpack.c.bf16 %v391_v51, %v389_v49  ;;  %v1066_v54 = vpack.c.bf16 %v504_v52, %v502_v50  ;;  %v393_v55 = vpop.f32.mrb[10].mxu0  ;;  %v506_v56 = vpop.f32.mrb[10].mxu1 }
 0x10a   :  { %v395_v57 = vpop.f32.mrb[11].mxu0  ;;  %v508_v58 = vpop.f32.mrb[11].mxu1 }
 0x10b   :  { %956 = vst [vmem:[%s1334_s2 + $0x40] sm:$0xff] %v1065_v53  ;;  %957 = vst [vmem:[%s1334_s2 + $0x48] sm:$0xff] %v1066_v54  ;;  %v1067_v59 = vpack.c.bf16 %v395_v57, %v393_v55  ;;  %v1068_v60 = vpack.c.bf16 %v508_v58, %v506_v56 }
 0x10d   :  { %958 = vst [vmem:[%s1334_s2 + $0x50] sm:$0xff] %v1067_v59  ;;  %959 = vst [vmem:[%s1334_s2 + $0x58] sm:$0xff] %v1068_v60 }
 0x10f   :  { %v399_v61 = vpop.f32.mrb[12].mxu0  ;;  %v512_v62 = vpop.f32.mrb[12].mxu1 }
 0x110   :  { %v401_v63 = vpop.f32.mrb[13].mxu0  ;;  %v514_v0 = vpop.f32.mrb[13].mxu1 }
 0x111   :  { %v1069_v1 = vpack.c.bf16 %v401_v63, %v399_v61  ;;  %v1070_v2 = vpack.c.bf16 %v514_v0, %v512_v62  ;;  %v403_v3 = vpop.f32.mrb[14].mxu0  ;;  %v516_v4 = vpop.f32.mrb[14].mxu1 }
 0x112   :  { %v405_v5 = vpop.f32.mrb[15].mxu0  ;;  %v518_v6 = vpop.f32.mrb[15].mxu1 }
 0x113   :  { %960 = vst [vmem:[%s1334_s2 + $0x60] sm:$0xff] %v1069_v1  ;;  %961 = vst [vmem:[%s1334_s2 + $0x68] sm:$0xff] %v1070_v2  ;;  %v1071_v7 = vpack.c.bf16 %v405_v5, %v403_v3  ;;  %v1072_v8 = vpack.c.bf16 %v518_v6, %v516_v4 }
 0x115   :  { %962 = vst [vmem:[%s1334_s2 + $0x70] sm:$0xff] %v1071_v7  ;;  %963 = vst [vmem:[%s1334_s2 + $0x78] sm:$0xff] %v1072_v8 }
 0x117   :  { %v409_v9 = vpop.f32.mrb[16].mxu0  ;;  %v522_v10 = vpop.f32.mrb[16].mxu1 }
 0x118   :  { %v411_v11 = vpop.f32.mrb[17].mxu0  ;;  %v524_v12 = vpop.f32.mrb[17].mxu1 }
 0x119   :  { %v1073_v13 = vpack.c.bf16 %v411_v11, %v409_v9  ;;  %v1074_v14 = vpack.c.bf16 %v524_v12, %v522_v10  ;;  %v413_v15 = vpop.f32.mrb[18].mxu0  ;;  %v526_v16 = vpop.f32.mrb[18].mxu1 }
 0x11a   :  { %v415_v17 = vpop.f32.mrb[19].mxu0  ;;  %v528_v18 = vpop.f32.mrb[19].mxu1 }
 0x11b   :  { %964 = vst [vmem:[%s1334_s2 + $0x80] sm:$0xff] %v1073_v13  ;;  %965 = vst [vmem:[%s1334_s2 + $0x88] sm:$0xff] %v1074_v14  ;;  %v1075_v19 = vpack.c.bf16 %v415_v17, %v413_v15  ;;  %v1076_v20 = vpack.c.bf16 %v528_v18, %v526_v16 }
 0x11d   :  { %966 = vst [vmem:[%s1334_s2 + $0x90] sm:$0xff] %v1075_v19  ;;  %967 = vst [vmem:[%s1334_s2 + $0x98] sm:$0xff] %v1076_v20 }
 0x11f   :  { %v419_v21 = vpop.f32.mrb[20].mxu0  ;;  %v532_v22 = vpop.f32.mrb[20].mxu1 }
 0x120   :  { %v421_v23 = vpop.f32.mrb[21].mxu0  ;;  %v534_v24 = vpop.f32.mrb[21].mxu1 }
 0x121   :  { %v1077_v25 = vpack.c.bf16 %v421_v23, %v419_v21  ;;  %v1078_v26 = vpack.c.bf16 %v534_v24, %v532_v22  ;;  %v423_v27 = vpop.f32.mrb[22].mxu0  ;;  %v536_v28 = vpop.f32.mrb[22].mxu1 }
 0x122   :  { %v425_v29 = vpop.f32.mrb[23].mxu0  ;;  %v538_v30 = vpop.f32.mrb[23].mxu1 }
 0x123   :  { %968 = vst [vmem:[%s1334_s2 + $0xa0] sm:$0xff] %v1077_v25  ;;  %969 = vst [vmem:[%s1334_s2 + $0xa8] sm:$0xff] %v1078_v26  ;;  %v1079_v31 = vpack.c.bf16 %v425_v29, %v423_v27  ;;  %v1080_v32 = vpack.c.bf16 %v538_v30, %v536_v28 }
 0x125   :  { %970 = vst [vmem:[%s1334_s2 + $0xb0] sm:$0xff] %v1079_v31  ;;  %971 = vst [vmem:[%s1334_s2 + $0xb8] sm:$0xff] %v1080_v32 }
 0x127   :  { %v429_v33 = vpop.f32.mrb[24].mxu0  ;;  %v542_v34 = vpop.f32.mrb[24].mxu1 }
 0x128   :  { %v431_v35 = vpop.f32.mrb[25].mxu0  ;;  %v544_v36 = vpop.f32.mrb[25].mxu1 }
 0x129   :  { %v1081_v37 = vpack.c.bf16 %v431_v35, %v429_v33  ;;  %v1082_v38 = vpack.c.bf16 %v544_v36, %v542_v34  ;;  %v433_v39 = vpop.f32.mrb[26].mxu0  ;;  %v546_v40 = vpop.f32.mrb[26].mxu1 }
 0x12a   :  { %v435_v41 = vpop.f32.mrb[27].mxu0  ;;  %v548_v42 = vpop.f32.mrb[27].mxu1 }
 0x12b   :  { %972 = vst [vmem:[%s1334_s2 + $0xc0] sm:$0xff] %v1081_v37  ;;  %973 = vst [vmem:[%s1334_s2 + $0xc8] sm:$0xff] %v1082_v38  ;;  %v1083_v43 = vpack.c.bf16 %v435_v41, %v433_v39  ;;  %v1084_v44 = vpack.c.bf16 %v548_v42, %v546_v40 }
 0x12d   :  { %974 = vst [vmem:[%s1334_s2 + $0xd0] sm:$0xff] %v1083_v43  ;;  %975 = vst [vmem:[%s1334_s2 + $0xd8] sm:$0xff] %v1084_v44 }
 0x12f   :  { %v439_v45 = vpop.f32.mrb[28].mxu0  ;;  %v552_v46 = vpop.f32.mrb[28].mxu1 }
 0x130   :  { %v441_v47 = vpop.f32.mrb[29].mxu0  ;;  %v554_v48 = vpop.f32.mrb[29].mxu1 }
 0x131   :  { %v1085_v49 = vpack.c.bf16 %v441_v47, %v439_v45  ;;  %v1086_v50 = vpack.c.bf16 %v554_v48, %v552_v46  ;;  %v443_v51 = vpop.f32.mrb[30].mxu0  ;;  %v556_v52 = vpop.f32.mrb[30].mxu1 }
 0x132   :  { %v445_v53 = vpop.f32.mrb[31].mxu0  ;;  %v558_v54 = vpop.f32.mrb[31].mxu1 }
 0x133   :  { %976 = vst [vmem:[%s1334_s2 + $0xe0] sm:$0xff] %v1085_v49  ;;  %977 = vst [vmem:[%s1334_s2 + $0xe8] sm:$0xff] %v1086_v50  ;;  %v1087_v55 = vpack.c.bf16 %v445_v53, %v443_v51  ;;  %v1088_v56 = vpack.c.bf16 %v558_v54, %v556_v52 }
 0x135   :  { %978 = vst [vmem:[%s1334_s2 + $0xf0] sm:$0xff] %v1087_v55  ;;  %979 = vst [vmem:[%s1334_s2 + $0xf8] sm:$0xff] %v1088_v56 }
 0x136   :  { %984 = vsyncpa [#allocation4], 1 }

// kernel: generator_forward_pallas.16
= control target key start
LH: loop header
LB: loop body
LE: loop exit
PB: predicated region body
PF: predicated region fallthrough
CT: control target
= control target key end

     0   :  { %vm604_vm0 = vcmask 257024   ;;  %s1472_s0 = inlined_call_operand.vmem [shape: bf16[512,32], index: 0, kind: input, shape index: {}]   ;;  %s1473_s1 = inlined_call_operand.vmem [shape: f32[1,32], index: 1, kind: input, shape index: {}]   ;;  %s1474_s2 = inlined_call_operand.vmem [shape: f32[1,32], index: 2, kind: input, shape index: {}]   ;;  %s1475_s3 = inlined_call_operand.vmem [shape: bf16[512,32], index: 3, kind: output, shape index: {}]  }
   0x1   :  { %v804_v0 = vld [vmem:[%s1472_s0] sm:$0xff]   ;;  %v931_v4 = vld [vmem:[%s1472_s0 + $0x8] sm:$0xff]   ;;  %v932_v5 = vld [vmem:[%s1472_s0 + $0x10] sm:$0xff]  }
   0x2   :  { %v988_v1 = vld [vmem:[%s1473_s1] ss:$0 sm:$0xff]  ;;  %v805_v2 = vunpack.c.l.bf16 %v804_v0  ;;  %v806_v3 = vunpack.c.h.bf16 %v804_v0  ;;  %v933_v6 = vld [vmem:[%s1472_s0 + $0x18] sm:$0xff]   ;;  %v809_v8 = vunpack.c.l.bf16 %v931_v4  ;;  %v810_v9 = vunpack.c.h.bf16 %v931_v4  ;;  %v935_v41 = vld [vmem:[%s1472_s0 + $0x28] sm:$0xff]  }
   0x3   :  { %v1002_v7 = vld [vmem:[%s1474_s2] ss:$0 sm:$0xff]  ;;  %v813_v10 = vunpack.c.l.bf16 %v932_v5  ;;  %v814_v11 = vunpack.c.h.bf16 %v932_v5  ;;  %v817_v14 = vunpack.c.l.bf16 %v933_v6  ;;  %v818_v15 = vunpack.c.h.bf16 %v933_v6  ;;  %v936_v42 = vld [vmem:[%s1472_s0 + $0x30] sm:$0xff]   ;;  %v937_v47 = vld [vmem:[%s1472_s0 + $0x38] sm:$0xff]  }
   0x4   :  { %v149_v12 = vmul.f32 %v805_v2, %v988_v1  ;;  %v150_v13 = vmul.f32 %v806_v3, %v988_v1  ;;  %v151_v16 = vmul.f32 %v809_v8, %v988_v1  ;;  %v152_v17 = vmul.f32 %v810_v9, %v988_v1  ;;  %v934_v36 = vld [vmem:[%s1472_s0 + $0x20] sm:$0xff]  }
   0x5   :  { %v153_v18 = vmul.f32 %v813_v10, %v988_v1  ;;  %v154_v19 = vmul.f32 %v814_v11, %v988_v1  ;;  %v155_v22 = vmul.f32 %v817_v14, %v988_v1  ;;  %v156_v23 = vmul.f32 %v818_v15, %v988_v1 }
   0x6   :  { %v220_v20 = vadd.f32 %v1002_v7, %v149_v12  ;;  %v221_v21 = vadd.f32 %v1002_v7, %v150_v13  ;;  %v222_v24 = vadd.f32 %v1002_v7, %v151_v16  ;;  %v223_v25 = vadd.f32 %v1002_v7, %v152_v17 }
   0x7   :  { %v224_v26 = vadd.f32 %v1002_v7, %v153_v18  ;;  %v225_v27 = vadd.f32 %v1002_v7, %v154_v19  ;;  %v226_v30 = vadd.f32 %v1002_v7, %v155_v22  ;;  %v227_v31 = vadd.f32 %v1002_v7, %v156_v23  ;;  %v938_v18 = vld [vmem:[%s1472_s0 + $0x40] sm:$0xff]   ;;  %v939_v23 = vld [vmem:[%s1472_s0 + $0x48] sm:$0xff]  }
   0x8   :  { %v284_v28 = vmax.f32 %v220_v20, 0.0  ;;  %v285_v29 = vmax.f32 %v221_v21, 0.0  ;;  %v286_v32 = vmax.f32 %v222_v24, 0.0  ;;  %v287_v33 = vmax.f32 %v223_v25, 0.0  ;;  %v940_v24 = vld [vmem:[%s1472_s0 + $0x50] sm:$0xff]  }
   0x9   :  { %v288_v34 = vmax.f32 %v224_v26, 0.0  ;;  %v289_v35 = vmax.f32 %v225_v27, 0.0  ;;  %v290_v39 = vmax.f32 %v226_v30, 0.0  ;;  %v291_v40 = vmax.f32 %v227_v31, 0.0 }
   0xa   :  { %v739_v37 = vpack.c.bf16 %v284_v28, %v284_v28  ;;  %v740_v38 = vpack.c.bf16 %v285_v29, %v285_v29  ;;  %v741_v43 = vpack.c.bf16 %v286_v32, %v286_v32  ;;  %v742_v44 = vpack.c.bf16 %v287_v33, %v287_v33  ;;  %v941_v29 = vld [vmem:[%s1472_s0 + $0x58] sm:$0xff]  }
   0xb   :  { %v743_v45 = vpack.c.bf16 %v288_v34, %v288_v34  ;;  %v744_v46 = vpack.c.bf16 %v289_v35, %v289_v35  ;;  %v745_v48 = vpack.c.bf16 %v290_v39, %v290_v39  ;;  %v746_v49 = vpack.c.bf16 %v291_v40, %v291_v40 }
   0xc   :  { %605 = vst.msk [vmem:[%s1475_s3] sm:$0xf] %vm604_vm0, %v739_v37  ;;  %606 = vst.msk [vmem:[%s1475_s3 + $0x4] sm:$0xf] %vm604_vm0, %v740_v38  ;;  %v821_v50 = vunpack.c.l.bf16 %v934_v36  ;;  %v822_v51 = vunpack.c.h.bf16 %v934_v36  ;;  %v825_v52 = vunpack.c.l.bf16 %v935_v41  ;;  %v826_v53 = vunpack.c.h.bf16 %v935_v41 }
   0xd   :  { %607 = vst.msk [vmem:[%s1475_s3 + $0x8] sm:$0xf] %vm604_vm0, %v741_v43  ;;  %608 = vst.msk [vmem:[%s1475_s3 + $0xc] sm:$0xf] %vm604_vm0, %v742_v44  ;;  %v829_v54 = vunpack.c.l.bf16 %v936_v42  ;;  %v830_v55 = vunpack.c.h.bf16 %v936_v42  ;;  %v833_v58 = vunpack.c.l.bf16 %v937_v47  ;;  %v834_v59 = vunpack.c.h.bf16 %v937_v47 }
   0xe   :  { %609 = vst.msk [vmem:[%s1475_s3 + $0x10] sm:$0xf] %vm604_vm0, %v743_v45  ;;  %610 = vst.msk [vmem:[%s1475_s3 + $0x14] sm:$0xf] %vm604_vm0, %v744_v46  ;;  %v157_v56 = vmul.f32 %v821_v50, %v988_v1  ;;  %v158_v57 = vmul.f32 %v822_v51, %v988_v1  ;;  %v159_v60 = vmul.f32 %v825_v52, %v988_v1  ;;  %v837_v32 = vunpack.c.l.bf16 %v938_v18 }
   0xf   :  { %611 = vst.msk [vmem:[%s1475_s3 + $0x18] sm:$0xf] %vm604_vm0, %v745_v48  ;;  %612 = vst.msk [vmem:[%s1475_s3 + $0x1c] sm:$0xf] %vm604_vm0, %v746_v49  ;;  %v160_v61 = vmul.f32 %v826_v53, %v988_v1  ;;  %v161_v62 = vmul.f32 %v829_v54, %v988_v1  ;;  %v162_v63 = vmul.f32 %v830_v55, %v988_v1  ;;  %v838_v33 = vunpack.c.h.bf16 %v938_v18 }
  0x10   :  { %v228_v0 = vadd.f32 %v1002_v7, %v157_v56  ;;  %v229_v2 = vadd.f32 %v1002_v7, %v158_v57  ;;  %v163_v3 = vmul.f32 %v833_v58, %v988_v1  ;;  %v164_v4 = vmul.f32 %v834_v59, %v988_v1 }
  0x11   :  { %v230_v5 = vadd.f32 %v1002_v7, %v159_v60  ;;  %v231_v6 = vadd.f32 %v1002_v7, %v160_v61  ;;  %v232_v8 = vadd.f32 %v1002_v7, %v161_v62  ;;  %v233_v9 = vadd.f32 %v1002_v7, %v162_v63  ;;  %v942_v62 = vld [vmem:[%s1472_s0 + $0x60] sm:$0xff]  }
  0x12   :  { %v292_v10 = vmax.f32 %v228_v0, 0.0  ;;  %v293_v11 = vmax.f32 %v229_v2, 0.0  ;;  %v234_v12 = vadd.f32 %v1002_v7, %v163_v3  ;;  %v235_v13 = vadd.f32 %v1002_v7, %v164_v4  ;;  %v943_v4 = vld [vmem:[%s1472_s0 + $0x68] sm:$0xff]  }
  0x13   :  { %v294_v14 = vmax.f32 %v230_v5, 0.0  ;;  %v295_v15 = vmax.f32 %v231_v6, 0.0  ;;  %v296_v16 = vmax.f32 %v232_v8, 0.0  ;;  %v297_v17 = vmax.f32 %v233_v9, 0.0  ;;  %v944_v5 = vld [vmem:[%s1472_s0 + $0x70] sm:$0xff]  }
  0x14   :  { %v747_v19 = vpack.c.bf16 %v292_v10, %v292_v10  ;;  %v748_v20 = vpack.c.bf16 %v293_v11, %v293_v11  ;;  %v298_v21 = vmax.f32 %v234_v12, 0.0  ;;  %v299_v22 = vmax.f32 %v235_v13, 0.0  ;;  %v945_v11 = vld [vmem:[%s1472_s0 + $0x78] sm:$0xff]  }
  0x15   :  { %v749_v25 = vpack.c.bf16 %v294_v14, %v294_v14  ;;  %v750_v26 = vpack.c.bf16 %v295_v15, %v295_v15  ;;  %v751_v27 = vpack.c.bf16 %v296_v16, %v296_v16  ;;  %v752_v28 = vpack.c.bf16 %v297_v17, %v297_v17 }
  0x16   :  { %613 = vst.msk [vmem:[%s1475_s3 + $0x20] sm:$0xf] %vm604_vm0, %v747_v19  ;;  %614 = vst.msk [vmem:[%s1475_s3 + $0x24] sm:$0xf] %vm604_vm0, %v748_v20  ;;  %v753_v30 = vpack.c.bf16 %v298_v21, %v298_v21  ;;  %v754_v31 = vpack.c.bf16 %v299_v22, %v299_v22  ;;  %v841_v34 = vunpack.c.l.bf16 %v939_v23  ;;  %v842_v35 = vunpack.c.h.bf16 %v939_v23 }
  0x17   :  { %615 = vst.msk [vmem:[%s1475_s3 + $0x28] sm:$0xf] %vm604_vm0, %v749_v25  ;;  %616 = vst.msk [vmem:[%s1475_s3 + $0x2c] sm:$0xf] %vm604_vm0, %v750_v26  ;;  %v845_v36 = vunpack.c.l.bf16 %v940_v24  ;;  %v846_v37 = vunpack.c.h.bf16 %v940_v24  ;;  %v165_v38 = vmul.f32 %v837_v32, %v988_v1  ;;  %v166_v39 = vmul.f32 %v838_v33, %v988_v1 }
  0x18   :  { %617 = vst.msk [vmem:[%s1475_s3 + $0x30] sm:$0xf] %vm604_vm0, %v751_v27  ;;  %618 = vst.msk [vmem:[%s1475_s3 + $0x34] sm:$0xf] %vm604_vm0, %v752_v28  ;;  %v849_v40 = vunpack.c.l.bf16 %v941_v29  ;;  %v850_v41 = vunpack.c.h.bf16 %v941_v29  ;;  %v167_v42 = vmul.f32 %v841_v34, %v988_v1  ;;  %v168_v43 = vmul.f32 %v842_v35, %v988_v1 }
  0x19   :  { %619 = vst.msk [vmem:[%s1475_s3 + $0x38] sm:$0xf] %vm604_vm0, %v753_v30  ;;  %620 = vst.msk [vmem:[%s1475_s3 + $0x3c] sm:$0xf] %vm604_vm0, %v754_v31  ;;  %v169_v44 = vmul.f32 %v845_v36, %v988_v1  ;;  %v170_v45 = vmul.f32 %v846_v37, %v988_v1  ;;  %v236_v46 = vadd.f32 %v1002_v7, %v165_v38  ;;  %v853_v14 = vunpack.c.l.bf16 %v942_v62 }
  0x1a   :  { %v237_v47 = vadd.f32 %v1002_v7, %v166_v39  ;;  %v171_v48 = vmul.f32 %v849_v40, %v988_v1  ;;  %v172_v49 = vmul.f32 %v850_v41, %v988_v1  ;;  %v238_v50 = vadd.f32 %v1002_v7, %v167_v42 }
  0x1b   :  { %v239_v51 = vadd.f32 %v1002_v7, %v168_v43  ;;  %v240_v52 = vadd.f32 %v1002_v7, %v169_v44  ;;  %v241_v53 = vadd.f32 %v1002_v7, %v170_v45  ;;  %v300_v54 = vmax.f32 %v236_v46, 0.0  ;;  %v946_v44 = vld [vmem:[%s1472_s0 + $0x80] sm:$0xff]  }
  0x1c   :  { %v301_v55 = vmax.f32 %v237_v47, 0.0  ;;  %v242_v56 = vadd.f32 %v1002_v7, %v171_v48  ;;  %v243_v57 = vadd.f32 %v1002_v7, %v172_v49  ;;  %v302_v58 = vmax.f32 %v238_v50, 0.0  ;;  %v947_v49 = vld [vmem:[%s1472_s0 + $0x88] sm:$0xff]   ;;  %v948_v50 = vld [vmem:[%s1472_s0 + $0x90] sm:$0xff]  }
  0x1d   :  { %v303_v59 = vmax.f32 %v239_v51, 0.0  ;;  %v304_v60 = vmax.f32 %v240_v52, 0.0  ;;  %v305_v61 = vmax.f32 %v241_v53, 0.0  ;;  %v755_v63 = vpack.c.bf16 %v300_v54, %v300_v54 }
  0x1e   :  { %v756_v0 = vpack.c.bf16 %v301_v55, %v301_v55  ;;  %v306_v2 = vmax.f32 %v242_v56, 0.0  ;;  %v307_v3 = vmax.f32 %v243_v57, 0.0  ;;  %v757_v6 = vpack.c.bf16 %v302_v58, %v302_v58  ;;  %v949_v55 = vld [vmem:[%s1472_s0 + $0x98] sm:$0xff]  }
  0x1f   :  { %v758_v8 = vpack.c.bf16 %v303_v59, %v303_v59  ;;  %v759_v9 = vpack.c.bf16 %v304_v60, %v304_v60  ;;  %v760_v10 = vpack.c.bf16 %v305_v61, %v305_v61  ;;  %621 = vst.msk [vmem:[%s1475_s3 + $0x40] sm:$0xf] %vm604_vm0, %v755_v63  ;;  %v854_v15 = vunpack.c.h.bf16 %v942_v62 }
  0x20   :  { %622 = vst.msk [vmem:[%s1475_s3 + $0x44] sm:$0xf] %vm604_vm0, %v756_v0  ;;  %v761_v12 = vpack.c.bf16 %v306_v2, %v306_v2  ;;  %v762_v13 = vpack.c.bf16 %v307_v3, %v307_v3  ;;  %623 = vst.msk [vmem:[%s1475_s3 + $0x48] sm:$0xf] %vm604_vm0, %v757_v6  ;;  %v857_v16 = vunpack.c.l.bf16 %v943_v4  ;;  %v858_v17 = vunpack.c.h.bf16 %v943_v4 }
  0x21   :  { %624 = vst.msk [vmem:[%s1475_s3 + $0x4c] sm:$0xf] %vm604_vm0, %v758_v8  ;;  %625 = vst.msk [vmem:[%s1475_s3 + $0x50] sm:$0xf] %vm604_vm0, %v759_v9  ;;  %v861_v18 = vunpack.c.l.bf16 %v944_v5  ;;  %v862_v19 = vunpack.c.h.bf16 %v944_v5  ;;  %v173_v20 = vmul.f32 %v853_v14, %v988_v1  ;;  %v174_v21 = vmul.f32 %v854_v15, %v988_v1 }
  0x22   :  { %626 = vst.msk [vmem:[%s1475_s3 + $0x54] sm:$0xf] %vm604_vm0, %v760_v10  ;;  %627 = vst.msk [vmem:[%s1475_s3 + $0x58] sm:$0xf] %vm604_vm0, %v761_v12  ;;  %v865_v22 = vunpack.c.l.bf16 %v945_v11  ;;  %v866_v23 = vunpack.c.h.bf16 %v945_v11  ;;  %v175_v24 = vmul.f32 %v857_v16, %v988_v1  ;;  %v176_v25 = vmul.f32 %v858_v17, %v988_v1 }
  0x23   :  { %628 = vst.msk [vmem:[%s1475_s3 + $0x5c] sm:$0xf] %vm604_vm0, %v762_v13  ;;  %v177_v26 = vmul.f32 %v861_v18, %v988_v1  ;;  %v178_v27 = vmul.f32 %v862_v19, %v988_v1  ;;  %v244_v28 = vadd.f32 %v1002_v7, %v173_v20  ;;  %v245_v29 = vadd.f32 %v1002_v7, %v174_v21 }
  0x24   :  { %v179_v30 = vmul.f32 %v865_v22, %v988_v1  ;;  %v180_v31 = vmul.f32 %v866_v23, %v988_v1  ;;  %v246_v32 = vadd.f32 %v1002_v7, %v175_v24  ;;  %v247_v33 = vadd.f32 %v1002_v7, %v176_v25 }
  0x25   :  { %v248_v34 = vadd.f32 %v1002_v7, %v177_v26  ;;  %v249_v35 = vadd.f32 %v1002_v7, %v178_v27  ;;  %v308_v36 = vmax.f32 %v244_v28, 0.0  ;;  %v309_v37 = vmax.f32 %v245_v29, 0.0  ;;  %v950_v26 = vld [vmem:[%s1472_s0 + $0xa0] sm:$0xff]  }
  0x26   :  { %v250_v38 = vadd.f32 %v1002_v7, %v179_v30  ;;  %v251_v39 = vadd.f32 %v1002_v7, %v180_v31  ;;  %v310_v40 = vmax.f32 %v246_v32, 0.0  ;;  %v311_v41 = vmax.f32 %v247_v33, 0.0  ;;  %v951_v31 = vld [vmem:[%s1472_s0 + $0xa8] sm:$0xff]   ;;  %v952_v32 = vld [vmem:[%s1472_s0 + $0xb0] sm:$0xff]  }
  0x27   :  { %v312_v42 = vmax.f32 %v248_v34, 0.0  ;;  %v313_v43 = vmax.f32 %v249_v35, 0.0  ;;  %v763_v45 = vpack.c.bf16 %v308_v36, %v308_v36  ;;  %v764_v46 = vpack.c.bf16 %v309_v37, %v309_v37  ;;  %v953_v37 = vld [vmem:[%s1472_s0 + $0xb8] sm:$0xff]  }
  0x28   :  { %v314_v47 = vmax.f32 %v250_v38, 0.0  ;;  %v315_v48 = vmax.f32 %v251_v39, 0.0  ;;  %v765_v51 = vpack.c.bf16 %v310_v40, %v310_v40  ;;  %v766_v52 = vpack.c.bf16 %v311_v41, %v311_v41 }
  0x29   :  { %v767_v53 = vpack.c.bf16 %v312_v42, %v312_v42  ;;  %v768_v54 = vpack.c.bf16 %v313_v43, %v313_v43  ;;  %629 = vst.msk [vmem:[%s1475_s3 + $0x60] sm:$0xf] %vm604_vm0, %v763_v45  ;;  %630 = vst.msk [vmem:[%s1475_s3 + $0x64] sm:$0xf] %vm604_vm0, %v764_v46  ;;  %v869_v58 = vunpack.c.l.bf16 %v946_v44  ;;  %v870_v59 = vunpack.c.h.bf16 %v946_v44 }
  0x2a   :  { %v769_v56 = vpack.c.bf16 %v314_v47, %v314_v47  ;;  %v770_v57 = vpack.c.bf16 %v315_v48, %v315_v48  ;;  %631 = vst.msk [vmem:[%s1475_s3 + $0x68] sm:$0xf] %vm604_vm0, %v765_v51  ;;  %632 = vst.msk [vmem:[%s1475_s3 + $0x6c] sm:$0xf] %vm604_vm0, %v766_v52  ;;  %v873_v60 = vunpack.c.l.bf16 %v947_v49  ;;  %v874_v61 = vunpack.c.h.bf16 %v947_v49 }
  0x2b   :  { %633 = vst.msk [vmem:[%s1475_s3 + $0x70] sm:$0xf] %vm604_vm0, %v767_v53  ;;  %634 = vst.msk [vmem:[%s1475_s3 + $0x74] sm:$0xf] %vm604_vm0, %v768_v54  ;;  %v877_v62 = vunpack.c.l.bf16 %v948_v50  ;;  %v878_v63 = vunpack.c.h.bf16 %v948_v50  ;;  %v181_v0 = vmul.f32 %v869_v58, %v988_v1  ;;  %v182_v2 = vmul.f32 %v870_v59, %v988_v1 }
  0x2c   :  { %635 = vst.msk [vmem:[%s1475_s3 + $0x78] sm:$0xf] %vm604_vm0, %v769_v56  ;;  %636 = vst.msk [vmem:[%s1475_s3 + $0x7c] sm:$0xf] %vm604_vm0, %v770_v57  ;;  %v881_v3 = vunpack.c.l.bf16 %v949_v55  ;;  %v882_v4 = vunpack.c.h.bf16 %v949_v55  ;;  %v183_v5 = vmul.f32 %v873_v60, %v988_v1  ;;  %v184_v6 = vmul.f32 %v874_v61, %v988_v1 }
  0x2d   :  { %v185_v8 = vmul.f32 %v877_v62, %v988_v1  ;;  %v186_v9 = vmul.f32 %v878_v63, %v988_v1  ;;  %v252_v10 = vadd.f32 %v1002_v7, %v181_v0  ;;  %v253_v11 = vadd.f32 %v1002_v7, %v182_v2 }
  0x2e   :  { %v187_v12 = vmul.f32 %v881_v3, %v988_v1  ;;  %v188_v13 = vmul.f32 %v882_v4, %v988_v1  ;;  %v254_v14 = vadd.f32 %v1002_v7, %v183_v5  ;;  %v255_v15 = vadd.f32 %v1002_v7, %v184_v6 }
  0x2f   :  { %v256_v16 = vadd.f32 %v1002_v7, %v185_v8  ;;  %v257_v17 = vadd.f32 %v1002_v7, %v186_v9  ;;  %v316_v18 = vmax.f32 %v252_v10, 0.0  ;;  %v317_v19 = vmax.f32 %v253_v11, 0.0  ;;  %v954_v8 = vld [vmem:[%s1472_s0 + $0xc0] sm:$0xff]  }
  0x30   :  { %v258_v20 = vadd.f32 %v1002_v7, %v187_v12  ;;  %v259_v21 = vadd.f32 %v1002_v7, %v188_v13  ;;  %v318_v22 = vmax.f32 %v254_v14, 0.0  ;;  %v319_v23 = vmax.f32 %v255_v15, 0.0  ;;  %v955_v13 = vld [vmem:[%s1472_s0 + $0xc8] sm:$0xff]   ;;  %v956_v14 = vld [vmem:[%s1472_s0 + $0xd0] sm:$0xff]  }
  0x31   :  { %v320_v24 = vmax.f32 %v256_v16, 0.0  ;;  %v321_v25 = vmax.f32 %v257_v17, 0.0  ;;  %v771_v27 = vpack.c.bf16 %v316_v18, %v316_v18  ;;  %v772_v28 = vpack.c.bf16 %v317_v19, %v317_v19  ;;  %v957_v19 = vld [vmem:[%s1472_s0 + $0xd8] sm:$0xff]  }
  0x32   :  { %v322_v29 = vmax.f32 %v258_v20, 0.0  ;;  %v323_v30 = vmax.f32 %v259_v21, 0.0  ;;  %v773_v33 = vpack.c.bf16 %v318_v22, %v318_v22  ;;  %v774_v34 = vpack.c.bf16 %v319_v23, %v319_v23 }
  0x33   :  { %v775_v35 = vpack.c.bf16 %v320_v24, %v320_v24  ;;  %v776_v36 = vpack.c.bf16 %v321_v25, %v321_v25  ;;  %637 = vst.msk [vmem:[%s1475_s3 + $0x80] sm:$0xf] %vm604_vm0, %v771_v27  ;;  %638 = vst.msk [vmem:[%s1475_s3 + $0x84] sm:$0xf] %vm604_vm0, %v772_v28  ;;  %v885_v40 = vunpack.c.l.bf16 %v950_v26  ;;  %v886_v41 = vunpack.c.h.bf16 %v950_v26 }
  0x34   :  { %v777_v38 = vpack.c.bf16 %v322_v29, %v322_v29  ;;  %v778_v39 = vpack.c.bf16 %v323_v30, %v323_v30  ;;  %639 = vst.msk [vmem:[%s1475_s3 + $0x88] sm:$0xf] %vm604_vm0, %v773_v33  ;;  %640 = vst.msk [vmem:[%s1475_s3 + $0x8c] sm:$0xf] %vm604_vm0, %v774_v34  ;;  %v889_v42 = vunpack.c.l.bf16 %v951_v31  ;;  %v890_v43 = vunpack.c.h.bf16 %v951_v31 }
  0x35   :  { %641 = vst.msk [vmem:[%s1475_s3 + $0x90] sm:$0xf] %vm604_vm0, %v775_v35  ;;  %642 = vst.msk [vmem:[%s1475_s3 + $0x94] sm:$0xf] %vm604_vm0, %v776_v36  ;;  %v893_v44 = vunpack.c.l.bf16 %v952_v32  ;;  %v894_v45 = vunpack.c.h.bf16 %v952_v32  ;;  %v189_v46 = vmul.f32 %v885_v40, %v988_v1  ;;  %v190_v47 = vmul.f32 %v886_v41, %v988_v1 }
  0x36   :  { %643 = vst.msk [vmem:[%s1475_s3 + $0x98] sm:$0xf] %vm604_vm0, %v777_v38  ;;  %644 = vst.msk [vmem:[%s1475_s3 + $0x9c] sm:$0xf] %vm604_vm0, %v778_v39  ;;  %v897_v48 = vunpack.c.l.bf16 %v953_v37  ;;  %v898_v49 = vunpack.c.h.bf16 %v953_v37  ;;  %v191_v50 = vmul.f32 %v889_v42, %v988_v1  ;;  %v192_v51 = vmul.f32 %v890_v43, %v988_v1 }
  0x37   :  { %v193_v52 = vmul.f32 %v893_v44, %v988_v1  ;;  %v194_v53 = vmul.f32 %v894_v45, %v988_v1  ;;  %v260_v54 = vadd.f32 %v1002_v7, %v189_v46  ;;  %v261_v55 = vadd.f32 %v1002_v7, %v190_v47 }
  0x38   :  { %v195_v56 = vmul.f32 %v897_v48, %v988_v1  ;;  %v196_v57 = vmul.f32 %v898_v49, %v988_v1  ;;  %v262_v58 = vadd.f32 %v1002_v7, %v191_v50  ;;  %v263_v59 = vadd.f32 %v1002_v7, %v192_v51 }
  0x39   :  { %v264_v60 = vadd.f32 %v1002_v7, %v193_v52  ;;  %v265_v61 = vadd.f32 %v1002_v7, %v194_v53  ;;  %v324_v62 = vmax.f32 %v260_v54, 0.0  ;;  %v325_v63 = vmax.f32 %v261_v55, 0.0  ;;  %v958_v52 = vld [vmem:[%s1472_s0 + $0xe0] sm:$0xff]  }
  0x3a   :  { %v266_v0 = vadd.f32 %v1002_v7, %v195_v56  ;;  %v267_v2 = vadd.f32 %v1002_v7, %v196_v57  ;;  %v326_v3 = vmax.f32 %v262_v58, 0.0  ;;  %v327_v4 = vmax.f32 %v263_v59, 0.0  ;;  %v959_v57 = vld [vmem:[%s1472_s0 + $0xe8] sm:$0xff]   ;;  %v960_v58 = vld [vmem:[%s1472_s0 + $0xf0] sm:$0xff]  }
  0x3b   :  { %v328_v5 = vmax.f32 %v264_v60, 0.0  ;;  %v329_v6 = vmax.f32 %v265_v61, 0.0  ;;  %v779_v9 = vpack.c.bf16 %v324_v62, %v324_v62  ;;  %v780_v10 = vpack.c.bf16 %v325_v63, %v325_v63  ;;  %v961_v63 = vld [vmem:[%s1472_s0 + $0xf8] sm:$0xff]  }
  0x3c   :  { %v330_v11 = vmax.f32 %v266_v0, 0.0  ;;  %v331_v12 = vmax.f32 %v267_v2, 0.0  ;;  %v781_v15 = vpack.c.bf16 %v326_v3, %v326_v3  ;;  %v782_v16 = vpack.c.bf16 %v327_v4, %v327_v4 }
  0x3d   :  { %v783_v17 = vpack.c.bf16 %v328_v5, %v328_v5  ;;  %v784_v18 = vpack.c.bf16 %v329_v6, %v329_v6  ;;  %645 = vst.msk [vmem:[%s1475_s3 + $0xa0] sm:$0xf] %vm604_vm0, %v779_v9  ;;  %646 = vst.msk [vmem:[%s1475_s3 + $0xa4] sm:$0xf] %vm604_vm0, %v780_v10  ;;  %v901_v22 = vunpack.c.l.bf16 %v954_v8  ;;  %v902_v23 = vunpack.c.h.bf16 %v954_v8 }
  0x3e   :  { %v785_v20 = vpack.c.bf16 %v330_v11, %v330_v11  ;;  %v786_v21 = vpack.c.bf16 %v331_v12, %v331_v12  ;;  %647 = vst.msk [vmem:[%s1475_s3 + $0xa8] sm:$0xf] %vm604_vm0, %v781_v15  ;;  %648 = vst.msk [vmem:[%s1475_s3 + $0xac] sm:$0xf] %vm604_vm0, %v782_v16  ;;  %v905_v24 = vunpack.c.l.bf16 %v955_v13  ;;  %v906_v25 = vunpack.c.h.bf16 %v955_v13 }
  0x3f   :  { %649 = vst.msk [vmem:[%s1475_s3 + $0xb0] sm:$0xf] %vm604_vm0, %v783_v17  ;;  %650 = vst.msk [vmem:[%s1475_s3 + $0xb4] sm:$0xf] %vm604_vm0, %v784_v18  ;;  %v909_v26 = vunpack.c.l.bf16 %v956_v14  ;;  %v910_v27 = vunpack.c.h.bf16 %v956_v14  ;;  %v197_v28 = vmul.f32 %v901_v22, %v988_v1  ;;  %v198_v29 = vmul.f32 %v902_v23, %v988_v1 }
  0x40   :  { %651 = vst.msk [vmem:[%s1475_s3 + $0xb8] sm:$0xf] %vm604_vm0, %v785_v20  ;;  %652 = vst.msk [vmem:[%s1475_s3 + $0xbc] sm:$0xf] %vm604_vm0, %v786_v21  ;;  %v913_v30 = vunpack.c.l.bf16 %v957_v19  ;;  %v914_v31 = vunpack.c.h.bf16 %v957_v19  ;;  %v199_v32 = vmul.f32 %v905_v24, %v988_v1  ;;  %v200_v33 = vmul.f32 %v906_v25, %v988_v1 }
  0x41   :  { %v201_v34 = vmul.f32 %v909_v26, %v988_v1  ;;  %v202_v35 = vmul.f32 %v910_v27, %v988_v1  ;;  %v268_v36 = vadd.f32 %v1002_v7, %v197_v28  ;;  %v269_v37 = vadd.f32 %v1002_v7, %v198_v29 }
  0x42   :  { %v203_v38 = vmul.f32 %v913_v30, %v988_v1  ;;  %v204_v39 = vmul.f32 %v914_v31, %v988_v1  ;;  %v270_v40 = vadd.f32 %v1002_v7, %v199_v32  ;;  %v271_v41 = vadd.f32 %v1002_v7, %v200_v33 }
  0x43   :  { %v272_v42 = vadd.f32 %v1002_v7, %v201_v34  ;;  %v273_v43 = vadd.f32 %v1002_v7, %v202_v35  ;;  %v332_v44 = vmax.f32 %v268_v36, 0.0  ;;  %v333_v45 = vmax.f32 %v269_v37, 0.0 }
  0x44   :  { %v274_v46 = vadd.f32 %v1002_v7, %v203_v38  ;;  %v275_v47 = vadd.f32 %v1002_v7, %v204_v39  ;;  %v334_v48 = vmax.f32 %v270_v40, 0.0  ;;  %v335_v49 = vmax.f32 %v271_v41, 0.0 }
  0x45   :  { %v336_v50 = vmax.f32 %v272_v42, 0.0  ;;  %v337_v51 = vmax.f32 %v273_v43, 0.0  ;;  %v787_v53 = vpack.c.bf16 %v332_v44, %v332_v44  ;;  %v788_v54 = vpack.c.bf16 %v333_v45, %v333_v45 }
  0x46   :  { %v338_v55 = vmax.f32 %v274_v46, 0.0  ;;  %v339_v56 = vmax.f32 %v275_v47, 0.0  ;;  %v789_v59 = vpack.c.bf16 %v334_v48, %v334_v48  ;;  %v790_v60 = vpack.c.bf16 %v335_v49, %v335_v49 }
  0x47   :  { %v791_v61 = vpack.c.bf16 %v336_v50, %v336_v50  ;;  %v792_v62 = vpack.c.bf16 %v337_v51, %v337_v51  ;;  %653 = vst.msk [vmem:[%s1475_s3 + $0xc0] sm:$0xf] %vm604_vm0, %v787_v53  ;;  %654 = vst.msk [vmem:[%s1475_s3 + $0xc4] sm:$0xf] %vm604_vm0, %v788_v54  ;;  %v917_v3 = vunpack.c.l.bf16 %v958_v52  ;;  %v918_v4 = vunpack.c.h.bf16 %v958_v52 }
  0x48   :  { %v793_v0 = vpack.c.bf16 %v338_v55, %v338_v55  ;;  %v794_v2 = vpack.c.bf16 %v339_v56, %v339_v56  ;;  %655 = vst.msk [vmem:[%s1475_s3 + $0xc8] sm:$0xf] %vm604_vm0, %v789_v59  ;;  %656 = vst.msk [vmem:[%s1475_s3 + $0xcc] sm:$0xf] %vm604_vm0, %v790_v60  ;;  %v921_v5 = vunpack.c.l.bf16 %v959_v57  ;;  %v922_v6 = vunpack.c.h.bf16 %v959_v57 }
  0x49   :  { %657 = vst.msk [vmem:[%s1475_s3 + $0xd0] sm:$0xf] %vm604_vm0, %v791_v61  ;;  %658 = vst.msk [vmem:[%s1475_s3 + $0xd4] sm:$0xf] %vm604_vm0, %v792_v62  ;;  %v925_v8 = vunpack.c.l.bf16 %v960_v58  ;;  %v926_v9 = vunpack.c.h.bf16 %v960_v58  ;;  %v205_v10 = vmul.f32 %v917_v3, %v988_v1  ;;  %v206_v11 = vmul.f32 %v918_v4, %v988_v1 }
  0x4a   :  { %659 = vst.msk [vmem:[%s1475_s3 + $0xd8] sm:$0xf] %vm604_vm0, %v793_v0  ;;  %660 = vst.msk [vmem:[%s1475_s3 + $0xdc] sm:$0xf] %vm604_vm0, %v794_v2  ;;  %v929_v12 = vunpack.c.l.bf16 %v961_v63  ;;  %v930_v13 = vunpack.c.h.bf16 %v961_v63  ;;  %v207_v14 = vmul.f32 %v921_v5, %v988_v1  ;;  %v208_v15 = vmul.f32 %v922_v6, %v988_v1 }
  0x4b   :  { %v209_v16 = vmul.f32 %v925_v8, %v988_v1  ;;  %v210_v17 = vmul.f32 %v926_v9, %v988_v1  ;;  %v276_v18 = vadd.f32 %v1002_v7, %v205_v10  ;;  %v277_v19 = vadd.f32 %v1002_v7, %v206_v11 }
  0x4c   :  { %v211_v20 = vmul.f32 %v929_v12, %v988_v1  ;;  %v212_v21 = vmul.f32 %v930_v13, %v988_v1  ;;  %v278_v22 = vadd.f32 %v1002_v7, %v207_v14  ;;  %v279_v23 = vadd.f32 %v1002_v7, %v208_v15 }
  0x4d   :  { %v280_v24 = vadd.f32 %v1002_v7, %v209_v16  ;;  %v281_v25 = vadd.f32 %v1002_v7, %v210_v17  ;;  %v340_v26 = vmax.f32 %v276_v18, 0.0  ;;  %v341_v27 = vmax.f32 %v277_v19, 0.0 }
  0x4e   :  { %v282_v28 = vadd.f32 %v1002_v7, %v211_v20  ;;  %v283_v29 = vadd.f32 %v1002_v7, %v212_v21  ;;  %v342_v30 = vmax.f32 %v278_v22, 0.0  ;;  %v343_v31 = vmax.f32 %v279_v23, 0.0 }
  0x4f   :  { %v344_v32 = vmax.f32 %v280_v24, 0.0  ;;  %v345_v33 = vmax.f32 %v281_v25, 0.0  ;;  %v795_v34 = vpack.c.bf16 %v340_v26, %v340_v26  ;;  %v796_v1 = vpack.c.bf16 %v341_v27, %v341_v27 }
  0x50   :  { %v346_v35 = vmax.f32 %v282_v28, 0.0  ;;  %v347_v36 = vmax.f32 %v283_v29, 0.0  ;;  %v797_v37 = vpack.c.bf16 %v342_v30, %v342_v30  ;;  %v798_v38 = vpack.c.bf16 %v343_v31, %v343_v31 }
  0x51   :  { %v799_v39 = vpack.c.bf16 %v344_v32, %v344_v32  ;;  %v800_v40 = vpack.c.bf16 %v345_v33, %v345_v33  ;;  %661 = vst.msk [vmem:[%s1475_s3 + $0xe0] sm:$0xf] %vm604_vm0, %v795_v34  ;;  %662 = vst.msk [vmem:[%s1475_s3 + $0xe4] sm:$0xf] %vm604_vm0, %v796_v1 }
  0x52   :  { %v801_v7 = vpack.c.bf16 %v346_v35, %v346_v35  ;;  %v802_v41 = vpack.c.bf16 %v347_v36, %v347_v36  ;;  %663 = vst.msk [vmem:[%s1475_s3 + $0xe8] sm:$0xf] %vm604_vm0, %v797_v37  ;;  %664 = vst.msk [vmem:[%s1475_s3 + $0xec] sm:$0xf] %vm604_vm0, %v798_v38 }
  0x53   :  { %665 = vst.msk [vmem:[%s1475_s3 + $0xf0] sm:$0xf] %vm604_vm0, %v799_v39  ;;  %666 = vst.msk [vmem:[%s1475_s3 + $0xf4] sm:$0xf] %vm604_vm0, %v800_v40 }
  0x54   :  { %667 = vst.msk [vmem:[%s1475_s3 + $0xf8] sm:$0xf] %vm604_vm0, %v801_v7  ;;  %668 = vst.msk [vmem:[%s1475_s3 + $0xfc] sm:$0xf] %vm604_vm0, %v802_v41 }

// kernel: generator_forward_pallas.17
= control target key start
LH: loop header
LB: loop body
LE: loop exit
PB: predicated region body
PF: predicated region fallthrough
CT: control target
= control target key end

     0   :  { %v2048_v1 = vmov 0   ;;  %vm520_vm0 = vcmask 261120   ;;  %s2428_s1 = inlined_call_operand.vmem [shape: bf16[32,256], index: 1, kind: input, shape index: {}]   ;;  %s2429_s0 = inlined_call_operand.vmem [shape: bf16[512,32], index: 0, kind: input, shape index: {}]   ;;  %s2430_s2 = inlined_call_operand.vmem [shape: bf16[512,256], index: 2, kind: output, shape index: {}]  }
   0x1   :  { %v2010_v0 = vld [vmem:[%s2428_s1 + $0x4] ss:$8 sps:$4 sm:$0xff]   ;;  %649 = vmatprep.mubr.bf16.mxu0 %v2048_v1  ;;  %809 = vmatprep.mubr.bf16.mxu1 %v2048_v1  ;;  %v2012_v2 = vld [vmem:[%s2428_s1] ss:$8 sps:$4 sm:$0xff]   ;;  %v2013_v3 = vld [vmem:[%s2428_s1 + $0x14] ss:$8 sps:$4 sm:$0xff]  }
   0x2   :  { %617 = vmatprep.subr.bf16.mxu0 %v2010_v0  ;;  %2005 = vmatprep.subr.bf16.mxu1 %v2010_v0  ;;  %v2015_v4 = vld [vmem:[%s2428_s1 + $0x10] ss:$8 sps:$4 sm:$0xff]   ;;  %v2016_v5 = vld [vmem:[%s2429_s0] sm:$0xff]   ;;  %v2018_v7 = vld [vmem:[%s2429_s0 + $0x8] sm:$0xff]  }
   0x3   :  { %618 = vmatpush1.bf16.msra.mxu0 %v2012_v2  ;;  %2007 = vmatpush1.bf16.msra.mxu1 %v2012_v2  ;;  %v2017_v6 = vld [vmem:[%s2429_s0 + $0x80] sm:$0xff]   ;;  %v2019_v8 = vld [vmem:[%s2429_s0 + $0x88] sm:$0xff]   ;;  %v2020_v9 = vld [vmem:[%s2429_s0 + $0x10] sm:$0xff]  }
   0x4   :  { %619 = vmatprep.subr.bf16.mxu0 %v2013_v3  ;;  %2006 = vmatprep.subr.bf16.mxu1 %v2013_v3  ;;  %v2021_v10 = vld [vmem:[%s2429_s0 + $0x90] sm:$0xff]   ;;  %v2022_v11 = vld [vmem:[%s2429_s0 + $0x18] sm:$0xff]   ;;  %v2024_v13 = vld [vmem:[%s2429_s0 + $0x20] sm:$0xff]  }
   0x5   :  { %v2023_v12 = vld [vmem:[%s2429_s0 + $0x98] sm:$0xff]   ;;  %v2025_v14 = vld [vmem:[%s2429_s0 + $0xa0] sm:$0xff]   ;;  %v2026_v15 = vld [vmem:[%s2429_s0 + $0x28] sm:$0xff]  }
   0x6   :  { %v2027_v16 = vld [vmem:[%s2429_s0 + $0xa8] sm:$0xff]   ;;  %v2028_v17 = vld [vmem:[%s2429_s0 + $0x30] sm:$0xff]   ;;  %v2030_v19 = vld [vmem:[%s2429_s0 + $0x38] sm:$0xff]  }
   0x7   :  { %620 = vmatpush1.bf16.msra.mxu0 %v2015_v4  ;;  %2008 = vmatpush1.bf16.msra.mxu1 %v2015_v4  ;;  %v2029_v18 = vld [vmem:[%s2429_s0 + $0xb0] sm:$0xff]   ;;  %v2031_v20 = vld [vmem:[%s2429_s0 + $0xb8] sm:$0xff]   ;;  %v2032_v21 = vld [vmem:[%s2429_s0 + $0x40] sm:$0xff]  }
   0x8   :  { %v2033_v22 = vld [vmem:[%s2429_s0 + $0xc0] sm:$0xff]   ;;  %v2034_v23 = vld [vmem:[%s2429_s0 + $0x48] sm:$0xff]   ;;  %v2036_v25 = vld [vmem:[%s2429_s0 + $0x50] sm:$0xff]  }
   0x9   :  { %v2035_v24 = vld [vmem:[%s2429_s0 + $0xc8] sm:$0xff]   ;;  %v2037_v26 = vld [vmem:[%s2429_s0 + $0xd0] sm:$0xff]   ;;  %v2038_v27 = vld [vmem:[%s2429_s0 + $0x58] sm:$0xff]  }
   0xa   :  { %1845 = vmatmul.mubr.msk.bf16.vlgmr.msra.gmra.mrb[0].mxu0 %vm520_vm0, %v2016_v5  ;;  %1861 = vmatmul.mubr.msk.bf16.vlgmr.msra.gmra.mrb[0].mxu1 %vm520_vm0, %v2017_v6  ;;  %v2039_v28 = vld [vmem:[%s2429_s0 + $0xd8] sm:$0xff]   ;;  %v2040_v29 = vld [vmem:[%s2429_s0 + $0x60] sm:$0xff]   ;;  %v2042_v31 = vld [vmem:[%s2429_s0 + $0x68] sm:$0xff]  }
   0xb   :  { %659 = vmatprep.mubr.bf16.mxu0 %v2048_v1  ;;  %819 = vmatprep.mubr.bf16.mxu1 %v2048_v1  ;;  %v2041_v30 = vld [vmem:[%s2429_s0 + $0xe0] sm:$0xff]   ;;  %v2043_v32 = vld [vmem:[%s2429_s0 + $0xe8] sm:$0xff]   ;;  %v2044_v33 = vld [vmem:[%s2429_s0 + $0x70] sm:$0xff]  }
   0xc   :  { %v2045_v34 = vld [vmem:[%s2429_s0 + $0xf0] sm:$0xff]   ;;  %v2046_v35 = vld [vmem:[%s2429_s0 + $0x78] sm:$0xff]  }
   0xd   :  { %v2047_v36 = vld [vmem:[%s2429_s0 + $0xf8] sm:$0xff]  }
  0x12   :  { %1846 = vmatmul.mubr.msk.bf16.gmra.mrb[4].mxu0 %vm520_vm0, %v2018_v7  ;;  %1862 = vmatmul.mubr.msk.bf16.gmra.mrb[4].mxu1 %vm520_vm0, %v2019_v8 }
  0x13   :  { %669 = vmatprep.mubr.bf16.mxu0 %v2048_v1  ;;  %829 = vmatprep.mubr.bf16.mxu1 %v2048_v1 }
  0x1a   :  { %1847 = vmatmul.mubr.msk.bf16.gmra.mrb[8].mxu0 %vm520_vm0, %v2020_v9  ;;  %1863 = vmatmul.mubr.msk.bf16.gmra.mrb[8].mxu1 %vm520_vm0, %v2021_v10 }
  0x1b   :  { %679 = vmatprep.mubr.bf16.mxu0 %v2048_v1  ;;  %839 = vmatprep.mubr.bf16.mxu1 %v2048_v1 }
  0x22   :  { %1848 = vmatmul.mubr.msk.bf16.gmra.mrb[12].mxu0 %vm520_vm0, %v2022_v11  ;;  %1864 = vmatmul.mubr.msk.bf16.gmra.mrb[12].mxu1 %vm520_vm0, %v2023_v12 }
  0x23   :  { %689 = vmatprep.mubr.bf16.mxu0 %v2048_v1  ;;  %849 = vmatprep.mubr.bf16.mxu1 %v2048_v1 }
  0x2a   :  { %1849 = vmatmul.mubr.msk.bf16.gmra.mrb[16].mxu0 %vm520_vm0, %v2024_v13  ;;  %1865 = vmatmul.mubr.msk.bf16.gmra.mrb[16].mxu1 %vm520_vm0, %v2025_v14 }
  0x2b   :  { %699 = vmatprep.mubr.bf16.mxu0 %v2048_v1  ;;  %859 = vmatprep.mubr.bf16.mxu1 %v2048_v1 }
  0x32   :  { %1850 = vmatmul.mubr.msk.bf16.gmra.mrb[20].mxu0 %vm520_vm0, %v2026_v15  ;;  %1866 = vmatmul.mubr.msk.bf16.gmra.mrb[20].mxu1 %vm520_vm0, %v2027_v16 }
  0x33   :  { %709 = vmatprep.mubr.bf16.mxu0 %v2048_v1  ;;  %869 = vmatprep.mubr.bf16.mxu1 %v2048_v1 }
  0x3a   :  { %1851 = vmatmul.mubr.msk.bf16.gmra.mrb[24].mxu0 %vm520_vm0, %v2028_v17  ;;  %1867 = vmatmul.mubr.msk.bf16.gmra.mrb[24].mxu1 %vm520_vm0, %v2029_v18 }
  0x3b   :  { %719 = vmatprep.mubr.bf16.mxu0 %v2048_v1  ;;  %879 = vmatprep.mubr.bf16.mxu1 %v2048_v1 }
  0x42   :  { %1852 = vmatmul.mubr.msk.bf16.gmra.mrb[28].mxu0 %vm520_vm0, %v2030_v19  ;;  %1868 = vmatmul.mubr.msk.bf16.gmra.mrb[28].mxu1 %vm520_vm0, %v2031_v20 }
  0x43   :  { %729 = vmatprep.mubr.bf16.mxu0 %v2048_v1  ;;  %889 = vmatprep.mubr.bf16.mxu1 %v2048_v1 }
  0x4a   :  { %1853 = vmatmul.mubr.msk.bf16.gmra.mrb[32].mxu0 %vm520_vm0, %v2032_v21  ;;  %1869 = vmatmul.mubr.msk.bf16.gmra.mrb[32].mxu1 %vm520_vm0, %v2033_v22 }
  0x4b   :  { %739 = vmatprep.mubr.bf16.mxu0 %v2048_v1  ;;  %899 = vmatprep.mubr.bf16.mxu1 %v2048_v1 }
  0x52   :  { %1854 = vmatmul.mubr.msk.bf16.gmra.mrb[36].mxu0 %vm520_vm0, %v2034_v23  ;;  %1870 = vmatmul.mubr.msk.bf16.gmra.mrb[36].mxu1 %vm520_vm0, %v2035_v24 }
  0x53   :  { %749 = vmatprep.mubr.bf16.mxu0 %v2048_v1  ;;  %909 = vmatprep.mubr.bf16.mxu1 %v2048_v1 }
  0x5a   :  { %1855 = vmatmul.mubr.msk.bf16.gmra.mrb[40].mxu0 %vm520_vm0, %v2036_v25  ;;  %1871 = vmatmul.mubr.msk.bf16.gmra.mrb[40].mxu1 %vm520_vm0, %v2037_v26 }
  0x5b   :  { %759 = vmatprep.mubr.bf16.mxu0 %v2048_v1  ;;  %919 = vmatprep.mubr.bf16.mxu1 %v2048_v1 }
  0x62   :  { %1856 = vmatmul.mubr.msk.bf16.gmra.mrb[44].mxu0 %vm520_vm0, %v2038_v27  ;;  %1872 = vmatmul.mubr.msk.bf16.gmra.mrb[44].mxu1 %vm520_vm0, %v2039_v28 }
  0x63   :  { %769 = vmatprep.mubr.bf16.mxu0 %v2048_v1  ;;  %929 = vmatprep.mubr.bf16.mxu1 %v2048_v1 }
  0x6a   :  { %1857 = vmatmul.mubr.msk.bf16.gmra.mrb[48].mxu0 %vm520_vm0, %v2040_v29  ;;  %1873 = vmatmul.mubr.msk.bf16.gmra.mrb[48].mxu1 %vm520_vm0, %v2041_v30 }
  0x6b   :  { %779 = vmatprep.mubr.bf16.mxu0 %v2048_v1  ;;  %939 = vmatprep.mubr.bf16.mxu1 %v2048_v1 }
  0x72   :  { %1858 = vmatmul.mubr.msk.bf16.gmra.mrb[52].mxu0 %vm520_vm0, %v2042_v31  ;;  %1874 = vmatmul.mubr.msk.bf16.gmra.mrb[52].mxu1 %vm520_vm0, %v2043_v32 }
  0x73   :  { %789 = vmatprep.mubr.bf16.mxu0 %v2048_v1  ;;  %949 = vmatprep.mubr.bf16.mxu1 %v2048_v1 }
  0x7a   :  { %1859 = vmatmul.mubr.msk.bf16.gmra.mrb[56].mxu0 %vm520_vm0, %v2044_v33  ;;  %1875 = vmatmul.mubr.msk.bf16.gmra.mrb[56].mxu1 %vm520_vm0, %v2045_v34 }
  0x7b   :  { %799 = vmatprep.mubr.bf16.mxu0 %v2048_v1  ;;  %959 = vmatprep.mubr.bf16.mxu1 %v2048_v1 }
  0x82   :  { %1860 = vmatmul.mubr.msk.bf16.gmra.mrb[60].mxu0 %vm520_vm0, %v2046_v35  ;;  %1876 = vmatmul.mubr.msk.bf16.gmra.mrb[60].mxu1 %vm520_vm0, %v2047_v36 }
  0xdd   :  { %v651_v37 = vpop.f32.mrb[0].mxu0  ;;  %v811_v38 = vpop.f32.mrb[0].mxu1 }
  0xde   :  { %v653_v39 = vpop.f32.mrb[1].mxu0  ;;  %v813_v40 = vpop.f32.mrb[1].mxu1 }
  0xdf   :  { %v1941_v41 = vpack.c.bf16 %v653_v39, %v651_v37  ;;  %v1973_v42 = vpack.c.bf16 %v813_v40, %v811_v38  ;;  %v655_v43 = vpop.f32.mrb[2].mxu0  ;;  %v815_v44 = vpop.f32.mrb[2].mxu1 }
  0xe0   :  { %v657_v45 = vpop.f32.mrb[3].mxu0  ;;  %v817_v46 = vpop.f32.mrb[3].mxu1 }
  0xe1   :  { %1741 = vst [vmem:[%s2430_s2] sm:$0xff] %v1941_v41  ;;  %1773 = vst [vmem:[%s2430_s2 + $0x100] sm:$0xff] %v1973_v42  ;;  %v1942_v47 = vpack.c.bf16 %v657_v45, %v655_v43  ;;  %v1974_v48 = vpack.c.bf16 %v817_v46, %v815_v44 }
  0xe3   :  { %1742 = vst [vmem:[%s2430_s2 + $0x8] sm:$0xff] %v1942_v47  ;;  %1774 = vst [vmem:[%s2430_s2 + $0x108] sm:$0xff] %v1974_v48 }
  0xe5   :  { %v661_v49 = vpop.f32.mrb[4].mxu0  ;;  %v821_v50 = vpop.f32.mrb[4].mxu1 }
  0xe6   :  { %v663_v51 = vpop.f32.mrb[5].mxu0  ;;  %v823_v52 = vpop.f32.mrb[5].mxu1 }
  0xe7   :  { %v1943_v53 = vpack.c.bf16 %v663_v51, %v661_v49  ;;  %v1975_v54 = vpack.c.bf16 %v823_v52, %v821_v50  ;;  %v665_v55 = vpop.f32.mrb[6].mxu0  ;;  %v825_v56 = vpop.f32.mrb[6].mxu1 }
  0xe8   :  { %v667_v57 = vpop.f32.mrb[7].mxu0  ;;  %v827_v58 = vpop.f32.mrb[7].mxu1 }
  0xe9   :  { %1743 = vst [vmem:[%s2430_s2 + $0x10] sm:$0xff] %v1943_v53  ;;  %1775 = vst [vmem:[%s2430_s2 + $0x110] sm:$0xff] %v1975_v54  ;;  %v1944_v59 = vpack.c.bf16 %v667_v57, %v665_v55  ;;  %v1976_v60 = vpack.c.bf16 %v827_v58, %v825_v56 }
  0xeb   :  { %1744 = vst [vmem:[%s2430_s2 + $0x18] sm:$0xff] %v1944_v59  ;;  %1776 = vst [vmem:[%s2430_s2 + $0x118] sm:$0xff] %v1976_v60 }
  0xed   :  { %v671_v61 = vpop.f32.mrb[8].mxu0  ;;  %v831_v62 = vpop.f32.mrb[8].mxu1 }
  0xee   :  { %v673_v63 = vpop.f32.mrb[9].mxu0  ;;  %v833_v0 = vpop.f32.mrb[9].mxu1 }
  0xef   :  { %v1945_v1 = vpack.c.bf16 %v673_v63, %v671_v61  ;;  %v1977_v2 = vpack.c.bf16 %v833_v0, %v831_v62  ;;  %v675_v3 = vpop.f32.mrb[10].mxu0  ;;  %v835_v4 = vpop.f32.mrb[10].mxu1 }
  0xf0   :  { %v677_v5 = vpop.f32.mrb[11].mxu0  ;;  %v837_v6 = vpop.f32.mrb[11].mxu1 }
  0xf1   :  { %1745 = vst [vmem:[%s2430_s2 + $0x20] sm:$0xff] %v1945_v1  ;;  %1777 = vst [vmem:[%s2430_s2 + $0x120] sm:$0xff] %v1977_v2  ;;  %v1946_v7 = vpack.c.bf16 %v677_v5, %v675_v3  ;;  %v1978_v8 = vpack.c.bf16 %v837_v6, %v835_v4 }
  0xf3   :  { %1746 = vst [vmem:[%s2430_s2 + $0x28] sm:$0xff] %v1946_v7  ;;  %1778 = vst [vmem:[%s2430_s2 + $0x128] sm:$0xff] %v1978_v8 }
  0xf5   :  { %v681_v9 = vpop.f32.mrb[12].mxu0  ;;  %v841_v10 = vpop.f32.mrb[12].mxu1 }
  0xf6   :  { %v683_v11 = vpop.f32.mrb[13].mxu0  ;;  %v843_v12 = vpop.f32.mrb[13].mxu1 }
  0xf7   :  { %v1947_v13 = vpack.c.bf16 %v683_v11, %v681_v9  ;;  %v1979_v14 = vpack.c.bf16 %v843_v12, %v841_v10  ;;  %v685_v15 = vpop.f32.mrb[14].mxu0  ;;  %v845_v16 = vpop.f32.mrb[14].mxu1 }
  0xf8   :  { %v687_v17 = vpop.f32.mrb[15].mxu0  ;;  %v847_v18 = vpop.f32.mrb[15].mxu1 }
  0xf9   :  { %1747 = vst [vmem:[%s2430_s2 + $0x30] sm:$0xff] %v1947_v13  ;;  %1779 = vst [vmem:[%s2430_s2 + $0x130] sm:$0xff] %v1979_v14  ;;  %v1948_v19 = vpack.c.bf16 %v687_v17, %v685_v15  ;;  %v1980_v20 = vpack.c.bf16 %v847_v18, %v845_v16 }
  0xfb   :  { %1748 = vst [vmem:[%s2430_s2 + $0x38] sm:$0xff] %v1948_v19  ;;  %1780 = vst [vmem:[%s2430_s2 + $0x138] sm:$0xff] %v1980_v20 }
  0xfd   :  { %v691_v21 = vpop.f32.mrb[16].mxu0  ;;  %v851_v22 = vpop.f32.mrb[16].mxu1 }
  0xfe   :  { %v693_v23 = vpop.f32.mrb[17].mxu0  ;;  %v853_v24 = vpop.f32.mrb[17].mxu1 }
  0xff   :  { %v1949_v25 = vpack.c.bf16 %v693_v23, %v691_v21  ;;  %v1981_v26 = vpack.c.bf16 %v853_v24, %v851_v22  ;;  %v695_v27 = vpop.f32.mrb[18].mxu0  ;;  %v855_v28 = vpop.f32.mrb[18].mxu1 }
 0x100   :  { %v697_v29 = vpop.f32.mrb[19].mxu0  ;;  %v857_v30 = vpop.f32.mrb[19].mxu1 }
 0x101   :  { %1749 = vst [vmem:[%s2430_s2 + $0x40] sm:$0xff] %v1949_v25  ;;  %1781 = vst [vmem:[%s2430_s2 + $0x140] sm:$0xff] %v1981_v26  ;;  %v1950_v31 = vpack.c.bf16 %v697_v29, %v695_v27  ;;  %v1982_v32 = vpack.c.bf16 %v857_v30, %v855_v28 }
 0x103   :  { %1750 = vst [vmem:[%s2430_s2 + $0x48] sm:$0xff] %v1950_v31  ;;  %1782 = vst [vmem:[%s2430_s2 + $0x148] sm:$0xff] %v1982_v32 }
 0x105   :  { %v701_v33 = vpop.f32.mrb[20].mxu0  ;;  %v861_v34 = vpop.f32.mrb[20].mxu1 }
 0x106   :  { %v703_v35 = vpop.f32.mrb[21].mxu0  ;;  %v863_v36 = vpop.f32.mrb[21].mxu1 }
 0x107   :  { %v1951_v37 = vpack.c.bf16 %v703_v35, %v701_v33  ;;  %v1983_v38 = vpack.c.bf16 %v863_v36, %v861_v34  ;;  %v705_v39 = vpop.f32.mrb[22].mxu0  ;;  %v865_v40 = vpop.f32.mrb[22].mxu1 }
 0x108   :  { %v707_v41 = vpop.f32.mrb[23].mxu0  ;;  %v867_v42 = vpop.f32.mrb[23].mxu1 }
 0x109   :  { %1751 = vst [vmem:[%s2430_s2 + $0x50] sm:$0xff] %v1951_v37  ;;  %1783 = vst [vmem:[%s2430_s2 + $0x150] sm:$0xff] %v1983_v38  ;;  %v1952_v43 = vpack.c.bf16 %v707_v41, %v705_v39  ;;  %v1984_v44 = vpack.c.bf16 %v867_v42, %v865_v40 }
 0x10b   :  { %1752 = vst [vmem:[%s2430_s2 + $0x58] sm:$0xff] %v1952_v43  ;;  %1784 = vst [vmem:[%s2430_s2 + $0x158] sm:$0xff] %v1984_v44 }
 0x10d   :  { %v711_v45 = vpop.f32.mrb[24].mxu0  ;;  %v871_v46 = vpop.f32.mrb[24].mxu1 }
 0x10e   :  { %v713_v47 = vpop.f32.mrb[25].mxu0  ;;  %v873_v48 = vpop.f32.mrb[25].mxu1 }
 0x10f   :  { %v1953_v49 = vpack.c.bf16 %v713_v47, %v711_v45  ;;  %v1985_v50 = vpack.c.bf16 %v873_v48, %v871_v46  ;;  %v715_v51 = vpop.f32.mrb[26].mxu0  ;;  %v875_v52 = vpop.f32.mrb[26].mxu1 }
 0x110   :  { %v717_v53 = vpop.f32.mrb[27].mxu0  ;;  %v877_v54 = vpop.f32.mrb[27].mxu1 }
 0x111   :  { %1753 = vst [vmem:[%s2430_s2 + $0x60] sm:$0xff] %v1953_v49  ;;  %1785 = vst [vmem:[%s2430_s2 + $0x160] sm:$0xff] %v1985_v50  ;;  %v1954_v55 = vpack.c.bf16 %v717_v53, %v715_v51  ;;  %v1986_v56 = vpack.c.bf16 %v877_v54, %v875_v52 }
 0x113   :  { %1754 = vst [vmem:[%s2430_s2 + $0x68] sm:$0xff] %v1954_v55  ;;  %1786 = vst [vmem:[%s2430_s2 + $0x168] sm:$0xff] %v1986_v56 }
 0x115   :  { %v721_v57 = vpop.f32.mrb[28].mxu0  ;;  %v881_v58 = vpop.f32.mrb[28].mxu1 }
 0x116   :  { %v723_v59 = vpop.f32.mrb[29].mxu0  ;;  %v883_v60 = vpop.f32.mrb[29].mxu1 }
 0x117   :  { %v1955_v61 = vpack.c.bf16 %v723_v59, %v721_v57  ;;  %v1987_v62 = vpack.c.bf16 %v883_v60, %v881_v58  ;;  %v725_v63 = vpop.f32.mrb[30].mxu0  ;;  %v885_v0 = vpop.f32.mrb[30].mxu1 }
 0x118   :  { %v727_v1 = vpop.f32.mrb[31].mxu0  ;;  %v887_v2 = vpop.f32.mrb[31].mxu1 }
 0x119   :  { %1755 = vst [vmem:[%s2430_s2 + $0x70] sm:$0xff] %v1955_v61  ;;  %1787 = vst [vmem:[%s2430_s2 + $0x170] sm:$0xff] %v1987_v62  ;;  %v1956_v3 = vpack.c.bf16 %v727_v1, %v725_v63  ;;  %v1988_v4 = vpack.c.bf16 %v887_v2, %v885_v0 }
 0x11b   :  { %1756 = vst [vmem:[%s2430_s2 + $0x78] sm:$0xff] %v1956_v3  ;;  %1788 = vst [vmem:[%s2430_s2 + $0x178] sm:$0xff] %v1988_v4 }
 0x11d   :  { %v731_v5 = vpop.f32.mrb[32].mxu0  ;;  %v891_v6 = vpop.f32.mrb[32].mxu1 }
 0x11e   :  { %v733_v7 = vpop.f32.mrb[33].mxu0  ;;  %v893_v8 = vpop.f32.mrb[33].mxu1 }
 0x11f   :  { %v1957_v9 = vpack.c.bf16 %v733_v7, %v731_v5  ;;  %v1989_v10 = vpack.c.bf16 %v893_v8, %v891_v6  ;;  %v735_v11 = vpop.f32.mrb[34].mxu0  ;;  %v895_v12 = vpop.f32.mrb[34].mxu1 }
 0x120   :  { %v737_v13 = vpop.f32.mrb[35].mxu0  ;;  %v897_v14 = vpop.f32.mrb[35].mxu1 }
 0x121   :  { %1757 = vst [vmem:[%s2430_s2 + $0x80] sm:$0xff] %v1957_v9  ;;  %1789 = vst [vmem:[%s2430_s2 + $0x180] sm:$0xff] %v1989_v10  ;;  %v1958_v15 = vpack.c.bf16 %v737_v13, %v735_v11  ;;  %v1990_v16 = vpack.c.bf16 %v897_v14, %v895_v12 }
 0x123   :  { %1758 = vst [vmem:[%s2430_s2 + $0x88] sm:$0xff] %v1958_v15  ;;  %1790 = vst [vmem:[%s2430_s2 + $0x188] sm:$0xff] %v1990_v16 }
 0x125   :  { %v741_v17 = vpop.f32.mrb[36].mxu0  ;;  %v901_v18 = vpop.f32.mrb[36].mxu1 }
 0x126   :  { %v743_v19 = vpop.f32.mrb[37].mxu0  ;;  %v903_v20 = vpop.f32.mrb[37].mxu1 }
 0x127   :  { %v1959_v21 = vpack.c.bf16 %v743_v19, %v741_v17  ;;  %v1991_v22 = vpack.c.bf16 %v903_v20, %v901_v18  ;;  %v745_v23 = vpop.f32.mrb[38].mxu0  ;;  %v905_v24 = vpop.f32.mrb[38].mxu1 }
 0x128   :  { %v747_v25 = vpop.f32.mrb[39].mxu0  ;;  %v907_v26 = vpop.f32.mrb[39].mxu1 }
 0x129   :  { %1759 = vst [vmem:[%s2430_s2 + $0x90] sm:$0xff] %v1959_v21  ;;  %1791 = vst [vmem:[%s2430_s2 + $0x190] sm:$0xff] %v1991_v22  ;;  %v1960_v27 = vpack.c.bf16 %v747_v25, %v745_v23  ;;  %v1992_v28 = vpack.c.bf16 %v907_v26, %v905_v24 }
 0x12b   :  { %1760 = vst [vmem:[%s2430_s2 + $0x98] sm:$0xff] %v1960_v27  ;;  %1792 = vst [vmem:[%s2430_s2 + $0x198] sm:$0xff] %v1992_v28 }
 0x12d   :  { %v751_v29 = vpop.f32.mrb[40].mxu0  ;;  %v911_v30 = vpop.f32.mrb[40].mxu1 }
 0x12e   :  { %v753_v31 = vpop.f32.mrb[41].mxu0  ;;  %v913_v32 = vpop.f32.mrb[41].mxu1 }
 0x12f   :  { %v1961_v33 = vpack.c.bf16 %v753_v31, %v751_v29  ;;  %v1993_v34 = vpack.c.bf16 %v913_v32, %v911_v30  ;;  %v755_v35 = vpop.f32.mrb[42].mxu0  ;;  %v915_v36 = vpop.f32.mrb[42].mxu1 }
 0x130   :  { %v757_v37 = vpop.f32.mrb[43].mxu0  ;;  %v917_v38 = vpop.f32.mrb[43].mxu1 }
 0x131   :  { %1761 = vst [vmem:[%s2430_s2 + $0xa0] sm:$0xff] %v1961_v33  ;;  %1793 = vst [vmem:[%s2430_s2 + $0x1a0] sm:$0xff] %v1993_v34  ;;  %v1962_v39 = vpack.c.bf16 %v757_v37, %v755_v35  ;;  %v1994_v40 = vpack.c.bf16 %v917_v38, %v915_v36 }
 0x133   :  { %1762 = vst [vmem:[%s2430_s2 + $0xa8] sm:$0xff] %v1962_v39  ;;  %1794 = vst [vmem:[%s2430_s2 + $0x1a8] sm:$0xff] %v1994_v40 }
 0x135   :  { %v761_v41 = vpop.f32.mrb[44].mxu0  ;;  %v921_v42 = vpop.f32.mrb[44].mxu1 }
 0x136   :  { %v763_v43 = vpop.f32.mrb[45].mxu0  ;;  %v923_v44 = vpop.f32.mrb[45].mxu1 }
 0x137   :  { %v1963_v45 = vpack.c.bf16 %v763_v43, %v761_v41  ;;  %v1995_v46 = vpack.c.bf16 %v923_v44, %v921_v42  ;;  %v765_v47 = vpop.f32.mrb[46].mxu0  ;;  %v925_v48 = vpop.f32.mrb[46].mxu1 }
 0x138   :  { %v767_v49 = vpop.f32.mrb[47].mxu0  ;;  %v927_v50 = vpop.f32.mrb[47].mxu1 }
 0x139   :  { %1763 = vst [vmem:[%s2430_s2 + $0xb0] sm:$0xff] %v1963_v45  ;;  %1795 = vst [vmem:[%s2430_s2 + $0x1b0] sm:$0xff] %v1995_v46  ;;  %v1964_v51 = vpack.c.bf16 %v767_v49, %v765_v47  ;;  %v1996_v52 = vpack.c.bf16 %v927_v50, %v925_v48 }
 0x13b   :  { %1764 = vst [vmem:[%s2430_s2 + $0xb8] sm:$0xff] %v1964_v51  ;;  %1796 = vst [vmem:[%s2430_s2 + $0x1b8] sm:$0xff] %v1996_v52 }
 0x13d   :  { %v771_v53 = vpop.f32.mrb[48].mxu0  ;;  %v931_v54 = vpop.f32.mrb[48].mxu1 }
 0x13e   :  { %v773_v55 = vpop.f32.mrb[49].mxu0  ;;  %v933_v56 = vpop.f32.mrb[49].mxu1 }
 0x13f   :  { %v1965_v57 = vpack.c.bf16 %v773_v55, %v771_v53  ;;  %v1997_v58 = vpack.c.bf16 %v933_v56, %v931_v54  ;;  %v775_v59 = vpop.f32.mrb[50].mxu0  ;;  %v935_v60 = vpop.f32.mrb[50].mxu1 }
 0x140   :  { %v777_v61 = vpop.f32.mrb[51].mxu0  ;;  %v937_v62 = vpop.f32.mrb[51].mxu1 }
 0x141   :  { %1765 = vst [vmem:[%s2430_s2 + $0xc0] sm:$0xff] %v1965_v57  ;;  %1797 = vst [vmem:[%s2430_s2 + $0x1c0] sm:$0xff] %v1997_v58  ;;  %v1966_v63 = vpack.c.bf16 %v777_v61, %v775_v59  ;;  %v1998_v0 = vpack.c.bf16 %v937_v62, %v935_v60 }
 0x143   :  { %1766 = vst [vmem:[%s2430_s2 + $0xc8] sm:$0xff] %v1966_v63  ;;  %1798 = vst [vmem:[%s2430_s2 + $0x1c8] sm:$0xff] %v1998_v0 }
 0x145   :  { %v781_v1 = vpop.f32.mrb[52].mxu0  ;;  %v941_v2 = vpop.f32.mrb[52].mxu1 }
 0x146   :  { %v783_v3 = vpop.f32.mrb[53].mxu0  ;;  %v943_v4 = vpop.f32.mrb[53].mxu1 }
 0x147   :  { %v1967_v5 = vpack.c.bf16 %v783_v3, %v781_v1  ;;  %v1999_v6 = vpack.c.bf16 %v943_v4, %v941_v2  ;;  %v785_v7 = vpop.f32.mrb[54].mxu0  ;;  %v945_v8 = vpop.f32.mrb[54].mxu1 }
 0x148   :  { %v787_v9 = vpop.f32.mrb[55].mxu0  ;;  %v947_v10 = vpop.f32.mrb[55].mxu1 }
 0x149   :  { %1767 = vst [vmem:[%s2430_s2 + $0xd0] sm:$0xff] %v1967_v5  ;;  %1799 = vst [vmem:[%s2430_s2 + $0x1d0] sm:$0xff] %v1999_v6  ;;  %v1968_v11 = vpack.c.bf16 %v787_v9, %v785_v7  ;;  %v2000_v12 = vpack.c.bf16 %v947_v10, %v945_v8 }
 0x14b   :  { %1768 = vst [vmem:[%s2430_s2 + $0xd8] sm:$0xff] %v1968_v11  ;;  %1800 = vst [vmem:[%s2430_s2 + $0x1d8] sm:$0xff] %v2000_v12 }
 0x14d   :  { %v791_v13 = vpop.f32.mrb[56].mxu0  ;;  %v951_v14 = vpop.f32.mrb[56].mxu1 }
 0x14e   :  { %v793_v15 = vpop.f32.mrb[57].mxu0  ;;  %v953_v16 = vpop.f32.mrb[57].mxu1 }
 0x14f   :  { %v1969_v17 = vpack.c.bf16 %v793_v15, %v791_v13  ;;  %v2001_v18 = vpack.c.bf16 %v953_v16, %v951_v14  ;;  %v795_v19 = vpop.f32.mrb[58].mxu0  ;;  %v955_v20 = vpop.f32.mrb[58].mxu1 }
 0x150   :  { %v797_v21 = vpop.f32.mrb[59].mxu0  ;;  %v957_v22 = vpop.f32.mrb[59].mxu1 }
 0x151   :  { %1769 = vst [vmem:[%s2430_s2 + $0xe0] sm:$0xff] %v1969_v17  ;;  %1801 = vst [vmem:[%s2430_s2 + $0x1e0] sm:$0xff] %v2001_v18  ;;  %v1970_v23 = vpack.c.bf16 %v797_v21, %v795_v19  ;;  %v2002_v24 = vpack.c.bf16 %v957_v22, %v955_v20 }
 0x153   :  { %1770 = vst [vmem:[%s2430_s2 + $0xe8] sm:$0xff] %v1970_v23  ;;  %1802 = vst [vmem:[%s2430_s2 + $0x1e8] sm:$0xff] %v2002_v24 }
 0x155   :  { %v801_v25 = vpop.f32.mrb[60].mxu0  ;;  %v961_v26 = vpop.f32.mrb[60].mxu1 }
 0x156   :  { %v803_v27 = vpop.f32.mrb[61].mxu0  ;;  %v963_v28 = vpop.f32.mrb[61].mxu1 }
 0x157   :  { %v1971_v29 = vpack.c.bf16 %v803_v27, %v801_v25  ;;  %v2003_v30 = vpack.c.bf16 %v963_v28, %v961_v26  ;;  %v805_v31 = vpop.f32.mrb[62].mxu0  ;;  %v965_v32 = vpop.f32.mrb[62].mxu1 }
 0x158   :  { %v807_v33 = vpop.f32.mrb[63].mxu0  ;;  %v967_v34 = vpop.f32.mrb[63].mxu1 }
 0x159   :  { %1771 = vst [vmem:[%s2430_s2 + $0xf0] sm:$0xff] %v1971_v29  ;;  %1803 = vst [vmem:[%s2430_s2 + $0x1f0] sm:$0xff] %v2003_v30  ;;  %v1972_v35 = vpack.c.bf16 %v807_v33, %v805_v31  ;;  %v2004_v36 = vpack.c.bf16 %v967_v34, %v965_v32 }
 0x15b   :  { %1772 = vst [vmem:[%s2430_s2 + $0xf8] sm:$0xff] %v1972_v35  ;;  %1804 = vst [vmem:[%s2430_s2 + $0x1f8] sm:$0xff] %v2004_v36 }

// kernel: generator_forward_pallas.18
= control target key start
LH: loop header
LB: loop body
LE: loop exit
PB: predicated region body
PF: predicated region fallthrough
CT: control target
= control target key end

     0   :  { %s1221_s12 = smov 0   ;;  %s1547_s0 = inlined_call_operand.vmem [shape: bf16[2048,16], index: 0, kind: input, shape index: {}]   ;;  %s1548_s1 = inlined_call_operand.vmem [shape: f32[1,16], index: 1, kind: input, shape index: {}]   ;;  %s1549_s2 = inlined_call_operand.vmem [shape: f32[1,16], index: 2, kind: input, shape index: {}]   ;;  %s1550_s3 = inlined_call_operand.vmem [shape: bf16[2048,16], index: 3, kind: output, shape index: {}]  }
   0x1 LB: > { %s885_s13 = sadd.s32 4294967295, %s1199_s12   ;;  %p889_p0 = scmp.ge.s32.totalorder %s1199_s12, 1  ;;  %s1199_s12 = sphi %s1221_s12, %s13_s12  }
   0x2   : > { %p138_p1 = scmp.lt.s32.totalorder %s1199_s12, 5 }
   0x4   : > { %p139_p2 = pnand %p889_p0, %p138_p1 }
   0x5   : > { %s890_s14 = sshll.u32 (!%p139_p2), %s885_s13, 6  ;;  %v1242_v0 = vld [vmem:[%s1548_s1] ss:$0 sm:$0xff] (!%p139_p2)  ;;  %vm764_vm0 = vcmask (!%p139_p2), 125952  }
   0x6   : > { %142 = sbr.rel (%p139_p2) target bundleno = 101 (0x65), region = 32  ;;  %p163_p3 = scmp.lt.s32.totalorder (!%p139_p2), %s890_s14, 255  ;;  %v1251_v9 = vld [vmem:[%s1549_s2] ss:$0 sm:$0xff] (!%p139_p2) }
   0xd   : > { %s1552_s14 = smov (!%p163_p3, %s890_s14), 255 }
   0xe   : > { %s891_s15 = sshll.u32 %s1552_s14, 2 }
   0xf   : > { %s1237_s18 = scalar_lea.vmem %s1547_s0, %s891_s15  ;;  %s1274_s25 = scalar_lea.vmem %s1550_s3, %s891_s15 }
  0x10   : > { %v1027_v1 = vld [vmem:[%s1237_s18] sm:$0xff]   ;;  %v1154_v2 = vld [vmem:[%s1237_s18 + $0x8] sm:$0xff]   ;;  %v1155_v3 = vld [vmem:[%s1237_s18 + $0x10] sm:$0xff]  }
  0x11   : > { %v1028_v4 = vunpack.c.l.bf16 %v1027_v1  ;;  %v1029_v5 = vunpack.c.h.bf16 %v1027_v1  ;;  %v1032_v6 = vunpack.c.l.bf16 %v1154_v2  ;;  %v1033_v7 = vunpack.c.h.bf16 %v1154_v2  ;;  %v1156_v8 = vld [vmem:[%s1237_s18 + $0x18] sm:$0xff]   ;;  %v1157_v38 = vld [vmem:[%s1237_s18 + $0x20] sm:$0xff]   ;;  %v1158_v39 = vld [vmem:[%s1237_s18 + $0x28] sm:$0xff]  }
  0x12   : > { %v1036_v10 = vunpack.c.l.bf16 %v1155_v3  ;;  %v1037_v11 = vunpack.c.h.bf16 %v1155_v3  ;;  %v1040_v12 = vunpack.c.l.bf16 %v1156_v8  ;;  %v1041_v13 = vunpack.c.h.bf16 %v1156_v8  ;;  %v1159_v44 = vld [vmem:[%s1237_s18 + $0x30] sm:$0xff]   ;;  %v1160_v45 = vld [vmem:[%s1237_s18 + $0x38] sm:$0xff]  }
  0x13   : > { %v309_v14 = vmul.f32 %v1028_v4, %v1242_v0  ;;  %v310_v15 = vmul.f32 %v1029_v5, %v1242_v0  ;;  %v311_v16 = vmul.f32 %v1032_v6, %v1242_v0  ;;  %v312_v17 = vmul.f32 %v1033_v7, %v1242_v0 }
  0x14   : > { %v313_v18 = vmul.f32 %v1036_v10, %v1242_v0  ;;  %v314_v19 = vmul.f32 %v1037_v11, %v1242_v0  ;;  %v315_v20 = vmul.f32 %v1040_v12, %v1242_v0  ;;  %v316_v21 = vmul.f32 %v1041_v13, %v1242_v0 }
  0x15   : > { %v380_v22 = vadd.f32 %v1251_v9, %v309_v14  ;;  %v381_v23 = vadd.f32 %v1251_v9, %v310_v15  ;;  %v382_v24 = vadd.f32 %v1251_v9, %v311_v16  ;;  %v383_v25 = vadd.f32 %v1251_v9, %v312_v17 }
  0x16   : > { %v384_v26 = vadd.f32 %v1251_v9, %v313_v18  ;;  %v385_v27 = vadd.f32 %v1251_v9, %v314_v19  ;;  %v386_v28 = vadd.f32 %v1251_v9, %v315_v20  ;;  %v387_v29 = vadd.f32 %v1251_v9, %v316_v21  ;;  %v1161_v20 = vld [vmem:[%s1237_s18 + $0x40] sm:$0xff]   ;;  %v1162_v21 = vld [vmem:[%s1237_s18 + $0x48] sm:$0xff]  }
  0x17   : > { %v444_v30 = vmax.f32 %v380_v22, 0.0  ;;  %v445_v31 = vmax.f32 %v381_v23, 0.0  ;;  %v446_v32 = vmax.f32 %v382_v24, 0.0  ;;  %v447_v33 = vmax.f32 %v383_v25, 0.0 }
  0x18   : > { %v448_v34 = vmax.f32 %v384_v26, 0.0  ;;  %v449_v35 = vmax.f32 %v385_v27, 0.0  ;;  %v450_v36 = vmax.f32 %v386_v28, 0.0  ;;  %v451_v37 = vmax.f32 %v387_v29, 0.0  ;;  %v1163_v26 = vld [vmem:[%s1237_s18 + $0x50] sm:$0xff]   ;;  %v1164_v27 = vld [vmem:[%s1237_s18 + $0x58] sm:$0xff]  }
  0x19   : > { %v962_v40 = vpack.c.bf16 %v444_v30, %v444_v30  ;;  %v963_v41 = vpack.c.bf16 %v445_v31, %v445_v31  ;;  %v964_v42 = vpack.c.bf16 %v446_v32, %v446_v32  ;;  %v965_v43 = vpack.c.bf16 %v447_v33, %v447_v33 }
  0x1a   : > { %v966_v46 = vpack.c.bf16 %v448_v34, %v448_v34  ;;  %v967_v47 = vpack.c.bf16 %v449_v35, %v449_v35  ;;  %v968_v48 = vpack.c.bf16 %v450_v36, %v450_v36  ;;  %v969_v49 = vpack.c.bf16 %v451_v37, %v451_v37 }
  0x1b   : > { %765 = vst.msk [vmem:[%s1274_s25] sm:$0xf] %vm764_vm0, %v962_v40  ;;  %766 = vst.msk [vmem:[%s1274_s25 + $0x4] sm:$0xf] %vm764_vm0, %v963_v41  ;;  %v1044_v50 = vunpack.c.l.bf16 %v1157_v38  ;;  %v1045_v51 = vunpack.c.h.bf16 %v1157_v38  ;;  %v1048_v52 = vunpack.c.l.bf16 %v1158_v39  ;;  %v1049_v53 = vunpack.c.h.bf16 %v1158_v39 }
  0x1c   : > { %767 = vst.msk [vmem:[%s1274_s25 + $0x8] sm:$0xf] %vm764_vm0, %v964_v42  ;;  %768 = vst.msk [vmem:[%s1274_s25 + $0xc] sm:$0xf] %vm764_vm0, %v965_v43  ;;  %v1052_v54 = vunpack.c.l.bf16 %v1159_v44  ;;  %v1053_v55 = vunpack.c.h.bf16 %v1159_v44  ;;  %v1056_v56 = vunpack.c.l.bf16 %v1160_v45  ;;  %v1057_v57 = vunpack.c.h.bf16 %v1160_v45 }
  0x1d   : > { %769 = vst.msk [vmem:[%s1274_s25 + $0x10] sm:$0xf] %vm764_vm0, %v966_v46  ;;  %770 = vst.msk [vmem:[%s1274_s25 + $0x14] sm:$0xf] %vm764_vm0, %v967_v47  ;;  %v317_v58 = vmul.f32 %v1044_v50, %v1242_v0  ;;  %v318_v59 = vmul.f32 %v1045_v51, %v1242_v0  ;;  %v319_v60 = vmul.f32 %v1048_v52, %v1242_v0  ;;  %v1060_v32 = vunpack.c.l.bf16 %v1161_v20 }
  0x1e   : > { %771 = vst.msk [vmem:[%s1274_s25 + $0x18] sm:$0xf] %vm764_vm0, %v968_v48  ;;  %772 = vst.msk [vmem:[%s1274_s25 + $0x1c] sm:$0xf] %vm764_vm0, %v969_v49  ;;  %v320_v61 = vmul.f32 %v1049_v53, %v1242_v0  ;;  %v321_v62 = vmul.f32 %v1052_v54, %v1242_v0  ;;  %v322_v63 = vmul.f32 %v1053_v55, %v1242_v0  ;;  %v1061_v33 = vunpack.c.h.bf16 %v1161_v20 }
  0x1f   : > { %v323_v1 = vmul.f32 %v1056_v56, %v1242_v0  ;;  %v324_v2 = vmul.f32 %v1057_v57, %v1242_v0  ;;  %v388_v3 = vadd.f32 %v1251_v9, %v317_v58  ;;  %v389_v4 = vadd.f32 %v1251_v9, %v318_v59 }
  0x20   : > { %v390_v5 = vadd.f32 %v1251_v9, %v319_v60  ;;  %v391_v6 = vadd.f32 %v1251_v9, %v320_v61  ;;  %v392_v7 = vadd.f32 %v1251_v9, %v321_v62  ;;  %v393_v8 = vadd.f32 %v1251_v9, %v322_v63 }
  0x21   : > { %v394_v10 = vadd.f32 %v1251_v9, %v323_v1  ;;  %v395_v11 = vadd.f32 %v1251_v9, %v324_v2  ;;  %v452_v12 = vmax.f32 %v388_v3, 0.0  ;;  %v453_v13 = vmax.f32 %v389_v4, 0.0  ;;  %v1165_v1 = vld [vmem:[%s1237_s18 + $0x60] sm:$0xff]   ;;  %v1166_v2 = vld [vmem:[%s1237_s18 + $0x68] sm:$0xff]  }
  0x22   : > { %v454_v14 = vmax.f32 %v390_v5, 0.0  ;;  %v455_v15 = vmax.f32 %v391_v6, 0.0  ;;  %v456_v16 = vmax.f32 %v392_v7, 0.0  ;;  %v457_v17 = vmax.f32 %v393_v8, 0.0  ;;  %v1167_v7 = vld [vmem:[%s1237_s18 + $0x70] sm:$0xff]   ;;  %v1168_v8 = vld [vmem:[%s1237_s18 + $0x78] sm:$0xff]  }
  0x23   : > { %v458_v18 = vmax.f32 %v394_v10, 0.0  ;;  %v459_v19 = vmax.f32 %v395_v11, 0.0  ;;  %v970_v22 = vpack.c.bf16 %v452_v12, %v452_v12  ;;  %v971_v23 = vpack.c.bf16 %v453_v13, %v453_v13 }
  0x24   : > { %v972_v24 = vpack.c.bf16 %v454_v14, %v454_v14  ;;  %v973_v25 = vpack.c.bf16 %v455_v15, %v455_v15  ;;  %v974_v28 = vpack.c.bf16 %v456_v16, %v456_v16  ;;  %v975_v29 = vpack.c.bf16 %v457_v17, %v457_v17 }
  0x25   : > { %v976_v30 = vpack.c.bf16 %v458_v18, %v458_v18  ;;  %v977_v31 = vpack.c.bf16 %v459_v19, %v459_v19  ;;  %773 = vst.msk [vmem:[%s1274_s25 + $0x20] sm:$0xf] %vm764_vm0, %v970_v22  ;;  %774 = vst.msk [vmem:[%s1274_s25 + $0x24] sm:$0xf] %vm764_vm0, %v971_v23  ;;  %v1064_v34 = vunpack.c.l.bf16 %v1162_v21  ;;  %v1065_v35 = vunpack.c.h.bf16 %v1162_v21 }
  0x26   : > { %775 = vst.msk [vmem:[%s1274_s25 + $0x28] sm:$0xf] %vm764_vm0, %v972_v24  ;;  %776 = vst.msk [vmem:[%s1274_s25 + $0x2c] sm:$0xf] %vm764_vm0, %v973_v25  ;;  %v1068_v36 = vunpack.c.l.bf16 %v1163_v26  ;;  %v1069_v37 = vunpack.c.h.bf16 %v1163_v26  ;;  %v1072_v38 = vunpack.c.l.bf16 %v1164_v27  ;;  %v1073_v39 = vunpack.c.h.bf16 %v1164_v27 }
  0x27   : > { %777 = vst.msk [vmem:[%s1274_s25 + $0x30] sm:$0xf] %vm764_vm0, %v974_v28  ;;  %778 = vst.msk [vmem:[%s1274_s25 + $0x34] sm:$0xf] %vm764_vm0, %v975_v29  ;;  %v325_v40 = vmul.f32 %v1060_v32, %v1242_v0  ;;  %v326_v41 = vmul.f32 %v1061_v33, %v1242_v0  ;;  %v327_v42 = vmul.f32 %v1064_v34, %v1242_v0  ;;  %v1076_v14 = vunpack.c.l.bf16 %v1165_v1 }
  0x28   : > { %779 = vst.msk [vmem:[%s1274_s25 + $0x38] sm:$0xf] %vm764_vm0, %v976_v30  ;;  %780 = vst.msk [vmem:[%s1274_s25 + $0x3c] sm:$0xf] %vm764_vm0, %v977_v31  ;;  %v328_v43 = vmul.f32 %v1065_v35, %v1242_v0  ;;  %v329_v44 = vmul.f32 %v1068_v36, %v1242_v0  ;;  %v330_v45 = vmul.f32 %v1069_v37, %v1242_v0  ;;  %v1077_v15 = vunpack.c.h.bf16 %v1165_v1 }
  0x29   : > { %v331_v46 = vmul.f32 %v1072_v38, %v1242_v0  ;;  %v332_v47 = vmul.f32 %v1073_v39, %v1242_v0  ;;  %v396_v48 = vadd.f32 %v1251_v9, %v325_v40  ;;  %v397_v49 = vadd.f32 %v1251_v9, %v326_v41 }
  0x2a   : > { %v398_v50 = vadd.f32 %v1251_v9, %v327_v42  ;;  %v399_v51 = vadd.f32 %v1251_v9, %v328_v43  ;;  %v400_v52 = vadd.f32 %v1251_v9, %v329_v44  ;;  %v401_v53 = vadd.f32 %v1251_v9, %v330_v45 }
  0x2b   : > { %v402_v54 = vadd.f32 %v1251_v9, %v331_v46  ;;  %v403_v55 = vadd.f32 %v1251_v9, %v332_v47  ;;  %v460_v56 = vmax.f32 %v396_v48, 0.0  ;;  %v461_v57 = vmax.f32 %v397_v49, 0.0  ;;  %v1169_v46 = vld [vmem:[%s1237_s18 + $0x80] sm:$0xff]   ;;  %v1170_v47 = vld [vmem:[%s1237_s18 + $0x88] sm:$0xff]  }
  0x2c   : > { %v462_v58 = vmax.f32 %v398_v50, 0.0  ;;  %v463_v59 = vmax.f32 %v399_v51, 0.0  ;;  %v464_v60 = vmax.f32 %v400_v52, 0.0  ;;  %v465_v61 = vmax.f32 %v401_v53, 0.0  ;;  %v1171_v52 = vld [vmem:[%s1237_s18 + $0x90] sm:$0xff]   ;;  %v1172_v53 = vld [vmem:[%s1237_s18 + $0x98] sm:$0xff]  }
  0x2d   : > { %v466_v62 = vmax.f32 %v402_v54, 0.0  ;;  %v467_v63 = vmax.f32 %v403_v55, 0.0  ;;  %v978_v3 = vpack.c.bf16 %v460_v56, %v460_v56  ;;  %v979_v4 = vpack.c.bf16 %v461_v57, %v461_v57 }
  0x2e   : > { %v980_v5 = vpack.c.bf16 %v462_v58, %v462_v58  ;;  %v981_v6 = vpack.c.bf16 %v463_v59, %v463_v59  ;;  %v982_v10 = vpack.c.bf16 %v464_v60, %v464_v60  ;;  %v983_v11 = vpack.c.bf16 %v465_v61, %v465_v61 }
  0x2f   : > { %v984_v12 = vpack.c.bf16 %v466_v62, %v466_v62  ;;  %v985_v13 = vpack.c.bf16 %v467_v63, %v467_v63  ;;  %781 = vst.msk [vmem:[%s1274_s25 + $0x40] sm:$0xf] %vm764_vm0, %v978_v3  ;;  %782 = vst.msk [vmem:[%s1274_s25 + $0x44] sm:$0xf] %vm764_vm0, %v979_v4  ;;  %v1080_v16 = vunpack.c.l.bf16 %v1166_v2  ;;  %v1081_v17 = vunpack.c.h.bf16 %v1166_v2 }
  0x30   : > { %783 = vst.msk [vmem:[%s1274_s25 + $0x48] sm:$0xf] %vm764_vm0, %v980_v5  ;;  %784 = vst.msk [vmem:[%s1274_s25 + $0x4c] sm:$0xf] %vm764_vm0, %v981_v6  ;;  %v1084_v18 = vunpack.c.l.bf16 %v1167_v7  ;;  %v1085_v19 = vunpack.c.h.bf16 %v1167_v7  ;;  %v1088_v20 = vunpack.c.l.bf16 %v1168_v8  ;;  %v1089_v21 = vunpack.c.h.bf16 %v1168_v8 }
  0x31   : > { %785 = vst.msk [vmem:[%s1274_s25 + $0x50] sm:$0xf] %vm764_vm0, %v982_v10  ;;  %786 = vst.msk [vmem:[%s1274_s25 + $0x54] sm:$0xf] %vm764_vm0, %v983_v11  ;;  %v333_v22 = vmul.f32 %v1076_v14, %v1242_v0  ;;  %v334_v23 = vmul.f32 %v1077_v15, %v1242_v0  ;;  %v335_v24 = vmul.f32 %v1080_v16, %v1242_v0  ;;  %v1092_v58 = vunpack.c.l.bf16 %v1169_v46 }
  0x32   : > { %787 = vst.msk [vmem:[%s1274_s25 + $0x58] sm:$0xf] %vm764_vm0, %v984_v12  ;;  %788 = vst.msk [vmem:[%s1274_s25 + $0x5c] sm:$0xf] %vm764_vm0, %v985_v13  ;;  %v336_v25 = vmul.f32 %v1081_v17, %v1242_v0  ;;  %v337_v26 = vmul.f32 %v1084_v18, %v1242_v0  ;;  %v338_v27 = vmul.f32 %v1085_v19, %v1242_v0  ;;  %v1093_v59 = vunpack.c.h.bf16 %v1169_v46 }
  0x33   : > { %v339_v28 = vmul.f32 %v1088_v20, %v1242_v0  ;;  %v340_v29 = vmul.f32 %v1089_v21, %v1242_v0  ;;  %v404_v30 = vadd.f32 %v1251_v9, %v333_v22  ;;  %v405_v31 = vadd.f32 %v1251_v9, %v334_v23 }
  0x34   : > { %v406_v32 = vadd.f32 %v1251_v9, %v335_v24  ;;  %v407_v33 = vadd.f32 %v1251_v9, %v336_v25  ;;  %v408_v34 = vadd.f32 %v1251_v9, %v337_v26  ;;  %v409_v35 = vadd.f32 %v1251_v9, %v338_v27 }
  0x35   : > { %v410_v36 = vadd.f32 %v1251_v9, %v339_v28  ;;  %v411_v37 = vadd.f32 %v1251_v9, %v340_v29  ;;  %v468_v38 = vmax.f32 %v404_v30, 0.0  ;;  %v469_v39 = vmax.f32 %v405_v31, 0.0  ;;  %v1173_v28 = vld [vmem:[%s1237_s18 + $0xa0] sm:$0xff]   ;;  %v1174_v29 = vld [vmem:[%s1237_s18 + $0xa8] sm:$0xff]  }
  0x36   : > { %v470_v40 = vmax.f32 %v406_v32, 0.0  ;;  %v471_v41 = vmax.f32 %v407_v33, 0.0  ;;  %v472_v42 = vmax.f32 %v408_v34, 0.0  ;;  %v473_v43 = vmax.f32 %v409_v35, 0.0  ;;  %v1175_v34 = vld [vmem:[%s1237_s18 + $0xb0] sm:$0xff]   ;;  %v1176_v35 = vld [vmem:[%s1237_s18 + $0xb8] sm:$0xff]  }
  0x37   : > { %v474_v44 = vmax.f32 %v410_v36, 0.0  ;;  %v475_v45 = vmax.f32 %v411_v37, 0.0  ;;  %v986_v48 = vpack.c.bf16 %v468_v38, %v468_v38  ;;  %v987_v49 = vpack.c.bf16 %v469_v39, %v469_v39 }
  0x38   : > { %v988_v50 = vpack.c.bf16 %v470_v40, %v470_v40  ;;  %v989_v51 = vpack.c.bf16 %v471_v41, %v471_v41  ;;  %v990_v54 = vpack.c.bf16 %v472_v42, %v472_v42  ;;  %v991_v55 = vpack.c.bf16 %v473_v43, %v473_v43 }
  0x39   : > { %v992_v56 = vpack.c.bf16 %v474_v44, %v474_v44  ;;  %v993_v57 = vpack.c.bf16 %v475_v45, %v475_v45  ;;  %789 = vst.msk [vmem:[%s1274_s25 + $0x60] sm:$0xf] %vm764_vm0, %v986_v48  ;;  %790 = vst.msk [vmem:[%s1274_s25 + $0x64] sm:$0xf] %vm764_vm0, %v987_v49  ;;  %v1096_v60 = vunpack.c.l.bf16 %v1170_v47  ;;  %v1097_v61 = vunpack.c.h.bf16 %v1170_v47 }
  0x3a   : > { %791 = vst.msk [vmem:[%s1274_s25 + $0x68] sm:$0xf] %vm764_vm0, %v988_v50  ;;  %792 = vst.msk [vmem:[%s1274_s25 + $0x6c] sm:$0xf] %vm764_vm0, %v989_v51  ;;  %v1100_v62 = vunpack.c.l.bf16 %v1171_v52  ;;  %v1101_v63 = vunpack.c.h.bf16 %v1171_v52  ;;  %v1104_v1 = vunpack.c.l.bf16 %v1172_v53  ;;  %v1105_v2 = vunpack.c.h.bf16 %v1172_v53 }
  0x3b   : > { %793 = vst.msk [vmem:[%s1274_s25 + $0x70] sm:$0xf] %vm764_vm0, %v990_v54  ;;  %794 = vst.msk [vmem:[%s1274_s25 + $0x74] sm:$0xf] %vm764_vm0, %v991_v55  ;;  %v341_v3 = vmul.f32 %v1092_v58, %v1242_v0  ;;  %v342_v4 = vmul.f32 %v1093_v59, %v1242_v0  ;;  %v343_v5 = vmul.f32 %v1096_v60, %v1242_v0  ;;  %v1108_v40 = vunpack.c.l.bf16 %v1173_v28 }
  0x3c   : > { %795 = vst.msk [vmem:[%s1274_s25 + $0x78] sm:$0xf] %vm764_vm0, %v992_v56  ;;  %796 = vst.msk [vmem:[%s1274_s25 + $0x7c] sm:$0xf] %vm764_vm0, %v993_v57  ;;  %v344_v6 = vmul.f32 %v1097_v61, %v1242_v0  ;;  %v345_v7 = vmul.f32 %v1100_v62, %v1242_v0  ;;  %v346_v8 = vmul.f32 %v1101_v63, %v1242_v0  ;;  %v1109_v41 = vunpack.c.h.bf16 %v1173_v28 }
  0x3d   : > { %v347_v10 = vmul.f32 %v1104_v1, %v1242_v0  ;;  %v348_v11 = vmul.f32 %v1105_v2, %v1242_v0  ;;  %v412_v12 = vadd.f32 %v1251_v9, %v341_v3  ;;  %v413_v13 = vadd.f32 %v1251_v9, %v342_v4 }
  0x3e   : > { %v414_v14 = vadd.f32 %v1251_v9, %v343_v5  ;;  %v415_v15 = vadd.f32 %v1251_v9, %v344_v6  ;;  %v416_v16 = vadd.f32 %v1251_v9, %v345_v7  ;;  %v417_v17 = vadd.f32 %v1251_v9, %v346_v8 }
  0x3f   : > { %v418_v18 = vadd.f32 %v1251_v9, %v347_v10  ;;  %v419_v19 = vadd.f32 %v1251_v9, %v348_v11  ;;  %v476_v20 = vmax.f32 %v412_v12, 0.0  ;;  %v477_v21 = vmax.f32 %v413_v13, 0.0  ;;  %v1177_v10 = vld [vmem:[%s1237_s18 + $0xc0] sm:$0xff]   ;;  %v1178_v11 = vld [vmem:[%s1237_s18 + $0xc8] sm:$0xff]  }
  0x40   : > { %v478_v22 = vmax.f32 %v414_v14, 0.0  ;;  %v479_v23 = vmax.f32 %v415_v15, 0.0  ;;  %v480_v24 = vmax.f32 %v416_v16, 0.0  ;;  %v481_v25 = vmax.f32 %v417_v17, 0.0  ;;  %v1179_v16 = vld [vmem:[%s1237_s18 + $0xd0] sm:$0xff]   ;;  %v1180_v17 = vld [vmem:[%s1237_s18 + $0xd8] sm:$0xff]  }
  0x41   : > { %v482_v26 = vmax.f32 %v418_v18, 0.0  ;;  %v483_v27 = vmax.f32 %v419_v19, 0.0  ;;  %v994_v30 = vpack.c.bf16 %v476_v20, %v476_v20  ;;  %v995_v31 = vpack.c.bf16 %v477_v21, %v477_v21 }
  0x42   : > { %v996_v32 = vpack.c.bf16 %v478_v22, %v478_v22  ;;  %v997_v33 = vpack.c.bf16 %v479_v23, %v479_v23  ;;  %v998_v36 = vpack.c.bf16 %v480_v24, %v480_v24  ;;  %v999_v37 = vpack.c.bf16 %v481_v25, %v481_v25 }
  0x43   : > { %v1000_v38 = vpack.c.bf16 %v482_v26, %v482_v26  ;;  %v1001_v39 = vpack.c.bf16 %v483_v27, %v483_v27  ;;  %797 = vst.msk [vmem:[%s1274_s25 + $0x80] sm:$0xf] %vm764_vm0, %v994_v30  ;;  %798 = vst.msk [vmem:[%s1274_s25 + $0x84] sm:$0xf] %vm764_vm0, %v995_v31  ;;  %v1112_v42 = vunpack.c.l.bf16 %v1174_v29  ;;  %v1113_v43 = vunpack.c.h.bf16 %v1174_v29 }
  0x44   : > { %799 = vst.msk [vmem:[%s1274_s25 + $0x88] sm:$0xf] %vm764_vm0, %v996_v32  ;;  %800 = vst.msk [vmem:[%s1274_s25 + $0x8c] sm:$0xf] %vm764_vm0, %v997_v33  ;;  %v1116_v44 = vunpack.c.l.bf16 %v1175_v34  ;;  %v1117_v45 = vunpack.c.h.bf16 %v1175_v34  ;;  %v1120_v46 = vunpack.c.l.bf16 %v1176_v35  ;;  %v1121_v47 = vunpack.c.h.bf16 %v1176_v35 }
  0x45   : > { %801 = vst.msk [vmem:[%s1274_s25 + $0x90] sm:$0xf] %vm764_vm0, %v998_v36  ;;  %802 = vst.msk [vmem:[%s1274_s25 + $0x94] sm:$0xf] %vm764_vm0, %v999_v37  ;;  %v349_v48 = vmul.f32 %v1108_v40, %v1242_v0  ;;  %v350_v49 = vmul.f32 %v1109_v41, %v1242_v0  ;;  %v351_v50 = vmul.f32 %v1112_v42, %v1242_v0  ;;  %v1124_v22 = vunpack.c.l.bf16 %v1177_v10 }
  0x46   : > { %803 = vst.msk [vmem:[%s1274_s25 + $0x98] sm:$0xf] %vm764_vm0, %v1000_v38  ;;  %804 = vst.msk [vmem:[%s1274_s25 + $0x9c] sm:$0xf] %vm764_vm0, %v1001_v39  ;;  %v352_v51 = vmul.f32 %v1113_v43, %v1242_v0  ;;  %v353_v52 = vmul.f32 %v1116_v44, %v1242_v0  ;;  %v354_v53 = vmul.f32 %v1117_v45, %v1242_v0  ;;  %v1125_v23 = vunpack.c.h.bf16 %v1177_v10 }
  0x47   : > { %v355_v54 = vmul.f32 %v1120_v46, %v1242_v0  ;;  %v356_v55 = vmul.f32 %v1121_v47, %v1242_v0  ;;  %v420_v56 = vadd.f32 %v1251_v9, %v349_v48  ;;  %v421_v57 = vadd.f32 %v1251_v9, %v350_v49 }
  0x48   : > { %v422_v58 = vadd.f32 %v1251_v9, %v351_v50  ;;  %v423_v59 = vadd.f32 %v1251_v9, %v352_v51  ;;  %v424_v60 = vadd.f32 %v1251_v9, %v353_v52  ;;  %v425_v61 = vadd.f32 %v1251_v9, %v354_v53 }
  0x49   : > { %v426_v62 = vadd.f32 %v1251_v9, %v355_v54  ;;  %v427_v63 = vadd.f32 %v1251_v9, %v356_v55  ;;  %v484_v1 = vmax.f32 %v420_v56, 0.0  ;;  %v485_v2 = vmax.f32 %v421_v57, 0.0  ;;  %v1181_v54 = vld [vmem:[%s1237_s18 + $0xe0] sm:$0xff]   ;;  %v1182_v55 = vld [vmem:[%s1237_s18 + $0xe8] sm:$0xff]  }
  0x4a   : > { %v486_v3 = vmax.f32 %v422_v58, 0.0  ;;  %v487_v4 = vmax.f32 %v423_v59, 0.0  ;;  %v488_v5 = vmax.f32 %v424_v60, 0.0  ;;  %v489_v6 = vmax.f32 %v425_v61, 0.0  ;;  %v1183_v60 = vld [vmem:[%s1237_s18 + $0xf0] sm:$0xff]   ;;  %v1184_v61 = vld [vmem:[%s1237_s18 + $0xf8] sm:$0xff]  }
  0x4b   : > { %v490_v7 = vmax.f32 %v426_v62, 0.0  ;;  %v491_v8 = vmax.f32 %v427_v63, 0.0  ;;  %v1002_v12 = vpack.c.bf16 %v484_v1, %v484_v1  ;;  %v1003_v13 = vpack.c.bf16 %v485_v2, %v485_v2 }
  0x4c   : > { %v1004_v14 = vpack.c.bf16 %v486_v3, %v486_v3  ;;  %v1005_v15 = vpack.c.bf16 %v487_v4, %v487_v4  ;;  %v1006_v18 = vpack.c.bf16 %v488_v5, %v488_v5  ;;  %v1007_v19 = vpack.c.bf16 %v489_v6, %v489_v6 }
  0x4d   : > { %v1008_v20 = vpack.c.bf16 %v490_v7, %v490_v7  ;;  %v1009_v21 = vpack.c.bf16 %v491_v8, %v491_v8  ;;  %805 = vst.msk [vmem:[%s1274_s25 + $0xa0] sm:$0xf] %vm764_vm0, %v1002_v12  ;;  %806 = vst.msk [vmem:[%s1274_s25 + $0xa4] sm:$0xf] %vm764_vm0, %v1003_v13  ;;  %v1128_v24 = vunpack.c.l.bf16 %v1178_v11  ;;  %v1129_v25 = vunpack.c.h.bf16 %v1178_v11 }
  0x4e   : > { %807 = vst.msk [vmem:[%s1274_s25 + $0xa8] sm:$0xf] %vm764_vm0, %v1004_v14  ;;  %808 = vst.msk [vmem:[%s1274_s25 + $0xac] sm:$0xf] %vm764_vm0, %v1005_v15  ;;  %v1132_v26 = vunpack.c.l.bf16 %v1179_v16  ;;  %v1133_v27 = vunpack.c.h.bf16 %v1179_v16  ;;  %v1136_v28 = vunpack.c.l.bf16 %v1180_v17  ;;  %v1137_v29 = vunpack.c.h.bf16 %v1180_v17 }
  0x4f   : > { %809 = vst.msk [vmem:[%s1274_s25 + $0xb0] sm:$0xf] %vm764_vm0, %v1006_v18  ;;  %810 = vst.msk [vmem:[%s1274_s25 + $0xb4] sm:$0xf] %vm764_vm0, %v1007_v19  ;;  %v357_v30 = vmul.f32 %v1124_v22, %v1242_v0  ;;  %v358_v31 = vmul.f32 %v1125_v23, %v1242_v0  ;;  %v359_v32 = vmul.f32 %v1128_v24, %v1242_v0  ;;  %v1140_v3 = vunpack.c.l.bf16 %v1181_v54 }
  0x50   : > { %811 = vst.msk [vmem:[%s1274_s25 + $0xb8] sm:$0xf] %vm764_vm0, %v1008_v20  ;;  %812 = vst.msk [vmem:[%s1274_s25 + $0xbc] sm:$0xf] %vm764_vm0, %v1009_v21  ;;  %v360_v33 = vmul.f32 %v1129_v25, %v1242_v0  ;;  %v361_v34 = vmul.f32 %v1132_v26, %v1242_v0  ;;  %v362_v35 = vmul.f32 %v1133_v27, %v1242_v0  ;;  %v1141_v4 = vunpack.c.h.bf16 %v1181_v54 }
  0x51   : > { %v363_v36 = vmul.f32 %v1136_v28, %v1242_v0  ;;  %v364_v37 = vmul.f32 %v1137_v29, %v1242_v0  ;;  %v428_v38 = vadd.f32 %v1251_v9, %v357_v30  ;;  %v429_v39 = vadd.f32 %v1251_v9, %v358_v31 }
  0x52   : > { %v430_v40 = vadd.f32 %v1251_v9, %v359_v32  ;;  %v431_v41 = vadd.f32 %v1251_v9, %v360_v33  ;;  %v432_v42 = vadd.f32 %v1251_v9, %v361_v34  ;;  %v433_v43 = vadd.f32 %v1251_v9, %v362_v35 }
  0x53   : > { %v434_v44 = vadd.f32 %v1251_v9, %v363_v36  ;;  %v435_v45 = vadd.f32 %v1251_v9, %v364_v37  ;;  %v492_v46 = vmax.f32 %v428_v38, 0.0  ;;  %v493_v47 = vmax.f32 %v429_v39, 0.0 }
  0x54   : > { %v494_v48 = vmax.f32 %v430_v40, 0.0  ;;  %v495_v49 = vmax.f32 %v431_v41, 0.0  ;;  %v496_v50 = vmax.f32 %v432_v42, 0.0  ;;  %v497_v51 = vmax.f32 %v433_v43, 0.0 }
  0x55   : > { %v498_v52 = vmax.f32 %v434_v44, 0.0  ;;  %v499_v53 = vmax.f32 %v435_v45, 0.0  ;;  %v1010_v56 = vpack.c.bf16 %v492_v46, %v492_v46  ;;  %v1011_v57 = vpack.c.bf16 %v493_v47, %v493_v47 }
  0x56   : > { %v1012_v58 = vpack.c.bf16 %v494_v48, %v494_v48  ;;  %v1013_v59 = vpack.c.bf16 %v495_v49, %v495_v49  ;;  %v1014_v62 = vpack.c.bf16 %v496_v50, %v496_v50  ;;  %v1015_v63 = vpack.c.bf16 %v497_v51, %v497_v51 }
  0x57   : > { %v1016_v1 = vpack.c.bf16 %v498_v52, %v498_v52  ;;  %v1017_v2 = vpack.c.bf16 %v499_v53, %v499_v53  ;;  %813 = vst.msk [vmem:[%s1274_s25 + $0xc0] sm:$0xf] %vm764_vm0, %v1010_v56  ;;  %814 = vst.msk [vmem:[%s1274_s25 + $0xc4] sm:$0xf] %vm764_vm0, %v1011_v57  ;;  %v1144_v5 = vunpack.c.l.bf16 %v1182_v55  ;;  %v1145_v6 = vunpack.c.h.bf16 %v1182_v55 }
  0x58   : > { %815 = vst.msk [vmem:[%s1274_s25 + $0xc8] sm:$0xf] %vm764_vm0, %v1012_v58  ;;  %816 = vst.msk [vmem:[%s1274_s25 + $0xcc] sm:$0xf] %vm764_vm0, %v1013_v59  ;;  %v1148_v7 = vunpack.c.l.bf16 %v1183_v60  ;;  %v1149_v8 = vunpack.c.h.bf16 %v1183_v60  ;;  %v1152_v10 = vunpack.c.l.bf16 %v1184_v61  ;;  %v1153_v11 = vunpack.c.h.bf16 %v1184_v61 }
  0x59   : > { %817 = vst.msk [vmem:[%s1274_s25 + $0xd0] sm:$0xf] %vm764_vm0, %v1014_v62  ;;  %818 = vst.msk [vmem:[%s1274_s25 + $0xd4] sm:$0xf] %vm764_vm0, %v1015_v63  ;;  %v365_v12 = vmul.f32 %v1140_v3, %v1242_v0  ;;  %v366_v13 = vmul.f32 %v1141_v4, %v1242_v0  ;;  %v367_v14 = vmul.f32 %v1144_v5, %v1242_v0 }
  0x5a   : > { %819 = vst.msk [vmem:[%s1274_s25 + $0xd8] sm:$0xf] %vm764_vm0, %v1016_v1  ;;  %820 = vst.msk [vmem:[%s1274_s25 + $0xdc] sm:$0xf] %vm764_vm0, %v1017_v2  ;;  %v368_v15 = vmul.f32 %v1145_v6, %v1242_v0  ;;  %v369_v16 = vmul.f32 %v1148_v7, %v1242_v0  ;;  %v370_v17 = vmul.f32 %v1149_v8, %v1242_v0 }
  0x5b   : > { %v371_v18 = vmul.f32 %v1152_v10, %v1242_v0  ;;  %v372_v19 = vmul.f32 %v1153_v11, %v1242_v0  ;;  %v436_v20 = vadd.f32 %v1251_v9, %v365_v12  ;;  %v437_v21 = vadd.f32 %v1251_v9, %v366_v13 }
  0x5c   : > { %v438_v22 = vadd.f32 %v1251_v9, %v367_v14  ;;  %v439_v23 = vadd.f32 %v1251_v9, %v368_v15  ;;  %v440_v24 = vadd.f32 %v1251_v9, %v369_v16  ;;  %v441_v25 = vadd.f32 %v1251_v9, %v370_v17 }
  0x5d   : > { %v442_v26 = vadd.f32 %v1251_v9, %v371_v18  ;;  %v443_v27 = vadd.f32 %v1251_v9, %v372_v19  ;;  %v500_v28 = vmax.f32 %v436_v20, 0.0  ;;  %v501_v29 = vmax.f32 %v437_v21, 0.0 }
  0x5e   : > { %v502_v0 = vmax.f32 %v438_v22, 0.0  ;;  %v503_v30 = vmax.f32 %v439_v23, 0.0  ;;  %v504_v31 = vmax.f32 %v440_v24, 0.0  ;;  %v505_v32 = vmax.f32 %v441_v25, 0.0 }
  0x5f   : > { %v506_v33 = vmax.f32 %v442_v26, 0.0  ;;  %v507_v34 = vmax.f32 %v443_v27, 0.0  ;;  %v1018_v35 = vpack.c.bf16 %v500_v28, %v500_v28  ;;  %v1019_v36 = vpack.c.bf16 %v501_v29, %v501_v29 }
  0x60   : > { %v1020_v37 = vpack.c.bf16 %v502_v0, %v502_v0  ;;  %v1021_v9 = vpack.c.bf16 %v503_v30, %v503_v30  ;;  %v1022_v38 = vpack.c.bf16 %v504_v31, %v504_v31  ;;  %v1023_v39 = vpack.c.bf16 %v505_v32, %v505_v32 }
  0x61   : > { %v1024_v40 = vpack.c.bf16 %v506_v33, %v506_v33  ;;  %v1025_v41 = vpack.c.bf16 %v507_v34, %v507_v34  ;;  %821 = vst.msk [vmem:[%s1274_s25 + $0xe0] sm:$0xf] %vm764_vm0, %v1018_v35  ;;  %822 = vst.msk [vmem:[%s1274_s25 + $0xe4] sm:$0xf] %vm764_vm0, %v1019_v36 }
  0x62   : > { %823 = vst.msk [vmem:[%s1274_s25 + $0xe8] sm:$0xf] %vm764_vm0, %v1020_v37  ;;  %824 = vst.msk [vmem:[%s1274_s25 + $0xec] sm:$0xf] %vm764_vm0, %v1021_v9 }
  0x63   : > { %825 = vst.msk [vmem:[%s1274_s25 + $0xf0] sm:$0xf] %vm764_vm0, %v1022_v38  ;;  %826 = vst.msk [vmem:[%s1274_s25 + $0xf4] sm:$0xf] %vm764_vm0, %v1023_v39 }
  0x64   : > { %827 = vst.msk [vmem:[%s1274_s25 + $0xf8] sm:$0xf] %vm764_vm0, %v1024_v40  ;;  %828 = vst.msk [vmem:[%s1274_s25 + $0xfc] sm:$0xf] %vm764_vm0, %v1025_v41 }
  0x65 PF: > { %s13_s12 = sadd.s32 1, %s1199_s12  }
  0x66   : > { %p10_p4 = scmp.ge.s32.totalorder %s13_s12, 6  }
  0x68   :  { %12 = sbr.rel (!%p10_p4) target bundleno = 1 (0x1), region = 62 }

// kernel: generator_forward_pallas.19
= control target key start
LH: loop header
LB: loop body
LE: loop exit
PB: predicated region body
PF: predicated region fallthrough
CT: control target
= control target key end

     0   :  { %s2176_s9 = smov 0   ;;  %s2178_s10 = smov 0   ;;  %s2319_s0 = inlined_call_operand.vmem [shape: bf16[2048,16], index: 0, kind: input, shape index: {}]   ;;  %s2320_s1 = inlined_call_operand.vmem [shape: bf16[16,128], index: 1, kind: input, shape index: {}]   ;;  %s2321_s2 = inlined_call_operand.vmem [shape: bf16[2048,128], index: 2, kind: output, shape index: {}]  }
   0x1   :  { %s2180_s11 = smov 0  }
   0x2 LB: > { %s31_s12 = sadd.s32 1, %s2155_s10  ;;  %p1588_p0 = scmp.ge.s32.totalorder %s2159_s11, 1  ;;  %s2159_s11 = sphi %s2180_s11, %s12_s11   ;;  %s2155_s10 = sphi %s2178_s10, %s2323_s10   ;;  %s2151_s9 = sphi %s2176_s9, %s2322_s9  }
   0x3   : > { %p33_p1 = scmp.ge.s32.totalorder %s31_s12, 4  ;;  %p155_p2 = scmp.lt.s32.totalorder %s2159_s11, 5 }
   0x5   : > { %s2325_s12 = smov (%p33_p1, %s31_s12), 0  ;;  %p156_p3 = pnand %p1588_p0, %p155_p2 }
   0x6   : > { %v2104_v0 = vld [vmem:[%s2320_s1] sm:$0xff] (!%p156_p3)   ;;  %s1589_s15 = sshll.u32 (!%p156_p3), %s2151_s9, 6  ;;  %vm583_vm0 = vcmask (!%p156_p3), 130048  }
   0x7   : > { %159 = sbr.rel (%p156_p3) target bundleno = 294 (0x126), region = 28  ;;  %p192_p4 = scmp.lt.s32.totalorder (!%p156_p3), %s1589_s15, 255  ;;  %2012 = vmatprep.subr.bf16.mxu0 (!%p156_p3), %v2104_v0  ;;  %2078 = vmatprep.subr.bf16.mxu1 (!%p156_p3), %v2104_v0 }
   0x8   : > { %2013 = vmatpush3.bf16.msra.mxu0 (!%p156_p3), %v2104_v0  ;;  %2079 = vmatpush3.bf16.msra.mxu1 (!%p156_p3), %v2104_v0 }
   0xe   : > { %s2327_s15 = smov (!%p192_p4, %s1589_s15), 255 }
   0xf   : > { %s1590_s16 = sshll.u32 %s2327_s15, 2 }
  0x10   : > { %s2205_s19 = scalar_lea.vmem %s2319_s0, %s1590_s16  ;;  %s2276_s22 = scalar_lea.vmem %s2321_s2, %s1590_s16 }
  0x11   : > { %v2105_v1 = vld [vmem:[%s2205_s19] sm:$0xff]   ;;  %v2107_v3 = vld [vmem:[%s2205_s19 + $0x8] sm:$0xff]   ;;  %v2109_v5 = vld [vmem:[%s2205_s19 + $0x10] sm:$0xff]  }
  0x12   : > { %v2106_v2 = vld [vmem:[%s2205_s19 + $0x80] sm:$0xff]   ;;  %2014 = vmatprep.mubr.msk.bf16.mxu0 %vm583_vm0, %v2105_v1  ;;  %v2108_v4 = vld [vmem:[%s2205_s19 + $0x88] sm:$0xff]   ;;  %v2110_v6 = vld [vmem:[%s2205_s19 + $0x90] sm:$0xff]  }
  0x13   : > { %2046 = vmatprep.mubr.msk.bf16.mxu1 %vm583_vm0, %v2106_v2  ;;  %2015 = vmatmul.mubr.msk.bf16.vlgmr.msra.gmra.mrb[0].mxu0 %vm583_vm0, %v2107_v3  ;;  %v2111_v7 = vld [vmem:[%s2205_s19 + $0x18] sm:$0xff]   ;;  %v2113_v9 = vld [vmem:[%s2205_s19 + $0x20] sm:$0xff]   ;;  %v2115_v11 = vld [vmem:[%s2205_s19 + $0x28] sm:$0xff]  }
  0x14   : > { %2047 = vmatmul.mubr.msk.bf16.vlgmr.msra.gmra.mrb[0].mxu1 %vm583_vm0, %v2108_v4  ;;  %2018 = vmatprep.mubr.msk.bf16.mxu0 %vm583_vm0, %v2109_v5  ;;  %v2112_v8 = vld [vmem:[%s2205_s19 + $0x98] sm:$0xff]   ;;  %v2114_v10 = vld [vmem:[%s2205_s19 + $0xa0] sm:$0xff]   ;;  %v2116_v12 = vld [vmem:[%s2205_s19 + $0xa8] sm:$0xff]  }
  0x15   : > { %2050 = vmatprep.mubr.msk.bf16.mxu1 %vm583_vm0, %v2110_v6  ;;  %v2117_v13 = vld [vmem:[%s2205_s19 + $0x30] sm:$0xff]   ;;  %v2119_v15 = vld [vmem:[%s2205_s19 + $0x38] sm:$0xff]   ;;  %v2121_v17 = vld [vmem:[%s2205_s19 + $0x40] sm:$0xff]  }
  0x16   : > { %v2118_v14 = vld [vmem:[%s2205_s19 + $0xb0] sm:$0xff]   ;;  %v2120_v16 = vld [vmem:[%s2205_s19 + $0xb8] sm:$0xff]   ;;  %v2122_v18 = vld [vmem:[%s2205_s19 + $0xc0] sm:$0xff]  }
  0x17   : > { %v2123_v19 = vld [vmem:[%s2205_s19 + $0x48] sm:$0xff]   ;;  %v2125_v21 = vld [vmem:[%s2205_s19 + $0x50] sm:$0xff]   ;;  %v2127_v23 = vld [vmem:[%s2205_s19 + $0x58] sm:$0xff]  }
  0x18   : > { %v2124_v20 = vld [vmem:[%s2205_s19 + $0xc8] sm:$0xff]   ;;  %v2126_v22 = vld [vmem:[%s2205_s19 + $0xd0] sm:$0xff]   ;;  %v2128_v24 = vld [vmem:[%s2205_s19 + $0xd8] sm:$0xff]  }
  0x19   : > { %v2129_v25 = vld [vmem:[%s2205_s19 + $0x60] sm:$0xff]   ;;  %v2131_v27 = vld [vmem:[%s2205_s19 + $0x68] sm:$0xff]   ;;  %v2133_v29 = vld [vmem:[%s2205_s19 + $0x70] sm:$0xff]  }
  0x1a   : > { %v2130_v26 = vld [vmem:[%s2205_s19 + $0xe0] sm:$0xff]   ;;  %v2132_v28 = vld [vmem:[%s2205_s19 + $0xe8] sm:$0xff]   ;;  %v2134_v30 = vld [vmem:[%s2205_s19 + $0xf0] sm:$0xff]  }
  0x1b   : > { %2019 = vmatmul.mubr.msk.bf16.gmra.mrb[4].mxu0 %vm583_vm0, %v2111_v7  ;;  %v2135_v31 = vld [vmem:[%s2205_s19 + $0x78] sm:$0xff]  }
  0x1c   : > { %2051 = vmatmul.mubr.msk.bf16.gmra.mrb[4].mxu1 %vm583_vm0, %v2112_v8  ;;  %2022 = vmatprep.mubr.msk.bf16.mxu0 %vm583_vm0, %v2113_v9  ;;  %v2136_v32 = vld [vmem:[%s2205_s19 + $0xf8] sm:$0xff]  }
  0x1d   : > { %2054 = vmatprep.mubr.msk.bf16.mxu1 %vm583_vm0, %v2114_v10 }
  0x23   : > { %2023 = vmatmul.mubr.msk.bf16.gmra.mrb[8].mxu0 %vm583_vm0, %v2115_v11 }
  0x24   : > { %2055 = vmatmul.mubr.msk.bf16.gmra.mrb[8].mxu1 %vm583_vm0, %v2116_v12  ;;  %2026 = vmatprep.mubr.msk.bf16.mxu0 %vm583_vm0, %v2117_v13 }
  0x25   : > { %2058 = vmatprep.mubr.msk.bf16.mxu1 %vm583_vm0, %v2118_v14 }
  0x2b   : > { %2027 = vmatmul.mubr.msk.bf16.gmra.mrb[12].mxu0 %vm583_vm0, %v2119_v15 }
  0x2c   : > { %2059 = vmatmul.mubr.msk.bf16.gmra.mrb[12].mxu1 %vm583_vm0, %v2120_v16  ;;  %2030 = vmatprep.mubr.msk.bf16.mxu0 %vm583_vm0, %v2121_v17 }
  0x2d   : > { %2062 = vmatprep.mubr.msk.bf16.mxu1 %vm583_vm0, %v2122_v18 }
  0x33   : > { %2031 = vmatmul.mubr.msk.bf16.gmra.mrb[16].mxu0 %vm583_vm0, %v2123_v19 }
  0x34   : > { %2063 = vmatmul.mubr.msk.bf16.gmra.mrb[16].mxu1 %vm583_vm0, %v2124_v20  ;;  %2034 = vmatprep.mubr.msk.bf16.mxu0 %vm583_vm0, %v2125_v21 }
  0x35   : > { %2066 = vmatprep.mubr.msk.bf16.mxu1 %vm583_vm0, %v2126_v22 }
  0x3b   : > { %2035 = vmatmul.mubr.msk.bf16.gmra.mrb[20].mxu0 %vm583_vm0, %v2127_v23 }
  0x3c   : > { %2067 = vmatmul.mubr.msk.bf16.gmra.mrb[20].mxu1 %vm583_vm0, %v2128_v24  ;;  %2038 = vmatprep.mubr.msk.bf16.mxu0 %vm583_vm0, %v2129_v25 }
  0x3d   : > { %2070 = vmatprep.mubr.msk.bf16.mxu1 %vm583_vm0, %v2130_v26 }
  0x43   : > { %2039 = vmatmul.mubr.msk.bf16.gmra.mrb[24].mxu0 %vm583_vm0, %v2131_v27 }
  0x44   : > { %2071 = vmatmul.mubr.msk.bf16.gmra.mrb[24].mxu1 %vm583_vm0, %v2132_v28  ;;  %2042 = vmatprep.mubr.msk.bf16.mxu0 %vm583_vm0, %v2133_v29 }
  0x45   : > { %2074 = vmatprep.mubr.msk.bf16.mxu1 %vm583_vm0, %v2134_v30 }
  0x4b   : > { %2043 = vmatmul.mubr.msk.bf16.gmra.mrb[28].mxu0 %vm583_vm0, %v2135_v31 }
  0x4c   : > { %2075 = vmatmul.mubr.msk.bf16.gmra.mrb[28].mxu1 %vm583_vm0, %v2136_v32 }
  0xe6   : > { %v2016_v33 = vpop.f32.mrb[0].mxu0 }
  0xe7   : > { %v2048_v34 = vpop.f32.mrb[0].mxu1  ;;  %v714_v35 = vpop.f32.mrb[1].mxu0 }
  0xe8   : > { %v842_v36 = vpop.f32.mrb[1].mxu1  ;;  %v2017_v37 = vpop.f32.mrb[2].mxu0 }
  0xe9   : > { %v1796_v38 = vpack.c.bf16 %v2017_v37, %v2016_v33  ;;  %v2049_v39 = vpop.f32.mrb[2].mxu1  ;;  %v717_v40 = vpop.f32.mrb[3].mxu0 }
  0xea   : > { %v1876_v41 = vpack.c.bf16 %v2049_v39, %v2048_v34  ;;  %v1791_v42 = vpack.c.bf16 %v717_v40, %v714_v35  ;;  %v845_v43 = vpop.f32.mrb[3].mxu1 }
  0xeb   : > { %1948 = vst [vmem:[%s2276_s22 + $0x8] sm:$0xff] %v1796_v38   ;;  %v1871_v44 = vpack.c.bf16 %v845_v43, %v842_v36 }
  0xec   : > { %1964 = vst [vmem:[%s2276_s22 + $0x88] sm:$0xff] %v1876_v41   ;;  %1792 = vst [vmem:[%s2276_s22] sm:$0xff] %v1791_v42  }
  0xed   : > { %1963 = vst [vmem:[%s2276_s22 + $0x80] sm:$0xff] %v1871_v44  }
  0xee   : > { %v2020_v45 = vpop.f32.mrb[4].mxu0 }
  0xef   : > { %v2052_v46 = vpop.f32.mrb[4].mxu1  ;;  %v730_v47 = vpop.f32.mrb[5].mxu0 }
  0xf0   : > { %v858_v48 = vpop.f32.mrb[5].mxu1  ;;  %v2021_v49 = vpop.f32.mrb[6].mxu0 }
  0xf1   : > { %v1806_v50 = vpack.c.bf16 %v2021_v49, %v2020_v45  ;;  %v2053_v51 = vpop.f32.mrb[6].mxu1  ;;  %v733_v52 = vpop.f32.mrb[7].mxu0 }
  0xf2   : > { %v1886_v53 = vpack.c.bf16 %v2053_v51, %v2052_v46  ;;  %v1801_v54 = vpack.c.bf16 %v733_v52, %v730_v47  ;;  %v861_v55 = vpop.f32.mrb[7].mxu1 }
  0xf3   : > { %1950 = vst [vmem:[%s2276_s22 + $0x18] sm:$0xff] %v1806_v50   ;;  %v1881_v56 = vpack.c.bf16 %v861_v55, %v858_v48 }
  0xf4   : > { %1966 = vst [vmem:[%s2276_s22 + $0x98] sm:$0xff] %v1886_v53   ;;  %1949 = vst [vmem:[%s2276_s22 + $0x10] sm:$0xff] %v1801_v54  }
  0xf5   : > { %1965 = vst [vmem:[%s2276_s22 + $0x90] sm:$0xff] %v1881_v56  }
  0xf6   : > { %v2024_v57 = vpop.f32.mrb[8].mxu0 }
  0xf7   : > { %v2056_v58 = vpop.f32.mrb[8].mxu1  ;;  %v746_v59 = vpop.f32.mrb[9].mxu0 }
  0xf8   : > { %v874_v60 = vpop.f32.mrb[9].mxu1  ;;  %v2025_v61 = vpop.f32.mrb[10].mxu0 }
  0xf9   : > { %v1816_v62 = vpack.c.bf16 %v2025_v61, %v2024_v57  ;;  %v2057_v63 = vpop.f32.mrb[10].mxu1  ;;  %v749_v0 = vpop.f32.mrb[11].mxu0 }
  0xfa   : > { %v1896_v1 = vpack.c.bf16 %v2057_v63, %v2056_v58  ;;  %v1811_v2 = vpack.c.bf16 %v749_v0, %v746_v59  ;;  %v877_v3 = vpop.f32.mrb[11].mxu1 }
  0xfb   : > { %1952 = vst [vmem:[%s2276_s22 + $0x28] sm:$0xff] %v1816_v62   ;;  %v1891_v4 = vpack.c.bf16 %v877_v3, %v874_v60 }
  0xfc   : > { %1968 = vst [vmem:[%s2276_s22 + $0xa8] sm:$0xff] %v1896_v1   ;;  %1951 = vst [vmem:[%s2276_s22 + $0x20] sm:$0xff] %v1811_v2  }
  0xfd   : > { %1967 = vst [vmem:[%s2276_s22 + $0xa0] sm:$0xff] %v1891_v4  }
  0xfe   : > { %v2028_v5 = vpop.f32.mrb[12].mxu0 }
  0xff   : > { %v2060_v6 = vpop.f32.mrb[12].mxu1  ;;  %v762_v7 = vpop.f32.mrb[13].mxu0 }
 0x100   : > { %v890_v8 = vpop.f32.mrb[13].mxu1  ;;  %v2029_v9 = vpop.f32.mrb[14].mxu0 }
 0x101   : > { %v1826_v10 = vpack.c.bf16 %v2029_v9, %v2028_v5  ;;  %v2061_v11 = vpop.f32.mrb[14].mxu1  ;;  %v765_v12 = vpop.f32.mrb[15].mxu0 }
 0x102   : > { %v1906_v13 = vpack.c.bf16 %v2061_v11, %v2060_v6  ;;  %v1821_v14 = vpack.c.bf16 %v765_v12, %v762_v7  ;;  %v893_v15 = vpop.f32.mrb[15].mxu1 }
 0x103   : > { %1954 = vst [vmem:[%s2276_s22 + $0x38] sm:$0xff] %v1826_v10   ;;  %v1901_v16 = vpack.c.bf16 %v893_v15, %v890_v8 }
 0x104   : > { %1970 = vst [vmem:[%s2276_s22 + $0xb8] sm:$0xff] %v1906_v13   ;;  %1953 = vst [vmem:[%s2276_s22 + $0x30] sm:$0xff] %v1821_v14  }
 0x105   : > { %1969 = vst [vmem:[%s2276_s22 + $0xb0] sm:$0xff] %v1901_v16  }
 0x106   : > { %v2032_v17 = vpop.f32.mrb[16].mxu0 }
 0x107   : > { %v2064_v18 = vpop.f32.mrb[16].mxu1  ;;  %v778_v19 = vpop.f32.mrb[17].mxu0 }
 0x108   : > { %v906_v20 = vpop.f32.mrb[17].mxu1  ;;  %v2033_v21 = vpop.f32.mrb[18].mxu0 }
 0x109   : > { %v1836_v22 = vpack.c.bf16 %v2033_v21, %v2032_v17  ;;  %v2065_v23 = vpop.f32.mrb[18].mxu1  ;;  %v781_v24 = vpop.f32.mrb[19].mxu0 }
 0x10a   : > { %v1916_v25 = vpack.c.bf16 %v2065_v23, %v2064_v18  ;;  %v1831_v26 = vpack.c.bf16 %v781_v24, %v778_v19  ;;  %v909_v27 = vpop.f32.mrb[19].mxu1 }
 0x10b   : > { %1956 = vst [vmem:[%s2276_s22 + $0x48] sm:$0xff] %v1836_v22   ;;  %v1911_v28 = vpack.c.bf16 %v909_v27, %v906_v20 }
 0x10c   : > { %1972 = vst [vmem:[%s2276_s22 + $0xc8] sm:$0xff] %v1916_v25   ;;  %1955 = vst [vmem:[%s2276_s22 + $0x40] sm:$0xff] %v1831_v26  }
 0x10d   : > { %1971 = vst [vmem:[%s2276_s22 + $0xc0] sm:$0xff] %v1911_v28  }
 0x10e   : > { %v2036_v29 = vpop.f32.mrb[20].mxu0 }
 0x10f   : > { %v2068_v30 = vpop.f32.mrb[20].mxu1  ;;  %v794_v31 = vpop.f32.mrb[21].mxu0 }
 0x110   : > { %v922_v32 = vpop.f32.mrb[21].mxu1  ;;  %v2037_v33 = vpop.f32.mrb[22].mxu0 }
 0x111   : > { %v1846_v34 = vpack.c.bf16 %v2037_v33, %v2036_v29  ;;  %v2069_v35 = vpop.f32.mrb[22].mxu1  ;;  %v797_v36 = vpop.f32.mrb[23].mxu0 }
 0x112   : > { %v1926_v37 = vpack.c.bf16 %v2069_v35, %v2068_v30  ;;  %v1841_v38 = vpack.c.bf16 %v797_v36, %v794_v31  ;;  %v925_v39 = vpop.f32.mrb[23].mxu1 }
 0x113   : > { %1958 = vst [vmem:[%s2276_s22 + $0x58] sm:$0xff] %v1846_v34   ;;  %v1921_v40 = vpack.c.bf16 %v925_v39, %v922_v32 }
 0x114   : > { %1974 = vst [vmem:[%s2276_s22 + $0xd8] sm:$0xff] %v1926_v37   ;;  %1957 = vst [vmem:[%s2276_s22 + $0x50] sm:$0xff] %v1841_v38  }
 0x115   : > { %1973 = vst [vmem:[%s2276_s22 + $0xd0] sm:$0xff] %v1921_v40  }
 0x116   : > { %v2040_v41 = vpop.f32.mrb[24].mxu0 }
 0x117   : > { %v2072_v42 = vpop.f32.mrb[24].mxu1  ;;  %v810_v43 = vpop.f32.mrb[25].mxu0 }
 0x118   : > { %v938_v44 = vpop.f32.mrb[25].mxu1  ;;  %v2041_v45 = vpop.f32.mrb[26].mxu0 }
 0x119   : > { %v1856_v46 = vpack.c.bf16 %v2041_v45, %v2040_v41  ;;  %v2073_v47 = vpop.f32.mrb[26].mxu1  ;;  %v813_v48 = vpop.f32.mrb[27].mxu0 }
 0x11a   : > { %v1936_v49 = vpack.c.bf16 %v2073_v47, %v2072_v42  ;;  %v1851_v50 = vpack.c.bf16 %v813_v48, %v810_v43  ;;  %v941_v51 = vpop.f32.mrb[27].mxu1 }
 0x11b   : > { %1960 = vst [vmem:[%s2276_s22 + $0x68] sm:$0xff] %v1856_v46   ;;  %v1931_v52 = vpack.c.bf16 %v941_v51, %v938_v44 }
 0x11c   : > { %1976 = vst [vmem:[%s2276_s22 + $0xe8] sm:$0xff] %v1936_v49   ;;  %1959 = vst [vmem:[%s2276_s22 + $0x60] sm:$0xff] %v1851_v50  }
 0x11d   : > { %1975 = vst [vmem:[%s2276_s22 + $0xe0] sm:$0xff] %v1931_v52  }
 0x11e   : > { %v2044_v53 = vpop.f32.mrb[28].mxu0 }
 0x11f   : > { %v2076_v54 = vpop.f32.mrb[28].mxu1  ;;  %v826_v55 = vpop.f32.mrb[29].mxu0 }
 0x120   : > { %v954_v56 = vpop.f32.mrb[29].mxu1  ;;  %v2045_v57 = vpop.f32.mrb[30].mxu0 }
 0x121   : > { %v1866_v58 = vpack.c.bf16 %v2045_v57, %v2044_v53  ;;  %v2077_v59 = vpop.f32.mrb[30].mxu1  ;;  %v829_v60 = vpop.f32.mrb[31].mxu0 }
 0x122   : > { %v1946_v61 = vpack.c.bf16 %v2077_v59, %v2076_v54  ;;  %v1861_v62 = vpack.c.bf16 %v829_v60, %v826_v55  ;;  %v957_v63 = vpop.f32.mrb[31].mxu1 }
 0x123   : > { %1962 = vst [vmem:[%s2276_s22 + $0x78] sm:$0xff] %v1866_v58   ;;  %v1941_v0 = vpack.c.bf16 %v957_v63, %v954_v56 }
 0x124   : > { %1978 = vst [vmem:[%s2276_s22 + $0xf8] sm:$0xff] %v1946_v61   ;;  %1961 = vst [vmem:[%s2276_s22 + $0x70] sm:$0xff] %v1861_v62  }
 0x125   : > { %1977 = vst [vmem:[%s2276_s22 + $0xf0] sm:$0xff] %v1941_v0  }
 0x126 PF: > { %s12_s11 = sadd.s32 1, %s2159_s11   ;;  %s2322_s9 = smov %s2155_s10 }
 0x127   : > { %p9_p5 = scmp.ge.s32.totalorder %s12_s11, 6   ;;  %s2323_s10 = smov %s2325_s12 }
 0x129   :  { %11 = sbr.rel (!%p9_p5) target bundleno = 2 (0x2), region = 69 }

// kernel: generator_forward_pallas.20
= control target key start
LH: loop header
LB: loop body
LE: loop exit
PB: predicated region body
PF: predicated region fallthrough
CT: control target
= control target key end

     0   :  { %s1221_s12 = smov 0   ;;  %s1547_s0 = inlined_call_operand.vmem [shape: bf16[8192,8], index: 0, kind: input, shape index: {}]   ;;  %s1548_s1 = inlined_call_operand.vmem [shape: f32[1,8], index: 1, kind: input, shape index: {}]   ;;  %s1549_s2 = inlined_call_operand.vmem [shape: f32[1,8], index: 2, kind: input, shape index: {}]   ;;  %s1550_s3 = inlined_call_operand.vmem [shape: bf16[8192,8], index: 3, kind: output, shape index: {}]  }
   0x1 LB: > { %s885_s13 = sadd.s32 4294967295, %s1199_s12   ;;  %p889_p0 = scmp.ge.s32.totalorder %s1199_s12, 1  ;;  %s1199_s12 = sphi %s1221_s12, %s13_s12  }
   0x2   : > { %p138_p1 = scmp.lt.s32.totalorder %s1199_s12, 17 }
   0x4   : > { %p139_p2 = pnand %p889_p0, %p138_p1 }
   0x5   : > { %s890_s14 = sshll.u32 (!%p139_p2), %s885_s13, 6  ;;  %v1242_v0 = vld [vmem:[%s1548_s1] ss:$0 sm:$0xff] (!%p139_p2)  ;;  %vm764_vm0 = vcmask (!%p139_p2), 60416  }
   0x6   : > { %142 = sbr.rel (%p139_p2) target bundleno = 101 (0x65), region = 32  ;;  %p163_p3 = scmp.lt.s32.totalorder (!%p139_p2), %s890_s14, 1023  ;;  %v1251_v9 = vld [vmem:[%s1549_s2] ss:$0 sm:$0xff] (!%p139_p2) }
   0xd   : > { %s1552_s14 = smov (!%p163_p3, %s890_s14), 1023 }
   0xe   : > { %s891_s15 = sshll.u32 %s1552_s14, 2 }
   0xf   : > { %s1237_s18 = scalar_lea.vmem %s1547_s0, %s891_s15  ;;  %s1274_s25 = scalar_lea.vmem %s1550_s3, %s891_s15 }
  0x10   : > { %v1027_v1 = vld [vmem:[%s1237_s18] sm:$0xff]   ;;  %v1154_v2 = vld [vmem:[%s1237_s18 + $0x8] sm:$0xff]   ;;  %v1155_v3 = vld [vmem:[%s1237_s18 + $0x10] sm:$0xff]  }
  0x11   : > { %v1028_v4 = vunpack.c.l.bf16 %v1027_v1  ;;  %v1029_v5 = vunpack.c.h.bf16 %v1027_v1  ;;  %v1032_v6 = vunpack.c.l.bf16 %v1154_v2  ;;  %v1033_v7 = vunpack.c.h.bf16 %v1154_v2  ;;  %v1156_v8 = vld [vmem:[%s1237_s18 + $0x18] sm:$0xff]   ;;  %v1157_v38 = vld [vmem:[%s1237_s18 + $0x20] sm:$0xff]   ;;  %v1158_v39 = vld [vmem:[%s1237_s18 + $0x28] sm:$0xff]  }
  0x12   : > { %v1036_v10 = vunpack.c.l.bf16 %v1155_v3  ;;  %v1037_v11 = vunpack.c.h.bf16 %v1155_v3  ;;  %v1040_v12 = vunpack.c.l.bf16 %v1156_v8  ;;  %v1041_v13 = vunpack.c.h.bf16 %v1156_v8  ;;  %v1159_v44 = vld [vmem:[%s1237_s18 + $0x30] sm:$0xff]   ;;  %v1160_v45 = vld [vmem:[%s1237_s18 + $0x38] sm:$0xff]  }
  0x13   : > { %v309_v14 = vmul.f32 %v1028_v4, %v1242_v0  ;;  %v310_v15 = vmul.f32 %v1029_v5, %v1242_v0  ;;  %v311_v16 = vmul.f32 %v1032_v6, %v1242_v0  ;;  %v312_v17 = vmul.f32 %v1033_v7, %v1242_v0 }
  0x14   : > { %v313_v18 = vmul.f32 %v1036_v10, %v1242_v0  ;;  %v314_v19 = vmul.f32 %v1037_v11, %v1242_v0  ;;  %v315_v20 = vmul.f32 %v1040_v12, %v1242_v0  ;;  %v316_v21 = vmul.f32 %v1041_v13, %v1242_v0 }
  0x15   : > { %v380_v22 = vadd.f32 %v1251_v9, %v309_v14  ;;  %v381_v23 = vadd.f32 %v1251_v9, %v310_v15  ;;  %v382_v24 = vadd.f32 %v1251_v9, %v311_v16  ;;  %v383_v25 = vadd.f32 %v1251_v9, %v312_v17 }
  0x16   : > { %v384_v26 = vadd.f32 %v1251_v9, %v313_v18  ;;  %v385_v27 = vadd.f32 %v1251_v9, %v314_v19  ;;  %v386_v28 = vadd.f32 %v1251_v9, %v315_v20  ;;  %v387_v29 = vadd.f32 %v1251_v9, %v316_v21  ;;  %v1161_v20 = vld [vmem:[%s1237_s18 + $0x40] sm:$0xff]   ;;  %v1162_v21 = vld [vmem:[%s1237_s18 + $0x48] sm:$0xff]  }
  0x17   : > { %v444_v30 = vmax.f32 %v380_v22, 0.0  ;;  %v445_v31 = vmax.f32 %v381_v23, 0.0  ;;  %v446_v32 = vmax.f32 %v382_v24, 0.0  ;;  %v447_v33 = vmax.f32 %v383_v25, 0.0 }
  0x18   : > { %v448_v34 = vmax.f32 %v384_v26, 0.0  ;;  %v449_v35 = vmax.f32 %v385_v27, 0.0  ;;  %v450_v36 = vmax.f32 %v386_v28, 0.0  ;;  %v451_v37 = vmax.f32 %v387_v29, 0.0  ;;  %v1163_v26 = vld [vmem:[%s1237_s18 + $0x50] sm:$0xff]   ;;  %v1164_v27 = vld [vmem:[%s1237_s18 + $0x58] sm:$0xff]  }
  0x19   : > { %v962_v40 = vpack.c.bf16 %v444_v30, %v444_v30  ;;  %v963_v41 = vpack.c.bf16 %v445_v31, %v445_v31  ;;  %v964_v42 = vpack.c.bf16 %v446_v32, %v446_v32  ;;  %v965_v43 = vpack.c.bf16 %v447_v33, %v447_v33 }
  0x1a   : > { %v966_v46 = vpack.c.bf16 %v448_v34, %v448_v34  ;;  %v967_v47 = vpack.c.bf16 %v449_v35, %v449_v35  ;;  %v968_v48 = vpack.c.bf16 %v450_v36, %v450_v36  ;;  %v969_v49 = vpack.c.bf16 %v451_v37, %v451_v37 }
  0x1b   : > { %765 = vst.msk [vmem:[%s1274_s25] sm:$0xf] %vm764_vm0, %v962_v40  ;;  %766 = vst.msk [vmem:[%s1274_s25 + $0x4] sm:$0xf] %vm764_vm0, %v963_v41  ;;  %v1044_v50 = vunpack.c.l.bf16 %v1157_v38  ;;  %v1045_v51 = vunpack.c.h.bf16 %v1157_v38  ;;  %v1048_v52 = vunpack.c.l.bf16 %v1158_v39  ;;  %v1049_v53 = vunpack.c.h.bf16 %v1158_v39 }
  0x1c   : > { %767 = vst.msk [vmem:[%s1274_s25 + $0x8] sm:$0xf] %vm764_vm0, %v964_v42  ;;  %768 = vst.msk [vmem:[%s1274_s25 + $0xc] sm:$0xf] %vm764_vm0, %v965_v43  ;;  %v1052_v54 = vunpack.c.l.bf16 %v1159_v44  ;;  %v1053_v55 = vunpack.c.h.bf16 %v1159_v44  ;;  %v1056_v56 = vunpack.c.l.bf16 %v1160_v45  ;;  %v1057_v57 = vunpack.c.h.bf16 %v1160_v45 }
  0x1d   : > { %769 = vst.msk [vmem:[%s1274_s25 + $0x10] sm:$0xf] %vm764_vm0, %v966_v46  ;;  %770 = vst.msk [vmem:[%s1274_s25 + $0x14] sm:$0xf] %vm764_vm0, %v967_v47  ;;  %v317_v58 = vmul.f32 %v1044_v50, %v1242_v0  ;;  %v318_v59 = vmul.f32 %v1045_v51, %v1242_v0  ;;  %v319_v60 = vmul.f32 %v1048_v52, %v1242_v0  ;;  %v1060_v32 = vunpack.c.l.bf16 %v1161_v20 }
  0x1e   : > { %771 = vst.msk [vmem:[%s1274_s25 + $0x18] sm:$0xf] %vm764_vm0, %v968_v48  ;;  %772 = vst.msk [vmem:[%s1274_s25 + $0x1c] sm:$0xf] %vm764_vm0, %v969_v49  ;;  %v320_v61 = vmul.f32 %v1049_v53, %v1242_v0  ;;  %v321_v62 = vmul.f32 %v1052_v54, %v1242_v0  ;;  %v322_v63 = vmul.f32 %v1053_v55, %v1242_v0  ;;  %v1061_v33 = vunpack.c.h.bf16 %v1161_v20 }
  0x1f   : > { %v323_v1 = vmul.f32 %v1056_v56, %v1242_v0  ;;  %v324_v2 = vmul.f32 %v1057_v57, %v1242_v0  ;;  %v388_v3 = vadd.f32 %v1251_v9, %v317_v58  ;;  %v389_v4 = vadd.f32 %v1251_v9, %v318_v59 }
  0x20   : > { %v390_v5 = vadd.f32 %v1251_v9, %v319_v60  ;;  %v391_v6 = vadd.f32 %v1251_v9, %v320_v61  ;;  %v392_v7 = vadd.f32 %v1251_v9, %v321_v62  ;;  %v393_v8 = vadd.f32 %v1251_v9, %v322_v63 }
  0x21   : > { %v394_v10 = vadd.f32 %v1251_v9, %v323_v1  ;;  %v395_v11 = vadd.f32 %v1251_v9, %v324_v2  ;;  %v452_v12 = vmax.f32 %v388_v3, 0.0  ;;  %v453_v13 = vmax.f32 %v389_v4, 0.0  ;;  %v1165_v1 = vld [vmem:[%s1237_s18 + $0x60] sm:$0xff]   ;;  %v1166_v2 = vld [vmem:[%s1237_s18 + $0x68] sm:$0xff]  }
  0x22   : > { %v454_v14 = vmax.f32 %v390_v5, 0.0  ;;  %v455_v15 = vmax.f32 %v391_v6, 0.0  ;;  %v456_v16 = vmax.f32 %v392_v7, 0.0  ;;  %v457_v17 = vmax.f32 %v393_v8, 0.0  ;;  %v1167_v7 = vld [vmem:[%s1237_s18 + $0x70] sm:$0xff]   ;;  %v1168_v8 = vld [vmem:[%s1237_s18 + $0x78] sm:$0xff]  }
  0x23   : > { %v458_v18 = vmax.f32 %v394_v10, 0.0  ;;  %v459_v19 = vmax.f32 %v395_v11, 0.0  ;;  %v970_v22 = vpack.c.bf16 %v452_v12, %v452_v12  ;;  %v971_v23 = vpack.c.bf16 %v453_v13, %v453_v13 }
  0x24   : > { %v972_v24 = vpack.c.bf16 %v454_v14, %v454_v14  ;;  %v973_v25 = vpack.c.bf16 %v455_v15, %v455_v15  ;;  %v974_v28 = vpack.c.bf16 %v456_v16, %v456_v16  ;;  %v975_v29 = vpack.c.bf16 %v457_v17, %v457_v17 }
  0x25   : > { %v976_v30 = vpack.c.bf16 %v458_v18, %v458_v18  ;;  %v977_v31 = vpack.c.bf16 %v459_v19, %v459_v19  ;;  %773 = vst.msk [vmem:[%s1274_s25 + $0x20] sm:$0xf] %vm764_vm0, %v970_v22  ;;  %774 = vst.msk [vmem:[%s1274_s25 + $0x24] sm:$0xf] %vm764_vm0, %v971_v23  ;;  %v1064_v34 = vunpack.c.l.bf16 %v1162_v21  ;;  %v1065_v35 = vunpack.c.h.bf16 %v1162_v21 }
  0x26   : > { %775 = vst.msk [vmem:[%s1274_s25 + $0x28] sm:$0xf] %vm764_vm0, %v972_v24  ;;  %776 = vst.msk [vmem:[%s1274_s25 + $0x2c] sm:$0xf] %vm764_vm0, %v973_v25  ;;  %v1068_v36 = vunpack.c.l.bf16 %v1163_v26  ;;  %v1069_v37 = vunpack.c.h.bf16 %v1163_v26  ;;  %v1072_v38 = vunpack.c.l.bf16 %v1164_v27  ;;  %v1073_v39 = vunpack.c.h.bf16 %v1164_v27 }
  0x27   : > { %777 = vst.msk [vmem:[%s1274_s25 + $0x30] sm:$0xf] %vm764_vm0, %v974_v28  ;;  %778 = vst.msk [vmem:[%s1274_s25 + $0x34] sm:$0xf] %vm764_vm0, %v975_v29  ;;  %v325_v40 = vmul.f32 %v1060_v32, %v1242_v0  ;;  %v326_v41 = vmul.f32 %v1061_v33, %v1242_v0  ;;  %v327_v42 = vmul.f32 %v1064_v34, %v1242_v0  ;;  %v1076_v14 = vunpack.c.l.bf16 %v1165_v1 }
  0x28   : > { %779 = vst.msk [vmem:[%s1274_s25 + $0x38] sm:$0xf] %vm764_vm0, %v976_v30  ;;  %780 = vst.msk [vmem:[%s1274_s25 + $0x3c] sm:$0xf] %vm764_vm0, %v977_v31  ;;  %v328_v43 = vmul.f32 %v1065_v35, %v1242_v0  ;;  %v329_v44 = vmul.f32 %v1068_v36, %v1242_v0  ;;  %v330_v45 = vmul.f32 %v1069_v37, %v1242_v0  ;;  %v1077_v15 = vunpack.c.h.bf16 %v1165_v1 }
  0x29   : > { %v331_v46 = vmul.f32 %v1072_v38, %v1242_v0  ;;  %v332_v47 = vmul.f32 %v1073_v39, %v1242_v0  ;;  %v396_v48 = vadd.f32 %v1251_v9, %v325_v40  ;;  %v397_v49 = vadd.f32 %v1251_v9, %v326_v41 }
  0x2a   : > { %v398_v50 = vadd.f32 %v1251_v9, %v327_v42  ;;  %v399_v51 = vadd.f32 %v1251_v9, %v328_v43  ;;  %v400_v52 = vadd.f32 %v1251_v9, %v329_v44  ;;  %v401_v53 = vadd.f32 %v1251_v9, %v330_v45 }
  0x2b   : > { %v402_v54 = vadd.f32 %v1251_v9, %v331_v46  ;;  %v403_v55 = vadd.f32 %v1251_v9, %v332_v47  ;;  %v460_v56 = vmax.f32 %v396_v48, 0.0  ;;  %v461_v57 = vmax.f32 %v397_v49, 0.0  ;;  %v1169_v46 = vld [vmem:[%s1237_s18 + $0x80] sm:$0xff]   ;;  %v1170_v47 = vld [vmem:[%s1237_s18 + $0x88] sm:$0xff]  }
  0x2c   : > { %v462_v58 = vmax.f32 %v398_v50, 0.0  ;;  %v463_v59 = vmax.f32 %v399_v51, 0.0  ;;  %v464_v60 = vmax.f32 %v400_v52, 0.0  ;;  %v465_v61 = vmax.f32 %v401_v53, 0.0  ;;  %v1171_v52 = vld [vmem:[%s1237_s18 + $0x90] sm:$0xff]   ;;  %v1172_v53 = vld [vmem:[%s1237_s18 + $0x98] sm:$0xff]  }
  0x2d   : > { %v466_v62 = vmax.f32 %v402_v54, 0.0  ;;  %v467_v63 = vmax.f32 %v403_v55, 0.0  ;;  %v978_v3 = vpack.c.bf16 %v460_v56, %v460_v56  ;;  %v979_v4 = vpack.c.bf16 %v461_v57, %v461_v57 }
  0x2e   : > { %v980_v5 = vpack.c.bf16 %v462_v58, %v462_v58  ;;  %v981_v6 = vpack.c.bf16 %v463_v59, %v463_v59  ;;  %v982_v10 = vpack.c.bf16 %v464_v60, %v464_v60  ;;  %v983_v11 = vpack.c.bf16 %v465_v61, %v465_v61 }
  0x2f   : > { %v984_v12 = vpack.c.bf16 %v466_v62, %v466_v62  ;;  %v985_v13 = vpack.c.bf16 %v467_v63, %v467_v63  ;;  %781 = vst.msk [vmem:[%s1274_s25 + $0x40] sm:$0xf] %vm764_vm0, %v978_v3  ;;  %782 = vst.msk [vmem:[%s1274_s25 + $0x44] sm:$0xf] %vm764_vm0, %v979_v4  ;;  %v1080_v16 = vunpack.c.l.bf16 %v1166_v2  ;;  %v1081_v17 = vunpack.c.h.bf16 %v1166_v2 }
  0x30   : > { %783 = vst.msk [vmem:[%s1274_s25 + $0x48] sm:$0xf] %vm764_vm0, %v980_v5  ;;  %784 = vst.msk [vmem:[%s1274_s25 + $0x4c] sm:$0xf] %vm764_vm0, %v981_v6  ;;  %v1084_v18 = vunpack.c.l.bf16 %v1167_v7  ;;  %v1085_v19 = vunpack.c.h.bf16 %v1167_v7  ;;  %v1088_v20 = vunpack.c.l.bf16 %v1168_v8  ;;  %v1089_v21 = vunpack.c.h.bf16 %v1168_v8 }
  0x31   : > { %785 = vst.msk [vmem:[%s1274_s25 + $0x50] sm:$0xf] %vm764_vm0, %v982_v10  ;;  %786 = vst.msk [vmem:[%s1274_s25 + $0x54] sm:$0xf] %vm764_vm0, %v983_v11  ;;  %v333_v22 = vmul.f32 %v1076_v14, %v1242_v0  ;;  %v334_v23 = vmul.f32 %v1077_v15, %v1242_v0  ;;  %v335_v24 = vmul.f32 %v1080_v16, %v1242_v0  ;;  %v1092_v58 = vunpack.c.l.bf16 %v1169_v46 }
  0x32   : > { %787 = vst.msk [vmem:[%s1274_s25 + $0x58] sm:$0xf] %vm764_vm0, %v984_v12  ;;  %788 = vst.msk [vmem:[%s1274_s25 + $0x5c] sm:$0xf] %vm764_vm0, %v985_v13  ;;  %v336_v25 = vmul.f32 %v1081_v17, %v1242_v0  ;;  %v337_v26 = vmul.f32 %v1084_v18, %v1242_v0  ;;  %v338_v27 = vmul.f32 %v1085_v19, %v1242_v0  ;;  %v1093_v59 = vunpack.c.h.bf16 %v1169_v46 }
  0x33   : > { %v339_v28 = vmul.f32 %v1088_v20, %v1242_v0  ;;  %v340_v29 = vmul.f32 %v1089_v21, %v1242_v0  ;;  %v404_v30 = vadd.f32 %v1251_v9, %v333_v22  ;;  %v405_v31 = vadd.f32 %v1251_v9, %v334_v23 }
  0x34   : > { %v406_v32 = vadd.f32 %v1251_v9, %v335_v24  ;;  %v407_v33 = vadd.f32 %v1251_v9, %v336_v25  ;;  %v408_v34 = vadd.f32 %v1251_v9, %v337_v26  ;;  %v409_v35 = vadd.f32 %v1251_v9, %v338_v27 }
  0x35   : > { %v410_v36 = vadd.f32 %v1251_v9, %v339_v28  ;;  %v411_v37 = vadd.f32 %v1251_v9, %v340_v29  ;;  %v468_v38 = vmax.f32 %v404_v30, 0.0  ;;  %v469_v39 = vmax.f32 %v405_v31, 0.0  ;;  %v1173_v28 = vld [vmem:[%s1237_s18 + $0xa0] sm:$0xff]   ;;  %v1174_v29 = vld [vmem:[%s1237_s18 + $0xa8] sm:$0xff]  }
  0x36   : > { %v470_v40 = vmax.f32 %v406_v32, 0.0  ;;  %v471_v41 = vmax.f32 %v407_v33, 0.0  ;;  %v472_v42 = vmax.f32 %v408_v34, 0.0  ;;  %v473_v43 = vmax.f32 %v409_v35, 0.0  ;;  %v1175_v34 = vld [vmem:[%s1237_s18 + $0xb0] sm:$0xff]   ;;  %v1176_v35 = vld [vmem:[%s1237_s18 + $0xb8] sm:$0xff]  }
  0x37   : > { %v474_v44 = vmax.f32 %v410_v36, 0.0  ;;  %v475_v45 = vmax.f32 %v411_v37, 0.0  ;;  %v986_v48 = vpack.c.bf16 %v468_v38, %v468_v38  ;;  %v987_v49 = vpack.c.bf16 %v469_v39, %v469_v39 }
  0x38   : > { %v988_v50 = vpack.c.bf16 %v470_v40, %v470_v40  ;;  %v989_v51 = vpack.c.bf16 %v471_v41, %v471_v41  ;;  %v990_v54 = vpack.c.bf16 %v472_v42, %v472_v42  ;;  %v991_v55 = vpack.c.bf16 %v473_v43, %v473_v43 }
  0x39   : > { %v992_v56 = vpack.c.bf16 %v474_v44, %v474_v44  ;;  %v993_v57 = vpack.c.bf16 %v475_v45, %v475_v45  ;;  %789 = vst.msk [vmem:[%s1274_s25 + $0x60] sm:$0xf] %vm764_vm0, %v986_v48  ;;  %790 = vst.msk [vmem:[%s1274_s25 + $0x64] sm:$0xf] %vm764_vm0, %v987_v49  ;;  %v1096_v60 = vunpack.c.l.bf16 %v1170_v47  ;;  %v1097_v61 = vunpack.c.h.bf16 %v1170_v47 }
  0x3a   : > { %791 = vst.msk [vmem:[%s1274_s25 + $0x68] sm:$0xf] %vm764_vm0, %v988_v50  ;;  %792 = vst.msk [vmem:[%s1274_s25 + $0x6c] sm:$0xf] %vm764_vm0, %v989_v51  ;;  %v1100_v62 = vunpack.c.l.bf16 %v1171_v52  ;;  %v1101_v63 = vunpack.c.h.bf16 %v1171_v52  ;;  %v1104_v1 = vunpack.c.l.bf16 %v1172_v53  ;;  %v1105_v2 = vunpack.c.h.bf16 %v1172_v53 }
  0x3b   : > { %793 = vst.msk [vmem:[%s1274_s25 + $0x70] sm:$0xf] %vm764_vm0, %v990_v54  ;;  %794 = vst.msk [vmem:[%s1274_s25 + $0x74] sm:$0xf] %vm764_vm0, %v991_v55  ;;  %v341_v3 = vmul.f32 %v1092_v58, %v1242_v0  ;;  %v342_v4 = vmul.f32 %v1093_v59, %v1242_v0  ;;  %v343_v5 = vmul.f32 %v1096_v60, %v1242_v0  ;;  %v1108_v40 = vunpack.c.l.bf16 %v1173_v28 }
  0x3c   : > { %795 = vst.msk [vmem:[%s1274_s25 + $0x78] sm:$0xf] %vm764_vm0, %v992_v56  ;;  %796 = vst.msk [vmem:[%s1274_s25 + $0x7c] sm:$0xf] %vm764_vm0, %v993_v57  ;;  %v344_v6 = vmul.f32 %v1097_v61, %v1242_v0  ;;  %v345_v7 = vmul.f32 %v1100_v62, %v1242_v0  ;;  %v346_v8 = vmul.f32 %v1101_v63, %v1242_v0  ;;  %v1109_v41 = vunpack.c.h.bf16 %v1173_v28 }
  0x3d   : > { %v347_v10 = vmul.f32 %v1104_v1, %v1242_v0  ;;  %v348_v11 = vmul.f32 %v1105_v2, %v1242_v0  ;;  %v412_v12 = vadd.f32 %v1251_v9, %v341_v3  ;;  %v413_v13 = vadd.f32 %v1251_v9, %v342_v4 }
  0x3e   : > { %v414_v14 = vadd.f32 %v1251_v9, %v343_v5  ;;  %v415_v15 = vadd.f32 %v1251_v9, %v344_v6  ;;  %v416_v16 = vadd.f32 %v1251_v9, %v345_v7  ;;  %v417_v17 = vadd.f32 %v1251_v9, %v346_v8 }
  0x3f   : > { %v418_v18 = vadd.f32 %v1251_v9, %v347_v10  ;;  %v419_v19 = vadd.f32 %v1251_v9, %v348_v11  ;;  %v476_v20 = vmax.f32 %v412_v12, 0.0  ;;  %v477_v21 = vmax.f32 %v413_v13, 0.0  ;;  %v1177_v10 = vld [vmem:[%s1237_s18 + $0xc0] sm:$0xff]   ;;  %v1178_v11 = vld [vmem:[%s1237_s18 + $0xc8] sm:$0xff]  }
  0x40   : > { %v478_v22 = vmax.f32 %v414_v14, 0.0  ;;  %v479_v23 = vmax.f32 %v415_v15, 0.0  ;;  %v480_v24 = vmax.f32 %v416_v16, 0.0  ;;  %v481_v25 = vmax.f32 %v417_v17, 0.0  ;;  %v1179_v16 = vld [vmem:[%s1237_s18 + $0xd0] sm:$0xff]   ;;  %v1180_v17 = vld [vmem:[%s1237_s18 + $0xd8] sm:$0xff]  }
  0x41   : > { %v482_v26 = vmax.f32 %v418_v18, 0.0  ;;  %v483_v27 = vmax.f32 %v419_v19, 0.0  ;;  %v994_v30 = vpack.c.bf16 %v476_v20, %v476_v20  ;;  %v995_v31 = vpack.c.bf16 %v477_v21, %v477_v21 }
  0x42   : > { %v996_v32 = vpack.c.bf16 %v478_v22, %v478_v22  ;;  %v997_v33 = vpack.c.bf16 %v479_v23, %v479_v23  ;;  %v998_v36 = vpack.c.bf16 %v480_v24, %v480_v24  ;;  %v999_v37 = vpack.c.bf16 %v481_v25, %v481_v25 }
  0x43   : > { %v1000_v38 = vpack.c.bf16 %v482_v26, %v482_v26  ;;  %v1001_v39 = vpack.c.bf16 %v483_v27, %v483_v27  ;;  %797 = vst.msk [vmem:[%s1274_s25 + $0x80] sm:$0xf] %vm764_vm0, %v994_v30  ;;  %798 = vst.msk [vmem:[%s1274_s25 + $0x84] sm:$0xf] %vm764_vm0, %v995_v31  ;;  %v1112_v42 = vunpack.c.l.bf16 %v1174_v29  ;;  %v1113_v43 = vunpack.c.h.bf16 %v1174_v29 }
  0x44   : > { %799 = vst.msk [vmem:[%s1274_s25 + $0x88] sm:$0xf] %vm764_vm0, %v996_v32  ;;  %800 = vst.msk [vmem:[%s1274_s25 + $0x8c] sm:$0xf] %vm764_vm0, %v997_v33  ;;  %v1116_v44 = vunpack.c.l.bf16 %v1175_v34  ;;  %v1117_v45 = vunpack.c.h.bf16 %v1175_v34  ;;  %v1120_v46 = vunpack.c.l.bf16 %v1176_v35  ;;  %v1121_v47 = vunpack.c.h.bf16 %v1176_v35 }
  0x45   : > { %801 = vst.msk [vmem:[%s1274_s25 + $0x90] sm:$0xf] %vm764_vm0, %v998_v36  ;;  %802 = vst.msk [vmem:[%s1274_s25 + $0x94] sm:$0xf] %vm764_vm0, %v999_v37  ;;  %v349_v48 = vmul.f32 %v1108_v40, %v1242_v0  ;;  %v350_v49 = vmul.f32 %v1109_v41, %v1242_v0  ;;  %v351_v50 = vmul.f32 %v1112_v42, %v1242_v0  ;;  %v1124_v22 = vunpack.c.l.bf16 %v1177_v10 }
  0x46   : > { %803 = vst.msk [vmem:[%s1274_s25 + $0x98] sm:$0xf] %vm764_vm0, %v1000_v38  ;;  %804 = vst.msk [vmem:[%s1274_s25 + $0x9c] sm:$0xf] %vm764_vm0, %v1001_v39  ;;  %v352_v51 = vmul.f32 %v1113_v43, %v1242_v0  ;;  %v353_v52 = vmul.f32 %v1116_v44, %v1242_v0  ;;  %v354_v53 = vmul.f32 %v1117_v45, %v1242_v0  ;;  %v1125_v23 = vunpack.c.h.bf16 %v1177_v10 }
  0x47   : > { %v355_v54 = vmul.f32 %v1120_v46, %v1242_v0  ;;  %v356_v55 = vmul.f32 %v1121_v47, %v1242_v0  ;;  %v420_v56 = vadd.f32 %v1251_v9, %v349_v48  ;;  %v421_v57 = vadd.f32 %v1251_v9, %v350_v49 }
  0x48   : > { %v422_v58 = vadd.f32 %v1251_v9, %v351_v50  ;;  %v423_v59 = vadd.f32 %v1251_v9, %v352_v51  ;;  %v424_v60 = vadd.f32 %v1251_v9, %v353_v52  ;;  %v425_v61 = vadd.f32 %v1251_v9, %v354_v53 }
  0x49   : > { %v426_v62 = vadd.f32 %v1251_v9, %v355_v54  ;;  %v427_v63 = vadd.f32 %v1251_v9, %v356_v55  ;;  %v484_v1 = vmax.f32 %v420_v56, 0.0  ;;  %v485_v2 = vmax.f32 %v421_v57, 0.0  ;;  %v1181_v54 = vld [vmem:[%s1237_s18 + $0xe0] sm:$0xff]   ;;  %v1182_v55 = vld [vmem:[%s1237_s18 + $0xe8] sm:$0xff]  }
  0x4a   : > { %v486_v3 = vmax.f32 %v422_v58, 0.0  ;;  %v487_v4 = vmax.f32 %v423_v59, 0.0  ;;  %v488_v5 = vmax.f32 %v424_v60, 0.0  ;;  %v489_v6 = vmax.f32 %v425_v61, 0.0  ;;  %v1183_v60 = vld [vmem:[%s1237_s18 + $0xf0] sm:$0xff]   ;;  %v1184_v61 = vld [vmem:[%s1237_s18 + $0xf8] sm:$0xff]  }
  0x4b   : > { %v490_v7 = vmax.f32 %v426_v62, 0.0  ;;  %v491_v8 = vmax.f32 %v427_v63, 0.0  ;;  %v1002_v12 = vpack.c.bf16 %v484_v1, %v484_v1  ;;  %v1003_v13 = vpack.c.bf16 %v485_v2, %v485_v2 }
  0x4c   : > { %v1004_v14 = vpack.c.bf16 %v486_v3, %v486_v3  ;;  %v1005_v15 = vpack.c.bf16 %v487_v4, %v487_v4  ;;  %v1006_v18 = vpack.c.bf16 %v488_v5, %v488_v5  ;;  %v1007_v19 = vpack.c.bf16 %v489_v6, %v489_v6 }
  0x4d   : > { %v1008_v20 = vpack.c.bf16 %v490_v7, %v490_v7  ;;  %v1009_v21 = vpack.c.bf16 %v491_v8, %v491_v8  ;;  %805 = vst.msk [vmem:[%s1274_s25 + $0xa0] sm:$0xf] %vm764_vm0, %v1002_v12  ;;  %806 = vst.msk [vmem:[%s1274_s25 + $0xa4] sm:$0xf] %vm764_vm0, %v1003_v13  ;;  %v1128_v24 = vunpack.c.l.bf16 %v1178_v11  ;;  %v1129_v25 = vunpack.c.h.bf16 %v1178_v11 }
  0x4e   : > { %807 = vst.msk [vmem:[%s1274_s25 + $0xa8] sm:$0xf] %vm764_vm0, %v1004_v14  ;;  %808 = vst.msk [vmem:[%s1274_s25 + $0xac] sm:$0xf] %vm764_vm0, %v1005_v15  ;;  %v1132_v26 = vunpack.c.l.bf16 %v1179_v16  ;;  %v1133_v27 = vunpack.c.h.bf16 %v1179_v16  ;;  %v1136_v28 = vunpack.c.l.bf16 %v1180_v17  ;;  %v1137_v29 = vunpack.c.h.bf16 %v1180_v17 }
  0x4f   : > { %809 = vst.msk [vmem:[%s1274_s25 + $0xb0] sm:$0xf] %vm764_vm0, %v1006_v18  ;;  %810 = vst.msk [vmem:[%s1274_s25 + $0xb4] sm:$0xf] %vm764_vm0, %v1007_v19  ;;  %v357_v30 = vmul.f32 %v1124_v22, %v1242_v0  ;;  %v358_v31 = vmul.f32 %v1125_v23, %v1242_v0  ;;  %v359_v32 = vmul.f32 %v1128_v24, %v1242_v0  ;;  %v1140_v3 = vunpack.c.l.bf16 %v1181_v54 }
  0x50   : > { %811 = vst.msk [vmem:[%s1274_s25 + $0xb8] sm:$0xf] %vm764_vm0, %v1008_v20  ;;  %812 = vst.msk [vmem:[%s1274_s25 + $0xbc] sm:$0xf] %vm764_vm0, %v1009_v21  ;;  %v360_v33 = vmul.f32 %v1129_v25, %v1242_v0  ;;  %v361_v34 = vmul.f32 %v1132_v26, %v1242_v0  ;;  %v362_v35 = vmul.f32 %v1133_v27, %v1242_v0  ;;  %v1141_v4 = vunpack.c.h.bf16 %v1181_v54 }
  0x51   : > { %v363_v36 = vmul.f32 %v1136_v28, %v1242_v0  ;;  %v364_v37 = vmul.f32 %v1137_v29, %v1242_v0  ;;  %v428_v38 = vadd.f32 %v1251_v9, %v357_v30  ;;  %v429_v39 = vadd.f32 %v1251_v9, %v358_v31 }
  0x52   : > { %v430_v40 = vadd.f32 %v1251_v9, %v359_v32  ;;  %v431_v41 = vadd.f32 %v1251_v9, %v360_v33  ;;  %v432_v42 = vadd.f32 %v1251_v9, %v361_v34  ;;  %v433_v43 = vadd.f32 %v1251_v9, %v362_v35 }
  0x53   : > { %v434_v44 = vadd.f32 %v1251_v9, %v363_v36  ;;  %v435_v45 = vadd.f32 %v1251_v9, %v364_v37  ;;  %v492_v46 = vmax.f32 %v428_v38, 0.0  ;;  %v493_v47 = vmax.f32 %v429_v39, 0.0 }
  0x54   : > { %v494_v48 = vmax.f32 %v430_v40, 0.0  ;;  %v495_v49 = vmax.f32 %v431_v41, 0.0  ;;  %v496_v50 = vmax.f32 %v432_v42, 0.0  ;;  %v497_v51 = vmax.f32 %v433_v43, 0.0 }
  0x55   : > { %v498_v52 = vmax.f32 %v434_v44, 0.0  ;;  %v499_v53 = vmax.f32 %v435_v45, 0.0  ;;  %v1010_v56 = vpack.c.bf16 %v492_v46, %v492_v46  ;;  %v1011_v57 = vpack.c.bf16 %v493_v47, %v493_v47 }
  0x56   : > { %v1012_v58 = vpack.c.bf16 %v494_v48, %v494_v48  ;;  %v1013_v59 = vpack.c.bf16 %v495_v49, %v495_v49  ;;  %v1014_v62 = vpack.c.bf16 %v496_v50, %v496_v50  ;;  %v1015_v63 = vpack.c.bf16 %v497_v51, %v497_v51 }
  0x57   : > { %v1016_v1 = vpack.c.bf16 %v498_v52, %v498_v52  ;;  %v1017_v2 = vpack.c.bf16 %v499_v53, %v499_v53  ;;  %813 = vst.msk [vmem:[%s1274_s25 + $0xc0] sm:$0xf] %vm764_vm0, %v1010_v56  ;;  %814 = vst.msk [vmem:[%s1274_s25 + $0xc4] sm:$0xf] %vm764_vm0, %v1011_v57  ;;  %v1144_v5 = vunpack.c.l.bf16 %v1182_v55  ;;  %v1145_v6 = vunpack.c.h.bf16 %v1182_v55 }
  0x58   : > { %815 = vst.msk [vmem:[%s1274_s25 + $0xc8] sm:$0xf] %vm764_vm0, %v1012_v58  ;;  %816 = vst.msk [vmem:[%s1274_s25 + $0xcc] sm:$0xf] %vm764_vm0, %v1013_v59  ;;  %v1148_v7 = vunpack.c.l.bf16 %v1183_v60  ;;  %v1149_v8 = vunpack.c.h.bf16 %v1183_v60  ;;  %v1152_v10 = vunpack.c.l.bf16 %v1184_v61  ;;  %v1153_v11 = vunpack.c.h.bf16 %v1184_v61 }
  0x59   : > { %817 = vst.msk [vmem:[%s1274_s25 + $0xd0] sm:$0xf] %vm764_vm0, %v1014_v62  ;;  %818 = vst.msk [vmem:[%s1274_s25 + $0xd4] sm:$0xf] %vm764_vm0, %v1015_v63  ;;  %v365_v12 = vmul.f32 %v1140_v3, %v1242_v0  ;;  %v366_v13 = vmul.f32 %v1141_v4, %v1242_v0  ;;  %v367_v14 = vmul.f32 %v1144_v5, %v1242_v0 }
  0x5a   : > { %819 = vst.msk [vmem:[%s1274_s25 + $0xd8] sm:$0xf] %vm764_vm0, %v1016_v1  ;;  %820 = vst.msk [vmem:[%s1274_s25 + $0xdc] sm:$0xf] %vm764_vm0, %v1017_v2  ;;  %v368_v15 = vmul.f32 %v1145_v6, %v1242_v0  ;;  %v369_v16 = vmul.f32 %v1148_v7, %v1242_v0  ;;  %v370_v17 = vmul.f32 %v1149_v8, %v1242_v0 }
  0x5b   : > { %v371_v18 = vmul.f32 %v1152_v10, %v1242_v0  ;;  %v372_v19 = vmul.f32 %v1153_v11, %v1242_v0  ;;  %v436_v20 = vadd.f32 %v1251_v9, %v365_v12  ;;  %v437_v21 = vadd.f32 %v1251_v9, %v366_v13 }
  0x5c   : > { %v438_v22 = vadd.f32 %v1251_v9, %v367_v14  ;;  %v439_v23 = vadd.f32 %v1251_v9, %v368_v15  ;;  %v440_v24 = vadd.f32 %v1251_v9, %v369_v16  ;;  %v441_v25 = vadd.f32 %v1251_v9, %v370_v17 }
  0x5d   : > { %v442_v26 = vadd.f32 %v1251_v9, %v371_v18  ;;  %v443_v27 = vadd.f32 %v1251_v9, %v372_v19  ;;  %v500_v28 = vmax.f32 %v436_v20, 0.0  ;;  %v501_v29 = vmax.f32 %v437_v21, 0.0 }
  0x5e   : > { %v502_v0 = vmax.f32 %v438_v22, 0.0  ;;  %v503_v30 = vmax.f32 %v439_v23, 0.0  ;;  %v504_v31 = vmax.f32 %v440_v24, 0.0  ;;  %v505_v32 = vmax.f32 %v441_v25, 0.0 }
  0x5f   : > { %v506_v33 = vmax.f32 %v442_v26, 0.0  ;;  %v507_v34 = vmax.f32 %v443_v27, 0.0  ;;  %v1018_v35 = vpack.c.bf16 %v500_v28, %v500_v28  ;;  %v1019_v36 = vpack.c.bf16 %v501_v29, %v501_v29 }
  0x60   : > { %v1020_v37 = vpack.c.bf16 %v502_v0, %v502_v0  ;;  %v1021_v9 = vpack.c.bf16 %v503_v30, %v503_v30  ;;  %v1022_v38 = vpack.c.bf16 %v504_v31, %v504_v31  ;;  %v1023_v39 = vpack.c.bf16 %v505_v32, %v505_v32 }
  0x61   : > { %v1024_v40 = vpack.c.bf16 %v506_v33, %v506_v33  ;;  %v1025_v41 = vpack.c.bf16 %v507_v34, %v507_v34  ;;  %821 = vst.msk [vmem:[%s1274_s25 + $0xe0] sm:$0xf] %vm764_vm0, %v1018_v35  ;;  %822 = vst.msk [vmem:[%s1274_s25 + $0xe4] sm:$0xf] %vm764_vm0, %v1019_v36 }
  0x62   : > { %823 = vst.msk [vmem:[%s1274_s25 + $0xe8] sm:$0xf] %vm764_vm0, %v1020_v37  ;;  %824 = vst.msk [vmem:[%s1274_s25 + $0xec] sm:$0xf] %vm764_vm0, %v1021_v9 }
  0x63   : > { %825 = vst.msk [vmem:[%s1274_s25 + $0xf0] sm:$0xf] %vm764_vm0, %v1022_v38  ;;  %826 = vst.msk [vmem:[%s1274_s25 + $0xf4] sm:$0xf] %vm764_vm0, %v1023_v39 }
  0x64   : > { %827 = vst.msk [vmem:[%s1274_s25 + $0xf8] sm:$0xf] %vm764_vm0, %v1024_v40  ;;  %828 = vst.msk [vmem:[%s1274_s25 + $0xfc] sm:$0xf] %vm764_vm0, %v1025_v41 }
  0x65 PF: > { %s13_s12 = sadd.s32 1, %s1199_s12  }
  0x66   : > { %p10_p4 = scmp.ge.s32.totalorder %s13_s12, 18  }
  0x68   :  { %12 = sbr.rel (!%p10_p4) target bundleno = 1 (0x1), region = 62 }

// kernel: generator_forward_pallas.21
= control target key start
LH: loop header
LB: loop body
LE: loop exit
PB: predicated region body
PF: predicated region fallthrough
CT: control target
= control target key end

     0   :  { %s2168_s9 = smov 0   ;;  %s2170_s10 = smov 0   ;;  %s2311_s0 = inlined_call_operand.vmem [shape: bf16[8192,8], index: 0, kind: input, shape index: {}]   ;;  %s2312_s1 = inlined_call_operand.vmem [shape: bf16[8,128], index: 1, kind: input, shape index: {}]   ;;  %s2313_s2 = inlined_call_operand.vmem [shape: bf16[8192,128], index: 2, kind: output, shape index: {}]  }
   0x1   :  { %s2172_s11 = smov 0  }
   0x2 LB: > { %s31_s12 = sadd.s32 1, %s2147_s10  ;;  %p1580_p0 = scmp.ge.s32.totalorder %s2151_s11, 1  ;;  %s2151_s11 = sphi %s2172_s11, %s12_s11   ;;  %s2147_s10 = sphi %s2170_s10, %s2315_s10   ;;  %s2143_s9 = sphi %s2168_s9, %s2314_s9  }
   0x3   : > { %p33_p1 = scmp.ge.s32.totalorder %s31_s12, 16  ;;  %p153_p2 = scmp.lt.s32.totalorder %s2151_s11, 17 }
   0x5   : > { %s2317_s12 = smov (%p33_p1, %s31_s12), 0  ;;  %p154_p3 = pnand %p1580_p0, %p153_p2 }
   0x6   : > { %v410_v0 = vld [vmem:[%s2312_s1] sm:$0xf] (!%p154_p3)  ;;  %vm668_vm0 = vcmask (!%p154_p3), 1043456   ;;  %s1581_s15 = sshll.u32 (!%p154_p3), %s2143_s9, 6  ;;  %vm571_vm1 = vcmask (!%p154_p3), 64512  }
   0x7   : > { %157 = sbr.rel (%p154_p3) target bundleno = 294 (0x126), region = 28  ;;  %2071 = vmatprep.subr.msk.bf16.mxu0 (!%p154_p3), %vm668_vm0, %v410_v0  ;;  %2072 = vmatprep.subr.msk.bf16.mxu1 (!%p154_p3), %vm668_vm0, %v410_v0  ;;  %v670_v1 = vsel (!%p154_p3), %vm668_vm0, %v410_v0, 0  ;;  %p189_p4 = scmp.lt.s32.totalorder (!%p154_p3), %s1581_s15, 1023 }
   0x8   : > { %2004 = vmatpush3.bf16.msra.mxu0 (!%p154_p3), %v670_v1  ;;  %2070 = vmatpush3.bf16.msra.mxu1 (!%p154_p3), %v670_v1 }
   0xe   : > { %s2319_s15 = smov (!%p189_p4, %s1581_s15), 1023 }
   0xf   : > { %s1582_s16 = sshll.u32 %s2319_s15, 2 }
  0x10   : > { %s2197_s19 = scalar_lea.vmem %s2311_s0, %s1582_s16  ;;  %s2268_s22 = scalar_lea.vmem %s2313_s2, %s1582_s16 }
  0x11   : > { %v2097_v2 = vld [vmem:[%s2197_s19] sm:$0xff]   ;;  %v2099_v4 = vld [vmem:[%s2197_s19 + $0x8] sm:$0xff]   ;;  %v2101_v6 = vld [vmem:[%s2197_s19 + $0x10] sm:$0xff]  }
  0x12   : > { %v2098_v3 = vld [vmem:[%s2197_s19 + $0x80] sm:$0xff]   ;;  %2005 = vmatprep.mubr.msk.bf16.mxu0 %vm571_vm1, %v2097_v2  ;;  %v2100_v5 = vld [vmem:[%s2197_s19 + $0x88] sm:$0xff]   ;;  %v2102_v7 = vld [vmem:[%s2197_s19 + $0x90] sm:$0xff]  }
  0x13   : > { %2037 = vmatprep.mubr.msk.bf16.mxu1 %vm571_vm1, %v2098_v3  ;;  %2006 = vmatmul.mubr.msk.bf16.vlgmr.msra.gmra.mrb[0].mxu0 %vm571_vm1, %v2099_v4  ;;  %v2103_v8 = vld [vmem:[%s2197_s19 + $0x18] sm:$0xff]   ;;  %v2105_v10 = vld [vmem:[%s2197_s19 + $0x20] sm:$0xff]   ;;  %v2107_v12 = vld [vmem:[%s2197_s19 + $0x28] sm:$0xff]  }
  0x14   : > { %2038 = vmatmul.mubr.msk.bf16.vlgmr.msra.gmra.mrb[0].mxu1 %vm571_vm1, %v2100_v5  ;;  %2009 = vmatprep.mubr.msk.bf16.mxu0 %vm571_vm1, %v2101_v6  ;;  %v2104_v9 = vld [vmem:[%s2197_s19 + $0x98] sm:$0xff]   ;;  %v2106_v11 = vld [vmem:[%s2197_s19 + $0xa0] sm:$0xff]   ;;  %v2108_v13 = vld [vmem:[%s2197_s19 + $0xa8] sm:$0xff]  }
  0x15   : > { %2041 = vmatprep.mubr.msk.bf16.mxu1 %vm571_vm1, %v2102_v7  ;;  %v2109_v14 = vld [vmem:[%s2197_s19 + $0x30] sm:$0xff]   ;;  %v2111_v16 = vld [vmem:[%s2197_s19 + $0x38] sm:$0xff]   ;;  %v2113_v18 = vld [vmem:[%s2197_s19 + $0x40] sm:$0xff]  }
  0x16   : > { %v2110_v15 = vld [vmem:[%s2197_s19 + $0xb0] sm:$0xff]   ;;  %v2112_v17 = vld [vmem:[%s2197_s19 + $0xb8] sm:$0xff]   ;;  %v2114_v19 = vld [vmem:[%s2197_s19 + $0xc0] sm:$0xff]  }
  0x17   : > { %v2115_v20 = vld [vmem:[%s2197_s19 + $0x48] sm:$0xff]   ;;  %v2117_v22 = vld [vmem:[%s2197_s19 + $0x50] sm:$0xff]   ;;  %v2119_v24 = vld [vmem:[%s2197_s19 + $0x58] sm:$0xff]  }
  0x18   : > { %v2116_v21 = vld [vmem:[%s2197_s19 + $0xc8] sm:$0xff]   ;;  %v2118_v23 = vld [vmem:[%s2197_s19 + $0xd0] sm:$0xff]   ;;  %v2120_v25 = vld [vmem:[%s2197_s19 + $0xd8] sm:$0xff]  }
  0x19   : > { %v2121_v26 = vld [vmem:[%s2197_s19 + $0x60] sm:$0xff]   ;;  %v2123_v28 = vld [vmem:[%s2197_s19 + $0x68] sm:$0xff]   ;;  %v2125_v30 = vld [vmem:[%s2197_s19 + $0x70] sm:$0xff]  }
  0x1a   : > { %v2122_v27 = vld [vmem:[%s2197_s19 + $0xe0] sm:$0xff]   ;;  %v2124_v29 = vld [vmem:[%s2197_s19 + $0xe8] sm:$0xff]   ;;  %v2126_v31 = vld [vmem:[%s2197_s19 + $0xf0] sm:$0xff]  }
  0x1b   : > { %2010 = vmatmul.mubr.msk.bf16.gmra.mrb[4].mxu0 %vm571_vm1, %v2103_v8  ;;  %v2127_v32 = vld [vmem:[%s2197_s19 + $0x78] sm:$0xff]  }
  0x1c   : > { %2042 = vmatmul.mubr.msk.bf16.gmra.mrb[4].mxu1 %vm571_vm1, %v2104_v9  ;;  %2013 = vmatprep.mubr.msk.bf16.mxu0 %vm571_vm1, %v2105_v10  ;;  %v2128_v33 = vld [vmem:[%s2197_s19 + $0xf8] sm:$0xff]  }
  0x1d   : > { %2045 = vmatprep.mubr.msk.bf16.mxu1 %vm571_vm1, %v2106_v11 }
  0x23   : > { %2014 = vmatmul.mubr.msk.bf16.gmra.mrb[8].mxu0 %vm571_vm1, %v2107_v12 }
  0x24   : > { %2046 = vmatmul.mubr.msk.bf16.gmra.mrb[8].mxu1 %vm571_vm1, %v2108_v13  ;;  %2017 = vmatprep.mubr.msk.bf16.mxu0 %vm571_vm1, %v2109_v14 }
  0x25   : > { %2049 = vmatprep.mubr.msk.bf16.mxu1 %vm571_vm1, %v2110_v15 }
  0x2b   : > { %2018 = vmatmul.mubr.msk.bf16.gmra.mrb[12].mxu0 %vm571_vm1, %v2111_v16 }
  0x2c   : > { %2050 = vmatmul.mubr.msk.bf16.gmra.mrb[12].mxu1 %vm571_vm1, %v2112_v17  ;;  %2021 = vmatprep.mubr.msk.bf16.mxu0 %vm571_vm1, %v2113_v18 }
  0x2d   : > { %2053 = vmatprep.mubr.msk.bf16.mxu1 %vm571_vm1, %v2114_v19 }
  0x33   : > { %2022 = vmatmul.mubr.msk.bf16.gmra.mrb[16].mxu0 %vm571_vm1, %v2115_v20 }
  0x34   : > { %2054 = vmatmul.mubr.msk.bf16.gmra.mrb[16].mxu1 %vm571_vm1, %v2116_v21  ;;  %2025 = vmatprep.mubr.msk.bf16.mxu0 %vm571_vm1, %v2117_v22 }
  0x35   : > { %2057 = vmatprep.mubr.msk.bf16.mxu1 %vm571_vm1, %v2118_v23 }
  0x3b   : > { %2026 = vmatmul.mubr.msk.bf16.gmra.mrb[20].mxu0 %vm571_vm1, %v2119_v24 }
  0x3c   : > { %2058 = vmatmul.mubr.msk.bf16.gmra.mrb[20].mxu1 %vm571_vm1, %v2120_v25  ;;  %2029 = vmatprep.mubr.msk.bf16.mxu0 %vm571_vm1, %v2121_v26 }
  0x3d   : > { %2061 = vmatprep.mubr.msk.bf16.mxu1 %vm571_vm1, %v2122_v27 }
  0x43   : > { %2030 = vmatmul.mubr.msk.bf16.gmra.mrb[24].mxu0 %vm571_vm1, %v2123_v28 }
  0x44   : > { %2062 = vmatmul.mubr.msk.bf16.gmra.mrb[24].mxu1 %vm571_vm1, %v2124_v29  ;;  %2033 = vmatprep.mubr.msk.bf16.mxu0 %vm571_vm1, %v2125_v30 }
  0x45   : > { %2065 = vmatprep.mubr.msk.bf16.mxu1 %vm571_vm1, %v2126_v31 }
  0x4b   : > { %2034 = vmatmul.mubr.msk.bf16.gmra.mrb[28].mxu0 %vm571_vm1, %v2127_v32 }
  0x4c   : > { %2066 = vmatmul.mubr.msk.bf16.gmra.mrb[28].mxu1 %vm571_vm1, %v2128_v33 }
  0xe6   : > { %v2007_v34 = vpop.f32.mrb[0].mxu0 }
  0xe7   : > { %v2039_v35 = vpop.f32.mrb[0].mxu1  ;;  %v706_v36 = vpop.f32.mrb[1].mxu0 }
  0xe8   : > { %v834_v37 = vpop.f32.mrb[1].mxu1  ;;  %v2008_v38 = vpop.f32.mrb[2].mxu0 }
  0xe9   : > { %v1787_v39 = vpack.c.bf16 %v2008_v38, %v2007_v34  ;;  %v2040_v40 = vpop.f32.mrb[2].mxu1  ;;  %v709_v41 = vpop.f32.mrb[3].mxu0 }
  0xea   : > { %v1867_v42 = vpack.c.bf16 %v2040_v40, %v2039_v35  ;;  %v1782_v43 = vpack.c.bf16 %v709_v41, %v706_v36  ;;  %v837_v44 = vpop.f32.mrb[3].mxu1 }
  0xeb   : > { %1939 = vst [vmem:[%s2268_s22 + $0x8] sm:$0xff] %v1787_v39   ;;  %v1862_v45 = vpack.c.bf16 %v837_v44, %v834_v37 }
  0xec   : > { %1955 = vst [vmem:[%s2268_s22 + $0x88] sm:$0xff] %v1867_v42   ;;  %1783 = vst [vmem:[%s2268_s22] sm:$0xff] %v1782_v43  }
  0xed   : > { %1954 = vst [vmem:[%s2268_s22 + $0x80] sm:$0xff] %v1862_v45  }
  0xee   : > { %v2011_v46 = vpop.f32.mrb[4].mxu0 }
  0xef   : > { %v2043_v47 = vpop.f32.mrb[4].mxu1  ;;  %v722_v48 = vpop.f32.mrb[5].mxu0 }
  0xf0   : > { %v850_v49 = vpop.f32.mrb[5].mxu1  ;;  %v2012_v50 = vpop.f32.mrb[6].mxu0 }
  0xf1   : > { %v1797_v51 = vpack.c.bf16 %v2012_v50, %v2011_v46  ;;  %v2044_v52 = vpop.f32.mrb[6].mxu1  ;;  %v725_v53 = vpop.f32.mrb[7].mxu0 }
  0xf2   : > { %v1877_v54 = vpack.c.bf16 %v2044_v52, %v2043_v47  ;;  %v1792_v55 = vpack.c.bf16 %v725_v53, %v722_v48  ;;  %v853_v56 = vpop.f32.mrb[7].mxu1 }
  0xf3   : > { %1941 = vst [vmem:[%s2268_s22 + $0x18] sm:$0xff] %v1797_v51   ;;  %v1872_v57 = vpack.c.bf16 %v853_v56, %v850_v49 }
  0xf4   : > { %1957 = vst [vmem:[%s2268_s22 + $0x98] sm:$0xff] %v1877_v54   ;;  %1940 = vst [vmem:[%s2268_s22 + $0x10] sm:$0xff] %v1792_v55  }
  0xf5   : > { %1956 = vst [vmem:[%s2268_s22 + $0x90] sm:$0xff] %v1872_v57  }
  0xf6   : > { %v2015_v58 = vpop.f32.mrb[8].mxu0 }
  0xf7   : > { %v2047_v59 = vpop.f32.mrb[8].mxu1  ;;  %v738_v60 = vpop.f32.mrb[9].mxu0 }
  0xf8   : > { %v866_v61 = vpop.f32.mrb[9].mxu1  ;;  %v2016_v62 = vpop.f32.mrb[10].mxu0 }
  0xf9   : > { %v1807_v63 = vpack.c.bf16 %v2016_v62, %v2015_v58  ;;  %v2048_v0 = vpop.f32.mrb[10].mxu1  ;;  %v741_v1 = vpop.f32.mrb[11].mxu0 }
  0xfa   : > { %v1887_v2 = vpack.c.bf16 %v2048_v0, %v2047_v59  ;;  %v1802_v3 = vpack.c.bf16 %v741_v1, %v738_v60  ;;  %v869_v4 = vpop.f32.mrb[11].mxu1 }
  0xfb   : > { %1943 = vst [vmem:[%s2268_s22 + $0x28] sm:$0xff] %v1807_v63   ;;  %v1882_v5 = vpack.c.bf16 %v869_v4, %v866_v61 }
  0xfc   : > { %1959 = vst [vmem:[%s2268_s22 + $0xa8] sm:$0xff] %v1887_v2   ;;  %1942 = vst [vmem:[%s2268_s22 + $0x20] sm:$0xff] %v1802_v3  }
  0xfd   : > { %1958 = vst [vmem:[%s2268_s22 + $0xa0] sm:$0xff] %v1882_v5  }
  0xfe   : > { %v2019_v6 = vpop.f32.mrb[12].mxu0 }
  0xff   : > { %v2051_v7 = vpop.f32.mrb[12].mxu1  ;;  %v754_v8 = vpop.f32.mrb[13].mxu0 }
 0x100   : > { %v882_v9 = vpop.f32.mrb[13].mxu1  ;;  %v2020_v10 = vpop.f32.mrb[14].mxu0 }
 0x101   : > { %v1817_v11 = vpack.c.bf16 %v2020_v10, %v2019_v6  ;;  %v2052_v12 = vpop.f32.mrb[14].mxu1  ;;  %v757_v13 = vpop.f32.mrb[15].mxu0 }
 0x102   : > { %v1897_v14 = vpack.c.bf16 %v2052_v12, %v2051_v7  ;;  %v1812_v15 = vpack.c.bf16 %v757_v13, %v754_v8  ;;  %v885_v16 = vpop.f32.mrb[15].mxu1 }
 0x103   : > { %1945 = vst [vmem:[%s2268_s22 + $0x38] sm:$0xff] %v1817_v11   ;;  %v1892_v17 = vpack.c.bf16 %v885_v16, %v882_v9 }
 0x104   : > { %1961 = vst [vmem:[%s2268_s22 + $0xb8] sm:$0xff] %v1897_v14   ;;  %1944 = vst [vmem:[%s2268_s22 + $0x30] sm:$0xff] %v1812_v15  }
 0x105   : > { %1960 = vst [vmem:[%s2268_s22 + $0xb0] sm:$0xff] %v1892_v17  }
 0x106   : > { %v2023_v18 = vpop.f32.mrb[16].mxu0 }
 0x107   : > { %v2055_v19 = vpop.f32.mrb[16].mxu1  ;;  %v770_v20 = vpop.f32.mrb[17].mxu0 }
 0x108   : > { %v898_v21 = vpop.f32.mrb[17].mxu1  ;;  %v2024_v22 = vpop.f32.mrb[18].mxu0 }
 0x109   : > { %v1827_v23 = vpack.c.bf16 %v2024_v22, %v2023_v18  ;;  %v2056_v24 = vpop.f32.mrb[18].mxu1  ;;  %v773_v25 = vpop.f32.mrb[19].mxu0 }
 0x10a   : > { %v1907_v26 = vpack.c.bf16 %v2056_v24, %v2055_v19  ;;  %v1822_v27 = vpack.c.bf16 %v773_v25, %v770_v20  ;;  %v901_v28 = vpop.f32.mrb[19].mxu1 }
 0x10b   : > { %1947 = vst [vmem:[%s2268_s22 + $0x48] sm:$0xff] %v1827_v23   ;;  %v1902_v29 = vpack.c.bf16 %v901_v28, %v898_v21 }
 0x10c   : > { %1963 = vst [vmem:[%s2268_s22 + $0xc8] sm:$0xff] %v1907_v26   ;;  %1946 = vst [vmem:[%s2268_s22 + $0x40] sm:$0xff] %v1822_v27  }
 0x10d   : > { %1962 = vst [vmem:[%s2268_s22 + $0xc0] sm:$0xff] %v1902_v29  }
 0x10e   : > { %v2027_v30 = vpop.f32.mrb[20].mxu0 }
 0x10f   : > { %v2059_v31 = vpop.f32.mrb[20].mxu1  ;;  %v786_v32 = vpop.f32.mrb[21].mxu0 }
 0x110   : > { %v914_v33 = vpop.f32.mrb[21].mxu1  ;;  %v2028_v34 = vpop.f32.mrb[22].mxu0 }
 0x111   : > { %v1837_v35 = vpack.c.bf16 %v2028_v34, %v2027_v30  ;;  %v2060_v36 = vpop.f32.mrb[22].mxu1  ;;  %v789_v37 = vpop.f32.mrb[23].mxu0 }
 0x112   : > { %v1917_v38 = vpack.c.bf16 %v2060_v36, %v2059_v31  ;;  %v1832_v39 = vpack.c.bf16 %v789_v37, %v786_v32  ;;  %v917_v40 = vpop.f32.mrb[23].mxu1 }
 0x113   : > { %1949 = vst [vmem:[%s2268_s22 + $0x58] sm:$0xff] %v1837_v35   ;;  %v1912_v41 = vpack.c.bf16 %v917_v40, %v914_v33 }
 0x114   : > { %1965 = vst [vmem:[%s2268_s22 + $0xd8] sm:$0xff] %v1917_v38   ;;  %1948 = vst [vmem:[%s2268_s22 + $0x50] sm:$0xff] %v1832_v39  }
 0x115   : > { %1964 = vst [vmem:[%s2268_s22 + $0xd0] sm:$0xff] %v1912_v41  }
 0x116   : > { %v2031_v42 = vpop.f32.mrb[24].mxu0 }
 0x117   : > { %v2063_v43 = vpop.f32.mrb[24].mxu1  ;;  %v802_v44 = vpop.f32.mrb[25].mxu0 }
 0x118   : > { %v930_v45 = vpop.f32.mrb[25].mxu1  ;;  %v2032_v46 = vpop.f32.mrb[26].mxu0 }
 0x119   : > { %v1847_v47 = vpack.c.bf16 %v2032_v46, %v2031_v42  ;;  %v2064_v48 = vpop.f32.mrb[26].mxu1  ;;  %v805_v49 = vpop.f32.mrb[27].mxu0 }
 0x11a   : > { %v1927_v50 = vpack.c.bf16 %v2064_v48, %v2063_v43  ;;  %v1842_v51 = vpack.c.bf16 %v805_v49, %v802_v44  ;;  %v933_v52 = vpop.f32.mrb[27].mxu1 }
 0x11b   : > { %1951 = vst [vmem:[%s2268_s22 + $0x68] sm:$0xff] %v1847_v47   ;;  %v1922_v53 = vpack.c.bf16 %v933_v52, %v930_v45 }
 0x11c   : > { %1967 = vst [vmem:[%s2268_s22 + $0xe8] sm:$0xff] %v1927_v50   ;;  %1950 = vst [vmem:[%s2268_s22 + $0x60] sm:$0xff] %v1842_v51  }
 0x11d   : > { %1966 = vst [vmem:[%s2268_s22 + $0xe0] sm:$0xff] %v1922_v53  }
 0x11e   : > { %v2035_v54 = vpop.f32.mrb[28].mxu0 }
 0x11f   : > { %v2067_v55 = vpop.f32.mrb[28].mxu1  ;;  %v818_v56 = vpop.f32.mrb[29].mxu0 }
 0x120   : > { %v946_v57 = vpop.f32.mrb[29].mxu1  ;;  %v2036_v58 = vpop.f32.mrb[30].mxu0 }
 0x121   : > { %v1857_v59 = vpack.c.bf16 %v2036_v58, %v2035_v54  ;;  %v2068_v60 = vpop.f32.mrb[30].mxu1  ;;  %v821_v61 = vpop.f32.mrb[31].mxu0 }
 0x122   : > { %v1937_v62 = vpack.c.bf16 %v2068_v60, %v2067_v55  ;;  %v1852_v63 = vpack.c.bf16 %v821_v61, %v818_v56  ;;  %v949_v0 = vpop.f32.mrb[31].mxu1 }
 0x123   : > { %1953 = vst [vmem:[%s2268_s22 + $0x78] sm:$0xff] %v1857_v59   ;;  %v1932_v1 = vpack.c.bf16 %v949_v0, %v946_v57 }
 0x124   : > { %1969 = vst [vmem:[%s2268_s22 + $0xf8] sm:$0xff] %v1937_v62   ;;  %1952 = vst [vmem:[%s2268_s22 + $0x70] sm:$0xff] %v1852_v63  }
 0x125   : > { %1968 = vst [vmem:[%s2268_s22 + $0xf0] sm:$0xff] %v1932_v1  }
 0x126 PF: > { %s12_s11 = sadd.s32 1, %s2151_s11   ;;  %s2314_s9 = smov %s2147_s10 }
 0x127   : > { %p9_p5 = scmp.ge.s32.totalorder %s12_s11, 18   ;;  %s2315_s10 = smov %s2317_s12 }
 0x129   :  { %11 = sbr.rel (!%p9_p5) target bundleno = 2 (0x2), region = 69 }

</bundles_post_ra>
